<compile_context>
chip_gen: v5e
topology: v5e:2x2
jax: 0.10.0
libtpu: 0.0.40
codegen_flags: <defaults>
</compile_context>

<pallas_src>
import numpy as np

import jax
import jax.numpy as jnp
from jax import lax
from jax.experimental import pallas as pl
from jax.experimental.pallas import tpu as pltpu

NEG_SLOPE = 0.01  # F.leaky_relu default

# ------------------------------------------------------------------------------ config
CONV_CHANNELS = (16, 32, 64)
HIDDEN = (64, 32, 16)
INPUT_DIMS = (32, 32, 1)        # small test config (module default is 256x256x1)
OUTPUT_DIMS = 10
KSIZE = (8, 6, 5)
PAD = (2, 2, 2)


def adaptive_bins(in_size, out_size):
    """PyTorch adaptive-pool bin boundaries: [floor(o*I/O), ceil((o+1)*I/O))."""
    return tuple(((o * in_size) // out_size, -((-((o + 1) * in_size)) // out_size))
                 for o in range(out_size))


def _geometry():
    H, W, _ = INPUT_DIMS
    K1, K2, K3 = KSIZE
    P1, P2, P3 = PAD
    g = {}
    g["HP1"], g["WP1"] = H + 2 * P1, W + 2 * P1
    g["HO1"], g["WO1"] = g["HP1"] - K1 + 1, g["WP1"] - K1 + 1
    g["Q1H"], g["Q1W"] = H // 4, W // 4
    g["HP2"], g["WP2"] = g["Q1H"] + 2 * P2, g["Q1W"] + 2 * P2
    g["HO2"], g["WO2"] = g["HP2"] - K2 + 1, g["WP2"] - K2 + 1
    g["Q2H"], g["Q2W"] = H // 8, W // 8
    g["HP3"], g["WP3"] = g["Q2H"] + 2 * P3, g["Q2W"] + 2 * P3
    g["HO3"], g["WO3"] = g["HP3"] - K3 + 1, g["WP3"] - K3 + 1
    g["Q3H"], g["Q3W"] = H // 16, W // 16
    return g


G = _geometry()


# -------------------------------------------------------------------- in-kernel helpers
def _leaky(y):
    return jnp.where(y >= 0, y, NEG_SLOPE * y)


def _conv_banded(x, band_ref, bias_ref, kh, ho):
    """LeakyReLU(bias + sum_dy x[dy:dy+ho, :] @ band[dy]).

    x:        (Hp, Wp*Cin)          channels-last, (w, c) interleaved on lanes
    band_ref: (KH, Wp*Cin, Wo*Cout) precomputed banded conv weights
    bias_ref: (1, Wo*Cout)
    """
    acc = jnp.dot(x[0:ho, :], band_ref[0], preferred_element_type=jnp.float32)
    for dy in range(1, kh):
        acc = acc + jnp.dot(x[dy:dy + ho, :], band_ref[dy],
                            preferred_element_type=jnp.float32)
    return _leaky(acc + bias_ref[...])


def _max_over_rows(y, bins):
    """Adaptive max over the H (row) dimension with static bins."""
    rows = [jnp.max(y[s:e, :], axis=0, keepdims=True) for (s, e) in bins]
    return jnp.concatenate(rows, axis=0)


def _max_over_lane_groups(a, bins, c):
    """Adaptive max over the W dimension; lanes are ordered (w*c + channel)."""
    out = []
    for (s, e) in bins:
        m = a[:, s * c:(s + 1) * c]
        for w in range(s + 1, e):
            m = jnp.maximum(m, a[:, w * c:(w + 1) * c])
        out.append(m)
    return out


# -------------------------------------------------------------------------- the kernel
def _observer_kernel(img_ref,
                     band1_ref, bias1_ref, p1h_ref, p1w_ref,
                     band2_ref, bias2_ref,
                     band3_ref, bias3_ref,
                     fc1w_ref, fc1b_ref, fc2w_ref, fc2b_ref,
                     fc3w_ref, fc3b_ref, fc4w_ref, fc4b_ref,
                     out_ref):
    C1, C2, C3 = CONV_CHANNELS
    K1, K2, K3 = KSIZE
    P3 = PAD[2]
    f32 = jnp.float32

    # conv1 + LeakyReLU: 8 banded matmuls on the MXU
    x1 = img_ref[0]                                                   # (HP1, WP1)
    y1 = _conv_banded(x1, band1_ref, bias1_ref, K1, G["HO1"])         # (HO1, WO1*C1)

    # pool1: AdaptiveAvgPool2d + zero-pad re-embedding for conv2, as two matmuls
    x2 = jnp.dot(jnp.dot(p1h_ref[...], y1, preferred_element_type=f32),
                 p1w_ref[...], preferred_element_type=f32)            # (HP2, WP2*C1)

    # conv2 + LeakyReLU
    y2 = _conv_banded(x2, band2_ref, bias2_ref, K2, G["HO2"])         # (HO2, WO2*C2)

    # pool2: AdaptiveMaxPool2d, then embed into conv3's zero-padded layout
    a2 = _max_over_rows(y2, adaptive_bins(G["HO2"], G["Q2H"]))        # (Q2H, WO2*C2)
    blk2 = _max_over_lane_groups(a2, adaptive_bins(G["WO2"], G["Q2W"]), C2)
    zcol = jnp.zeros((G["Q2H"], P3 * C2), f32)
    x3_mid = jnp.concatenate([zcol] + blk2 + [zcol], axis=1)          # (Q2H, WP3*C2)
    zrow = jnp.zeros((P3, G["WP3"] * C2), f32)
    x3 = jnp.concatenate([zrow, x3_mid, zrow], axis=0)                # (HP3, WP3*C2)

    # conv3 + LeakyReLU
    y3 = _conv_banded(x3, band3_ref, bias3_ref, K3, G["HO3"])         # (HO3, WO3*C3)

    # pool3: AdaptiveMaxPool2d
    a3 = _max_over_rows(y3, adaptive_bins(G["HO3"], G["Q3H"]))        # (Q3H, WO3*C3)
    blk3 = _max_over_lane_groups(a3, adaptive_bins(G["WO3"], G["Q3W"]), C3)
    pooled = jnp.concatenate(blk3, axis=1)                            # (Q3H, Q3W*C3)

    # MLP head; fc1 consumes the pooled rows directly (weights pre-permuted to match).
    # TODO(synk): Dropout2d / Dropout are stochastic only in train mode; identity here.
    h = fc1b_ref[...]
    for oh in range(G["Q3H"]):
        h = h + jnp.dot(pooled[oh:oh + 1, :], fc1w_ref[oh],
                        preferred_element_type=f32)
    h = _leaky(h)
    h = _leaky(jnp.dot(h, fc2w_ref[...], preferred_element_type=f32) + fc2b_ref[...])
    h = _leaky(jnp.dot(h, fc3w_ref[...], preferred_element_type=f32) + fc3b_ref[...])
    logits = jnp.dot(h, fc4w_ref[...], preferred_element_type=f32) + fc4b_ref[...]
    out_ref[0] = logits                                               # (1, OUTPUT_DIMS)


# ------------------------------------------------------------ parameters (PyTorch layout)
def init_params(key):
    """Deterministic synthetic parameters in PyTorch layouts."""
    C1, C2, C3 = CONV_CHANNELS
    H1, H2, H3 = HIDDEN
    K1, K2, K3 = KSIZE
    CIN = INPUT_DIMS[2]
    fc1_in = C3 * (INPUT_DIMS[0] // 16) * (INPUT_DIMS[1] // 16)
    keys = jax.random.split(key, 14)

    def w(k, shape, fan_in):
        return jax.random.normal(k, shape, jnp.float32) / np.sqrt(float(fan_in))

    return {
        "conv1_w": w(keys[0], (C1, CIN, K1, K1), CIN * K1 * K1),
        "conv1_b": w(keys[1], (C1,), CIN * K1 * K1),
        "conv2_w": w(keys[2], (C2, C1, K2, K2), C1 * K2 * K2),
        "conv2_b": w(keys[3], (C2,), C1 * K2 * K2),
        "conv3_w": w(keys[4], (C3, C2, K3, K3), C2 * K3 * K3),
        "conv3_b": w(keys[5], (C3,), C2 * K3 * K3),
        "fc1_w": w(keys[6], (H1, fc1_in), fc1_in),
        "fc1_b": w(keys[7], (H1,), fc1_in),
        "fc2_w": w(keys[8], (H2, H1), H1),
        "fc2_b": w(keys[9], (H2,), H1),
        "fc3_w": w(keys[10], (H3, H2), H2),
        "fc3_b": w(keys[11], (H3,), H2),
        "fc4_w": w(keys[12], (OUTPUT_DIMS, H3), H3),
        "fc4_b": w(keys[13], (OUTPUT_DIMS,), H3),
    }


# ----------------------------------------------- one-time host-side parameter preparation
def _banded_conv_weights(w_oihw, wp, wo):
    """B[dy][wi*Cin+ci, o*Cout+co] = W[co, ci, dy, wi-o] (0 <= wi-o < KW), else 0."""
    w = np.asarray(w_oihw, np.float32)
    cout, cin, kh, kw = w.shape
    band = np.zeros((kh, wp * cin, wo * cout), np.float32)
    for dy in range(kh):
        for o in range(wo):
            for dx in range(kw):
                wi = o + dx
                band[dy, wi * cin:(wi + 1) * cin, o * cout:(o + 1) * cout] = w[:, :, dy, dx].T
    return jnp.asarray(band)


def _bias_row(b, wo):
    return jnp.asarray(np.tile(np.asarray(b, np.float32)[None, :], (1, wo)))


def _avg_pool_mats(hi, wi, oh, ow, c, pad_next):
    """P_h @ Y @ P_w adaptive-avg-pools (hi,wi)->(oh,ow) per channel and re-embeds the
    result into the next conv's zero-padded (h, w*c) layout."""
    hb, wb = adaptive_bins(hi, oh), adaptive_bins(wi, ow)
    ph = np.zeros((oh + 2 * pad_next, hi), np.float32)
    for o, (s, e) in enumerate(hb):
        ph[o + pad_next, s:e] = 1.0 / (e - s)
    pw = np.zeros((wi * c, (ow + 2 * pad_next) * c), np.float32)
    for o, (s, e) in enumerate(wb):
        for w in range(s, e):
            for ch in range(c):
                pw[w * c + ch, (o + pad_next) * c + ch] = 1.0 / (e - s)
    return jnp.asarray(ph), jnp.asarray(pw)


def prepare_params(p):
    """Re-layout PyTorch-style parameters into the shapes the fused kernel consumes."""
    C1, C2, C3 = CONV_CHANNELS
    kp = {
        "band1": _banded_conv_weights(p["conv1_w"], G["WP1"], G["WO1"]),
        "bias1": _bias_row(p["conv1_b"], G["WO1"]),
        "band2": _banded_conv_weights(p["conv2_w"], G["WP2"], G["WO2"]),
        "bias2": _bias_row(p["conv2_b"], G["WO2"]),
        "band3": _banded_conv_weights(p["conv3_w"], G["WP3"], G["WO3"]),
        "bias3": _bias_row(p["conv3_b"], G["WO3"]),
    }
    kp["p1h"], kp["p1w"] = _avg_pool_mats(G["HO1"], G["WO1"], G["Q1H"], G["Q1W"], C1, PAD[1])
    # fc1: PyTorch flattens (C3, Q3H, Q3W) as c*Q3H*Q3W + oh*Q3W + ow; the kernel's
    # pooled activation row `oh` has lanes ordered (ow*C3 + c) -> permute weight rows.
    w1 = np.asarray(p["fc1_w"], np.float32)
    fc1w = np.zeros((G["Q3H"], G["Q3W"] * C3, w1.shape[0]), np.float32)
    for oh in range(G["Q3H"]):
        for ow in range(G["Q3W"]):
            for c in range(C3):
                fc1w[oh, ow * C3 + c, :] = w1[:, c * G["Q3H"] * G["Q3W"] + oh * G["Q3W"] + ow]
    kp["fc1w"] = jnp.asarray(fc1w)
    kp["fc1b"] = jnp.asarray(np.asarray(p["fc1_b"], np.float32)[None, :])
    kp["fc2w"] = jnp.asarray(np.asarray(p["fc2_w"], np.float32).T)
    kp["fc2b"] = jnp.asarray(np.asarray(p["fc2_b"], np.float32)[None, :])
    kp["fc3w"] = jnp.asarray(np.asarray(p["fc3_w"], np.float32).T)
    kp["fc3b"] = jnp.asarray(np.asarray(p["fc3_b"], np.float32)[None, :])
    kp["fc4w"] = jnp.asarray(np.asarray(p["fc4_w"], np.float32).T)
    kp["fc4b"] = jnp.asarray(np.asarray(p["fc4_b"], np.float32)[None, :])
    return kp


# ------------------------------------------------------------------------------ wrapper
_KP_ORDER = ("band1", "bias1", "p1h", "p1w", "band2", "bias2", "band3", "bias3",
             "fc1w", "fc1b", "fc2w", "fc2b", "fc3w", "fc3b", "fc4w", "fc4b")


def _const_spec(shape):
    zeros = (0,) * len(shape)
    return pl.BlockSpec(shape, lambda n: zeros)


@jax.jit
def observer_forward(kparams, img):
    """Fused ObserverNetwork forward. img: (N, 1, H, W) float32 -> (N, OUTPUT_DIMS)."""
    n = img.shape[0]
    pad = PAD[0]
    x = jnp.pad(img[:, 0].astype(jnp.float32), ((0, 0), (pad, pad), (pad, pad)))
    weights = tuple(kparams[k] for k in _KP_ORDER)
    in_specs = [pl.BlockSpec((1, G["HP1"], G["WP1"]), lambda b: (b, 0, 0))]
    in_specs += [_const_spec(w.shape) for w in weights]
    out = pl.pallas_call(
        _observer_kernel,
        grid=(n,),
        in_specs=in_specs,
        out_specs=pl.BlockSpec((1, 1, OUTPUT_DIMS), lambda b: (b, 0, 0)),
        out_shape=jax.ShapeDtypeStruct((n, 1, OUTPUT_DIMS), jnp.float32),
        compiler_params=pltpu.CompilerParams(
            dimension_semantics=("parallel",),     # v7x: the two TensorCores split batch
            vmem_limit_bytes=32 * 1024 * 1024,
        ),
    )(x, *weights)
    return out[:, 0, :]


# ----------------------------------------------------------- plain-XLA reference (check)
def reference_forward(p, img):
    hi = lax.Precision.HIGHEST

    def conv(x, w, b, pad):
        y = lax.conv_general_dilated(x, w, (1, 1), [(pad, pad), (pad, pad)],
                                     dimension_numbers=("NCHW", "OIHW", "NCHW"),
                                     precision=hi)
        return y + b.reshape(1, -1, 1, 1)

    def apool(x, out_hw, mode):
        _, _, h, w = x.shape
        hb, wb = adaptive_bins(h, out_hw[0]), adaptive_bins(w, out_hw[1])
        rows = []
        for (hs, he) in hb:
            cols = []
            for (ws, we) in wb:
                seg = x[:, :, hs:he, ws:we]
                cols.append(jnp.max(seg, axis=(2, 3)) if mode == "max"
                            else jnp.mean(seg, axis=(2, 3)))
            rows.append(jnp.stack(cols, axis=-1))
        return jnp.stack(rows, axis=-2)

    x = img.astype(jnp.float32)
    x = _leaky(conv(x, p["conv1_w"], p["conv1_b"], PAD[0]))
    x = apool(x, (G["Q1H"], G["Q1W"]), "avg")
    x = _leaky(conv(x, p["conv2_w"], p["conv2_b"], PAD[1]))
    x = apool(x, (G["Q2H"], G["Q2W"]), "max")
    x = _leaky(conv(x, p["conv3_w"], p["conv3_b"], PAD[2]))
    x = apool(x, (G["Q3H"], G["Q3W"]), "max")
    x = x.reshape(x.shape[0], -1)
    x = _leaky(jnp.dot(x, p["fc1_w"].T, precision=hi) + p["fc1_b"])
    x = _leaky(jnp.dot(x, p["fc2_w"].T, precision=hi) + p["fc2_b"])
    x = _leaky(jnp.dot(x, p["fc3_w"].T, precision=hi) + p["fc3_b"])
    return jnp.dot(x, p["fc4_w"].T, precision=hi) + p["fc4_b"]


if __name__ == "__main__":
    key = jax.random.PRNGKey(0)
    pkey, xkey = jax.random.split(key)

    params = init_params(pkey)
    kparams = prepare_params(params)     # one-time weight re-layout (not per call)

    batch = 2
    img = jax.random.normal(xkey, (batch, 1, INPUT_DIMS[0], INPUT_DIMS[1]), jnp.float32)

    logits = jax.block_until_ready(observer_forward(kparams, img))
    assert logits.shape == (batch, OUTPUT_DIMS), logits.shape
    assert bool(jnp.all(jnp.isfinite(logits)))

    ref = jax.block_until_ready(reference_forward(params, img))
    err = float(jnp.max(jnp.abs(logits - ref)))
    assert err < 5e-2, f"kernel/reference mismatch: max abs err = {err}"

    print("KERNEL_OK")
</pallas_src>

<mosaic_0001>
module attributes {stable_mosaic.version = 11 : i64} {
  func.func @_observer_kernel(%arg0: i32, %arg1: memref<1x36x36xf32, #tpu.memory_space<vmem>>, %arg2: memref<8x36x464xf32, #tpu.memory_space<vmem>>, %arg3: memref<1x464xf32, #tpu.memory_space<vmem>>, %arg4: memref<12x29xf32, #tpu.memory_space<vmem>>, %arg5: memref<464x192xf32, #tpu.memory_space<vmem>>, %arg6: memref<6x192x224xf32, #tpu.memory_space<vmem>>, %arg7: memref<1x224xf32, #tpu.memory_space<vmem>>, %arg8: memref<5x256x256xf32, #tpu.memory_space<vmem>>, %arg9: memref<1x256xf32, #tpu.memory_space<vmem>>, %arg10: memref<2x128x64xf32, #tpu.memory_space<vmem>>, %arg11: memref<1x64xf32, #tpu.memory_space<vmem>>, %arg12: memref<64x32xf32, #tpu.memory_space<vmem>>, %arg13: memref<1x32xf32, #tpu.memory_space<vmem>>, %arg14: memref<32x16xf32, #tpu.memory_space<vmem>>, %arg15: memref<1x16xf32, #tpu.memory_space<vmem>>, %arg16: memref<16x10xf32, #tpu.memory_space<vmem>>, %arg17: memref<1x10xf32, #tpu.memory_space<vmem>>, %arg18: memref<1x1x10xf32, #tpu.memory_space<vmem>>) attributes {dimension_semantics = [#tpu.dimension_semantics<parallel>], iteration_bounds = array<i64: 2>, scalar_prefetch = 0 : i64, scratch_operands = 0 : i64, tpu.core_type = #tpu.core_type<tc>, window_params = [{transform_indices = @transform_0, window_bounds = array<i64: 1, 36, 36>}, {pipeline_mode = #tpu.pipeline_mode<synchronous>, transform_indices = @transform_1, window_bounds = array<i64: 8, 36, 464>}, {pipeline_mode = #tpu.pipeline_mode<synchronous>, transform_indices = @transform_2, window_bounds = array<i64: 1, 464>}, {pipeline_mode = #tpu.pipeline_mode<synchronous>, transform_indices = @transform_3, window_bounds = array<i64: 12, 29>}, {pipeline_mode = #tpu.pipeline_mode<synchronous>, transform_indices = @transform_4, window_bounds = array<i64: 464, 192>}, {pipeline_mode = #tpu.pipeline_mode<synchronous>, transform_indices = @transform_5, window_bounds = array<i64: 6, 192, 224>}, {pipeline_mode = #tpu.pipeline_mode<synchronous>, transform_indices = @transform_6, window_bounds = array<i64: 1, 224>}, {pipeline_mode = #tpu.pipeline_mode<synchronous>, transform_indices = @transform_7, window_bounds = array<i64: 5, 256, 256>}, {pipeline_mode = #tpu.pipeline_mode<synchronous>, transform_indices = @transform_8, window_bounds = array<i64: 1, 256>}, {pipeline_mode = #tpu.pipeline_mode<synchronous>, transform_indices = @transform_9, window_bounds = array<i64: 2, 128, 64>}, {pipeline_mode = #tpu.pipeline_mode<synchronous>, transform_indices = @transform_10, window_bounds = array<i64: 1, 64>}, {pipeline_mode = #tpu.pipeline_mode<synchronous>, transform_indices = @transform_11, window_bounds = array<i64: 64, 32>}, {pipeline_mode = #tpu.pipeline_mode<synchronous>, transform_indices = @transform_12, window_bounds = array<i64: 1, 32>}, {pipeline_mode = #tpu.pipeline_mode<synchronous>, transform_indices = @transform_13, window_bounds = array<i64: 32, 16>}, {pipeline_mode = #tpu.pipeline_mode<synchronous>, transform_indices = @transform_14, window_bounds = array<i64: 1, 16>}, {pipeline_mode = #tpu.pipeline_mode<synchronous>, transform_indices = @transform_15, window_bounds = array<i64: 16, 10>}, {pipeline_mode = #tpu.pipeline_mode<synchronous>, transform_indices = @transform_16, window_bounds = array<i64: 1, 10>}, {transform_indices = @transform_17, window_bounds = array<i64: 1, 1, 10>}]} {
    %c0 = arith.constant 0 : index
    %c0_0 = arith.constant 0 : index
    %c0_1 = arith.constant 0 : index
    %0 = vector.load %arg1[%c0, %c0_0, %c0_1] : memref<1x36x36xf32, #tpu.memory_space<vmem>>, vector<1x36x36xf32>
    %1 = vector.shape_cast %0 : vector<1x36x36xf32> to vector<36x36xf32>
    %2 = vector.extract_strided_slice %1 {offsets = [0, 0], sizes = [29, 36], strides = [1, 1]} : vector<36x36xf32> to vector<29x36xf32>
    %c0_2 = arith.constant 0 : index
    %c0_3 = arith.constant 0 : index
    %c0_4 = arith.constant 0 : index
    %3 = vector.load %arg2[%c0_2, %c0_3, %c0_4] : memref<8x36x464xf32, #tpu.memory_space<vmem>>, vector<1x36x464xf32>
    %4 = vector.shape_cast %3 : vector<1x36x464xf32> to vector<36x464xf32>
    %cst = arith.constant dense<0.000000e+00> : vector<29x464xf32>
    %5 = tpu.matmul %2, %4, %cst {dimension_numbers = #tpu.dot_dimension_numbers<[1], [0], [0], [1], [0, 0, 1, 1], [], []>} : vector<29x36xf32>, vector<36x464xf32>, vector<29x464xf32> -> vector<29x464xf32>
    %6 = vector.extract_strided_slice %1 {offsets = [1, 0], sizes = [29, 36], strides = [1, 1]} : vector<36x36xf32> to vector<29x36xf32>
    %c1 = arith.constant 1 : index
    %c0_5 = arith.constant 0 : index
    %c0_6 = arith.constant 0 : index
    %7 = vector.load %arg2[%c1, %c0_5, %c0_6] : memref<8x36x464xf32, #tpu.memory_space<vmem>>, vector<1x36x464xf32>
    %8 = vector.shape_cast %7 : vector<1x36x464xf32> to vector<36x464xf32>
    %cst_7 = arith.constant dense<0.000000e+00> : vector<29x464xf32>
    %9 = tpu.matmul %6, %8, %cst_7 {dimension_numbers = #tpu.dot_dimension_numbers<[1], [0], [0], [1], [0, 0, 1, 1], [], []>} : vector<29x36xf32>, vector<36x464xf32>, vector<29x464xf32> -> vector<29x464xf32>
    %10 = arith.addf %5, %9 : vector<29x464xf32>
    %11 = vector.extract_strided_slice %1 {offsets = [2, 0], sizes = [29, 36], strides = [1, 1]} : vector<36x36xf32> to vector<29x36xf32>
    %c2 = arith.constant 2 : index
    %c0_8 = arith.constant 0 : index
    %c0_9 = arith.constant 0 : index
    %12 = vector.load %arg2[%c2, %c0_8, %c0_9] : memref<8x36x464xf32, #tpu.memory_space<vmem>>, vector<1x36x464xf32>
    %13 = vector.shape_cast %12 : vector<1x36x464xf32> to vector<36x464xf32>
    %cst_10 = arith.constant dense<0.000000e+00> : vector<29x464xf32>
    %14 = tpu.matmul %11, %13, %cst_10 {dimension_numbers = #tpu.dot_dimension_numbers<[1], [0], [0], [1], [0, 0, 1, 1], [], []>} : vector<29x36xf32>, vector<36x464xf32>, vector<29x464xf32> -> vector<29x464xf32>
    %15 = arith.addf %10, %14 : vector<29x464xf32>
    %16 = vector.extract_strided_slice %1 {offsets = [3, 0], sizes = [29, 36], strides = [1, 1]} : vector<36x36xf32> to vector<29x36xf32>
    %c3 = arith.constant 3 : index
    %c0_11 = arith.constant 0 : index
    %c0_12 = arith.constant 0 : index
    %17 = vector.load %arg2[%c3, %c0_11, %c0_12] : memref<8x36x464xf32, #tpu.memory_space<vmem>>, vector<1x36x464xf32>
    %18 = vector.shape_cast %17 : vector<1x36x464xf32> to vector<36x464xf32>
    %cst_13 = arith.constant dense<0.000000e+00> : vector<29x464xf32>
    %19 = tpu.matmul %16, %18, %cst_13 {dimension_numbers = #tpu.dot_dimension_numbers<[1], [0], [0], [1], [0, 0, 1, 1], [], []>} : vector<29x36xf32>, vector<36x464xf32>, vector<29x464xf32> -> vector<29x464xf32>
    %20 = arith.addf %15, %19 : vector<29x464xf32>
    %21 = vector.extract_strided_slice %1 {offsets = [4, 0], sizes = [29, 36], strides = [1, 1]} : vector<36x36xf32> to vector<29x36xf32>
    %c4 = arith.constant 4 : index
    %c0_14 = arith.constant 0 : index
    %c0_15 = arith.constant 0 : index
    %22 = vector.load %arg2[%c4, %c0_14, %c0_15] : memref<8x36x464xf32, #tpu.memory_space<vmem>>, vector<1x36x464xf32>
    %23 = vector.shape_cast %22 : vector<1x36x464xf32> to vector<36x464xf32>
    %cst_16 = arith.constant dense<0.000000e+00> : vector<29x464xf32>
    %24 = tpu.matmul %21, %23, %cst_16 {dimension_numbers = #tpu.dot_dimension_numbers<[1], [0], [0], [1], [0, 0, 1, 1], [], []>} : vector<29x36xf32>, vector<36x464xf32>, vector<29x464xf32> -> vector<29x464xf32>
    %25 = arith.addf %20, %24 : vector<29x464xf32>
    %26 = vector.extract_strided_slice %1 {offsets = [5, 0], sizes = [29, 36], strides = [1, 1]} : vector<36x36xf32> to vector<29x36xf32>
    %c5 = arith.constant 5 : index
    %c0_17 = arith.constant 0 : index
    %c0_18 = arith.constant 0 : index
    %27 = vector.load %arg2[%c5, %c0_17, %c0_18] : memref<8x36x464xf32, #tpu.memory_space<vmem>>, vector<1x36x464xf32>
    %28 = vector.shape_cast %27 : vector<1x36x464xf32> to vector<36x464xf32>
    %cst_19 = arith.constant dense<0.000000e+00> : vector<29x464xf32>
    %29 = tpu.matmul %26, %28, %cst_19 {dimension_numbers = #tpu.dot_dimension_numbers<[1], [0], [0], [1], [0, 0, 1, 1], [], []>} : vector<29x36xf32>, vector<36x464xf32>, vector<29x464xf32> -> vector<29x464xf32>
    %30 = arith.addf %25, %29 : vector<29x464xf32>
    %31 = vector.extract_strided_slice %1 {offsets = [6, 0], sizes = [29, 36], strides = [1, 1]} : vector<36x36xf32> to vector<29x36xf32>
    %c6 = arith.constant 6 : index
    %c0_20 = arith.constant 0 : index
    %c0_21 = arith.constant 0 : index
    %32 = vector.load %arg2[%c6, %c0_20, %c0_21] : memref<8x36x464xf32, #tpu.memory_space<vmem>>, vector<1x36x464xf32>
    %33 = vector.shape_cast %32 : vector<1x36x464xf32> to vector<36x464xf32>
    %cst_22 = arith.constant dense<0.000000e+00> : vector<29x464xf32>
    %34 = tpu.matmul %31, %33, %cst_22 {dimension_numbers = #tpu.dot_dimension_numbers<[1], [0], [0], [1], [0, 0, 1, 1], [], []>} : vector<29x36xf32>, vector<36x464xf32>, vector<29x464xf32> -> vector<29x464xf32>
    %35 = arith.addf %30, %34 : vector<29x464xf32>
    %36 = vector.extract_strided_slice %1 {offsets = [7, 0], sizes = [29, 36], strides = [1, 1]} : vector<36x36xf32> to vector<29x36xf32>
    %c7 = arith.constant 7 : index
    %c0_23 = arith.constant 0 : index
    %c0_24 = arith.constant 0 : index
    %37 = vector.load %arg2[%c7, %c0_23, %c0_24] : memref<8x36x464xf32, #tpu.memory_space<vmem>>, vector<1x36x464xf32>
    %38 = vector.shape_cast %37 : vector<1x36x464xf32> to vector<36x464xf32>
    %cst_25 = arith.constant dense<0.000000e+00> : vector<29x464xf32>
    %39 = tpu.matmul %36, %38, %cst_25 {dimension_numbers = #tpu.dot_dimension_numbers<[1], [0], [0], [1], [0, 0, 1, 1], [], []>} : vector<29x36xf32>, vector<36x464xf32>, vector<29x464xf32> -> vector<29x464xf32>
    %40 = arith.addf %35, %39 : vector<29x464xf32>
    %c0_26 = arith.constant 0 : index
    %c0_27 = arith.constant 0 : index
    %41 = vector.load %arg3[%c0_26, %c0_27] : memref<1x464xf32, #tpu.memory_space<vmem>>, vector<1x464xf32>
    %42 = vector.broadcast %41 : vector<1x464xf32> to vector<29x464xf32>
    %43 = arith.addf %40, %42 : vector<29x464xf32>
    %cst_28 = arith.constant 0.000000e+00 : f32
    %44 = vector.broadcast %cst_28 : f32 to vector<29x464xf32>
    %45 = arith.cmpf oge, %43, %44 : vector<29x464xf32>
    %cst_29 = arith.constant 0.00999999977 : f32
    %46 = vector.broadcast %cst_29 : f32 to vector<29x464xf32>
    %47 = arith.mulf %46, %43 : vector<29x464xf32>
    %48 = arith.select %45, %43, %47 : vector<29x464xi1>, vector<29x464xf32>
    %c0_30 = arith.constant 0 : index
    %c0_31 = arith.constant 0 : index
    %49 = vector.load %arg4[%c0_30, %c0_31] : memref<12x29xf32, #tpu.memory_space<vmem>>, vector<12x29xf32>
    %cst_32 = arith.constant dense<0.000000e+00> : vector<12x464xf32>
    %50 = tpu.matmul %49, %48, %cst_32 {dimension_numbers = #tpu.dot_dimension_numbers<[1], [0], [0], [1], [0, 0, 1, 1], [], []>} : vector<12x29xf32>, vector<29x464xf32>, vector<12x464xf32> -> vector<12x464xf32>
    %c0_33 = arith.constant 0 : index
    %c0_34 = arith.constant 0 : index
    %51 = vector.load %arg5[%c0_33, %c0_34] : memref<464x192xf32, #tpu.memory_space<vmem>>, vector<464x192xf32>
    %cst_35 = arith.constant dense<0.000000e+00> : vector<12x192xf32>
    %52 = tpu.matmul %50, %51, %cst_35 {dimension_numbers = #tpu.dot_dimension_numbers<[1], [0], [0], [1], [0, 0, 1, 1], [], []>} : vector<12x464xf32>, vector<464x192xf32>, vector<12x192xf32> -> vector<12x192xf32>
    %53 = vector.extract_strided_slice %52 {offsets = [0, 0], sizes = [7, 192], strides = [1, 1]} : vector<12x192xf32> to vector<7x192xf32>
    %c0_36 = arith.constant 0 : index
    %c0_37 = arith.constant 0 : index
    %c0_38 = arith.constant 0 : index
    %54 = vector.load %arg6[%c0_36, %c0_37, %c0_38] : memref<6x192x224xf32, #tpu.memory_space<vmem>>, vector<1x192x224xf32>
    %55 = vector.shape_cast %54 : vector<1x192x224xf32> to vector<192x224xf32>
    %cst_39 = arith.constant dense<0.000000e+00> : vector<7x224xf32>
    %56 = tpu.matmul %53, %55, %cst_39 {dimension_numbers = #tpu.dot_dimension_numbers<[1], [0], [0], [1], [0, 0, 1, 1], [], []>} : vector<7x192xf32>, vector<192x224xf32>, vector<7x224xf32> -> vector<7x224xf32>
    %57 = vector.extract_strided_slice %52 {offsets = [1, 0], sizes = [7, 192], strides = [1, 1]} : vector<12x192xf32> to vector<7x192xf32>
    %c1_40 = arith.constant 1 : index
    %c0_41 = arith.constant 0 : index
    %c0_42 = arith.constant 0 : index
    %58 = vector.load %arg6[%c1_40, %c0_41, %c0_42] : memref<6x192x224xf32, #tpu.memory_space<vmem>>, vector<1x192x224xf32>
    %59 = vector.shape_cast %58 : vector<1x192x224xf32> to vector<192x224xf32>
    %cst_43 = arith.constant dense<0.000000e+00> : vector<7x224xf32>
    %60 = tpu.matmul %57, %59, %cst_43 {dimension_numbers = #tpu.dot_dimension_numbers<[1], [0], [0], [1], [0, 0, 1, 1], [], []>} : vector<7x192xf32>, vector<192x224xf32>, vector<7x224xf32> -> vector<7x224xf32>
    %61 = arith.addf %56, %60 : vector<7x224xf32>
    %62 = vector.extract_strided_slice %52 {offsets = [2, 0], sizes = [7, 192], strides = [1, 1]} : vector<12x192xf32> to vector<7x192xf32>
    %c2_44 = arith.constant 2 : index
    %c0_45 = arith.constant 0 : index
    %c0_46 = arith.constant 0 : index
    %63 = vector.load %arg6[%c2_44, %c0_45, %c0_46] : memref<6x192x224xf32, #tpu.memory_space<vmem>>, vector<1x192x224xf32>
    %64 = vector.shape_cast %63 : vector<1x192x224xf32> to vector<192x224xf32>
    %cst_47 = arith.constant dense<0.000000e+00> : vector<7x224xf32>
    %65 = tpu.matmul %62, %64, %cst_47 {dimension_numbers = #tpu.dot_dimension_numbers<[1], [0], [0], [1], [0, 0, 1, 1], [], []>} : vector<7x192xf32>, vector<192x224xf32>, vector<7x224xf32> -> vector<7x224xf32>
    %66 = arith.addf %61, %65 : vector<7x224xf32>
    %67 = vector.extract_strided_slice %52 {offsets = [3, 0], sizes = [7, 192], strides = [1, 1]} : vector<12x192xf32> to vector<7x192xf32>
    %c3_48 = arith.constant 3 : index
    %c0_49 = arith.constant 0 : index
    %c0_50 = arith.constant 0 : index
    %68 = vector.load %arg6[%c3_48, %c0_49, %c0_50] : memref<6x192x224xf32, #tpu.memory_space<vmem>>, vector<1x192x224xf32>
    %69 = vector.shape_cast %68 : vector<1x192x224xf32> to vector<192x224xf32>
    %cst_51 = arith.constant dense<0.000000e+00> : vector<7x224xf32>
    %70 = tpu.matmul %67, %69, %cst_51 {dimension_numbers = #tpu.dot_dimension_numbers<[1], [0], [0], [1], [0, 0, 1, 1], [], []>} : vector<7x192xf32>, vector<192x224xf32>, vector<7x224xf32> -> vector<7x224xf32>
    %71 = arith.addf %66, %70 : vector<7x224xf32>
    %72 = vector.extract_strided_slice %52 {offsets = [4, 0], sizes = [7, 192], strides = [1, 1]} : vector<12x192xf32> to vector<7x192xf32>
    %c4_52 = arith.constant 4 : index
    %c0_53 = arith.constant 0 : index
    %c0_54 = arith.constant 0 : index
    %73 = vector.load %arg6[%c4_52, %c0_53, %c0_54] : memref<6x192x224xf32, #tpu.memory_space<vmem>>, vector<1x192x224xf32>
    %74 = vector.shape_cast %73 : vector<1x192x224xf32> to vector<192x224xf32>
    %cst_55 = arith.constant dense<0.000000e+00> : vector<7x224xf32>
    %75 = tpu.matmul %72, %74, %cst_55 {dimension_numbers = #tpu.dot_dimension_numbers<[1], [0], [0], [1], [0, 0, 1, 1], [], []>} : vector<7x192xf32>, vector<192x224xf32>, vector<7x224xf32> -> vector<7x224xf32>
    %76 = arith.addf %71, %75 : vector<7x224xf32>
    %77 = vector.extract_strided_slice %52 {offsets = [5, 0], sizes = [7, 192], strides = [1, 1]} : vector<12x192xf32> to vector<7x192xf32>
    %c5_56 = arith.constant 5 : index
    %c0_57 = arith.constant 0 : index
    %c0_58 = arith.constant 0 : index
    %78 = vector.load %arg6[%c5_56, %c0_57, %c0_58] : memref<6x192x224xf32, #tpu.memory_space<vmem>>, vector<1x192x224xf32>
    %79 = vector.shape_cast %78 : vector<1x192x224xf32> to vector<192x224xf32>
    %cst_59 = arith.constant dense<0.000000e+00> : vector<7x224xf32>
    %80 = tpu.matmul %77, %79, %cst_59 {dimension_numbers = #tpu.dot_dimension_numbers<[1], [0], [0], [1], [0, 0, 1, 1], [], []>} : vector<7x192xf32>, vector<192x224xf32>, vector<7x224xf32> -> vector<7x224xf32>
    %81 = arith.addf %76, %80 : vector<7x224xf32>
    %c0_60 = arith.constant 0 : index
    %c0_61 = arith.constant 0 : index
    %82 = vector.load %arg7[%c0_60, %c0_61] : memref<1x224xf32, #tpu.memory_space<vmem>>, vector<1x224xf32>
    %83 = vector.broadcast %82 : vector<1x224xf32> to vector<7x224xf32>
    %84 = arith.addf %81, %83 : vector<7x224xf32>
    %cst_62 = arith.constant 0.000000e+00 : f32
    %85 = vector.broadcast %cst_62 : f32 to vector<7x224xf32>
    %86 = arith.cmpf oge, %84, %85 : vector<7x224xf32>
    %cst_63 = arith.constant 0.00999999977 : f32
    %87 = vector.broadcast %cst_63 : f32 to vector<7x224xf32>
    %88 = arith.mulf %87, %84 : vector<7x224xf32>
    %89 = arith.select %86, %84, %88 : vector<7x224xi1>, vector<7x224xf32>
    %90 = vector.extract_strided_slice %89 {offsets = [0, 0], sizes = [2, 224], strides = [1, 1]} : vector<7x224xf32> to vector<2x224xf32>
    %cst_64 = arith.constant dense<0xFF800000> : vector<224xf32>
    %91 = vector.multi_reduction <maximumf>, %90, %cst_64 [0] : vector<2x224xf32> to vector<224xf32>
    %92 = vector.shape_cast %91 : vector<224xf32> to vector<1x224xf32>
    %93 = vector.extract_strided_slice %89 {offsets = [1, 0], sizes = [3, 224], strides = [1, 1]} : vector<7x224xf32> to vector<3x224xf32>
    %cst_65 = arith.constant dense<0xFF800000> : vector<224xf32>
    %94 = vector.multi_reduction <maximumf>, %93, %cst_65 [0] : vector<3x224xf32> to vector<224xf32>
    %95 = vector.shape_cast %94 : vector<224xf32> to vector<1x224xf32>
    %96 = vector.extract_strided_slice %89 {offsets = [3, 0], sizes = [3, 224], strides = [1, 1]} : vector<7x224xf32> to vector<3x224xf32>
    %cst_66 = arith.constant dense<0xFF800000> : vector<224xf32>
    %97 = vector.multi_reduction <maximumf>, %96, %cst_66 [0] : vector<3x224xf32> to vector<224xf32>
    %98 = vector.shape_cast %97 : vector<224xf32> to vector<1x224xf32>
    %99 = vector.extract_strided_slice %89 {offsets = [5, 0], sizes = [2, 224], strides = [1, 1]} : vector<7x224xf32> to vector<2x224xf32>
    %cst_67 = arith.constant dense<0xFF800000> : vector<224xf32>
    %100 = vector.multi_reduction <maximumf>, %99, %cst_67 [0] : vector<2x224xf32> to vector<224xf32>
    %101 = vector.shape_cast %100 : vector<224xf32> to vector<1x224xf32>
    %102 = tpu.concatenate %92, %95, %98, %101 in 0 : vector<1x224xf32>, vector<1x224xf32>, vector<1x224xf32>, vector<1x224xf32> -> vector<4x224xf32>
    %103 = vector.extract_strided_slice %102 {offsets = [0, 0], sizes = [4, 32], strides = [1, 1]} : vector<4x224xf32> to vector<4x32xf32>
    %104 = vector.extract_strided_slice %102 {offsets = [0, 32], sizes = [4, 32], strides = [1, 1]} : vector<4x224xf32> to vector<4x32xf32>
    %105 = arith.maximumf %103, %104 : vector<4x32xf32>
    %106 = vector.extract_strided_slice %102 {offsets = [0, 32], sizes = [4, 32], strides = [1, 1]} : vector<4x224xf32> to vector<4x32xf32>
    %107 = vector.extract_strided_slice %102 {offsets = [0, 64], sizes = [4, 32], strides = [1, 1]} : vector<4x224xf32> to vector<4x32xf32>
    %108 = arith.maximumf %106, %107 : vector<4x32xf32>
    %109 = vector.extract_strided_slice %102 {offsets = [0, 96], sizes = [4, 32], strides = [1, 1]} : vector<4x224xf32> to vector<4x32xf32>
    %110 = arith.maximumf %108, %109 : vector<4x32xf32>
    %111 = vector.extract_strided_slice %102 {offsets = [0, 96], sizes = [4, 32], strides = [1, 1]} : vector<4x224xf32> to vector<4x32xf32>
    %112 = vector.extract_strided_slice %102 {offsets = [0, 128], sizes = [4, 32], strides = [1, 1]} : vector<4x224xf32> to vector<4x32xf32>
    %113 = arith.maximumf %111, %112 : vector<4x32xf32>
    %114 = vector.extract_strided_slice %102 {offsets = [0, 160], sizes = [4, 32], strides = [1, 1]} : vector<4x224xf32> to vector<4x32xf32>
    %115 = arith.maximumf %113, %114 : vector<4x32xf32>
    %116 = vector.extract_strided_slice %102 {offsets = [0, 160], sizes = [4, 32], strides = [1, 1]} : vector<4x224xf32> to vector<4x32xf32>
    %117 = vector.extract_strided_slice %102 {offsets = [0, 192], sizes = [4, 32], strides = [1, 1]} : vector<4x224xf32> to vector<4x32xf32>
    %118 = arith.maximumf %116, %117 : vector<4x32xf32>
    %cst_68 = arith.constant 0.000000e+00 : f32
    %119 = vector.broadcast %cst_68 : f32 to vector<4x64xf32>
    %120 = tpu.concatenate %119, %105, %110, %115, %118, %119 in 1 : vector<4x64xf32>, vector<4x32xf32>, vector<4x32xf32>, vector<4x32xf32>, vector<4x32xf32>, vector<4x64xf32> -> vector<4x256xf32>
    %cst_69 = arith.constant 0.000000e+00 : f32
    %121 = vector.broadcast %cst_69 : f32 to vector<2x256xf32>
    %122 = tpu.concatenate %121, %120, %121 in 0 : vector<2x256xf32>, vector<4x256xf32>, vector<2x256xf32> -> vector<8x256xf32>
    %123 = vector.extract_strided_slice %122 {offsets = [0, 0], sizes = [4, 256], strides = [1, 1]} : vector<8x256xf32> to vector<4x256xf32>
    %c0_70 = arith.constant 0 : index
    %c0_71 = arith.constant 0 : index
    %c0_72 = arith.constant 0 : index
    %124 = vector.load %arg8[%c0_70, %c0_71, %c0_72] : memref<5x256x256xf32, #tpu.memory_space<vmem>>, vector<1x256x256xf32>
    %125 = vector.shape_cast %124 : vector<1x256x256xf32> to vector<256x256xf32>
    %cst_73 = arith.constant dense<0.000000e+00> : vector<4x256xf32>
    %126 = tpu.matmul %123, %125, %cst_73 {dimension_numbers = #tpu.dot_dimension_numbers<[1], [0], [0], [1], [0, 0, 1, 1], [], []>} : vector<4x256xf32>, vector<256x256xf32>, vector<4x256xf32> -> vector<4x256xf32>
    %127 = vector.extract_strided_slice %122 {offsets = [1, 0], sizes = [4, 256], strides = [1, 1]} : vector<8x256xf32> to vector<4x256xf32>
    %c1_74 = arith.constant 1 : index
    %c0_75 = arith.constant 0 : index
    %c0_76 = arith.constant 0 : index
    %128 = vector.load %arg8[%c1_74, %c0_75, %c0_76] : memref<5x256x256xf32, #tpu.memory_space<vmem>>, vector<1x256x256xf32>
    %129 = vector.shape_cast %128 : vector<1x256x256xf32> to vector<256x256xf32>
    %cst_77 = arith.constant dense<0.000000e+00> : vector<4x256xf32>
    %130 = tpu.matmul %127, %129, %cst_77 {dimension_numbers = #tpu.dot_dimension_numbers<[1], [0], [0], [1], [0, 0, 1, 1], [], []>} : vector<4x256xf32>, vector<256x256xf32>, vector<4x256xf32> -> vector<4x256xf32>
    %131 = arith.addf %126, %130 : vector<4x256xf32>
    %132 = vector.extract_strided_slice %122 {offsets = [2, 0], sizes = [4, 256], strides = [1, 1]} : vector<8x256xf32> to vector<4x256xf32>
    %c2_78 = arith.constant 2 : index
    %c0_79 = arith.constant 0 : index
    %c0_80 = arith.constant 0 : index
    %133 = vector.load %arg8[%c2_78, %c0_79, %c0_80] : memref<5x256x256xf32, #tpu.memory_space<vmem>>, vector<1x256x256xf32>
    %134 = vector.shape_cast %133 : vector<1x256x256xf32> to vector<256x256xf32>
    %cst_81 = arith.constant dense<0.000000e+00> : vector<4x256xf32>
    %135 = tpu.matmul %132, %134, %cst_81 {dimension_numbers = #tpu.dot_dimension_numbers<[1], [0], [0], [1], [0, 0, 1, 1], [], []>} : vector<4x256xf32>, vector<256x256xf32>, vector<4x256xf32> -> vector<4x256xf32>
    %136 = arith.addf %131, %135 : vector<4x256xf32>
    %137 = vector.extract_strided_slice %122 {offsets = [3, 0], sizes = [4, 256], strides = [1, 1]} : vector<8x256xf32> to vector<4x256xf32>
    %c3_82 = arith.constant 3 : index
    %c0_83 = arith.constant 0 : index
    %c0_84 = arith.constant 0 : index
    %138 = vector.load %arg8[%c3_82, %c0_83, %c0_84] : memref<5x256x256xf32, #tpu.memory_space<vmem>>, vector<1x256x256xf32>
    %139 = vector.shape_cast %138 : vector<1x256x256xf32> to vector<256x256xf32>
    %cst_85 = arith.constant dense<0.000000e+00> : vector<4x256xf32>
    %140 = tpu.matmul %137, %139, %cst_85 {dimension_numbers = #tpu.dot_dimension_numbers<[1], [0], [0], [1], [0, 0, 1, 1], [], []>} : vector<4x256xf32>, vector<256x256xf32>, vector<4x256xf32> -> vector<4x256xf32>
    %141 = arith.addf %136, %140 : vector<4x256xf32>
    %142 = vector.extract_strided_slice %122 {offsets = [4, 0], sizes = [4, 256], strides = [1, 1]} : vector<8x256xf32> to vector<4x256xf32>
    %c4_86 = arith.constant 4 : index
    %c0_87 = arith.constant 0 : index
    %c0_88 = arith.constant 0 : index
    %143 = vector.load %arg8[%c4_86, %c0_87, %c0_88] : memref<5x256x256xf32, #tpu.memory_space<vmem>>, vector<1x256x256xf32>
    %144 = vector.shape_cast %143 : vector<1x256x256xf32> to vector<256x256xf32>
    %cst_89 = arith.constant dense<0.000000e+00> : vector<4x256xf32>
    %145 = tpu.matmul %142, %144, %cst_89 {dimension_numbers = #tpu.dot_dimension_numbers<[1], [0], [0], [1], [0, 0, 1, 1], [], []>} : vector<4x256xf32>, vector<256x256xf32>, vector<4x256xf32> -> vector<4x256xf32>
    %146 = arith.addf %141, %145 : vector<4x256xf32>
    %c0_90 = arith.constant 0 : index
    %c0_91 = arith.constant 0 : index
    %147 = vector.load %arg9[%c0_90, %c0_91] : memref<1x256xf32, #tpu.memory_space<vmem>>, vector<1x256xf32>
    %148 = vector.broadcast %147 : vector<1x256xf32> to vector<4x256xf32>
    %149 = arith.addf %146, %148 : vector<4x256xf32>
    %cst_92 = arith.constant 0.000000e+00 : f32
    %150 = vector.broadcast %cst_92 : f32 to vector<4x256xf32>
    %151 = arith.cmpf oge, %149, %150 : vector<4x256xf32>
    %cst_93 = arith.constant 0.00999999977 : f32
    %152 = vector.broadcast %cst_93 : f32 to vector<4x256xf32>
    %153 = arith.mulf %152, %149 : vector<4x256xf32>
    %154 = arith.select %151, %149, %153 : vector<4x256xi1>, vector<4x256xf32>
    %155 = vector.extract_strided_slice %154 {offsets = [0, 0], sizes = [2, 256], strides = [1, 1]} : vector<4x256xf32> to vector<2x256xf32>
    %cst_94 = arith.constant dense<0xFF800000> : vector<256xf32>
    %156 = vector.multi_reduction <maximumf>, %155, %cst_94 [0] : vector<2x256xf32> to vector<256xf32>
    %157 = vector.shape_cast %156 : vector<256xf32> to vector<1x256xf32>
    %158 = vector.extract_strided_slice %154 {offsets = [2, 0], sizes = [2, 256], strides = [1, 1]} : vector<4x256xf32> to vector<2x256xf32>
    %cst_95 = arith.constant dense<0xFF800000> : vector<256xf32>
    %159 = vector.multi_reduction <maximumf>, %158, %cst_95 [0] : vector<2x256xf32> to vector<256xf32>
    %160 = vector.shape_cast %159 : vector<256xf32> to vector<1x256xf32>
    %161 = tpu.concatenate %157, %160 in 0 : vector<1x256xf32>, vector<1x256xf32> -> vector<2x256xf32>
    %162 = vector.extract_strided_slice %161 {offsets = [0, 0], sizes = [2, 64], strides = [1, 1]} : vector<2x256xf32> to vector<2x64xf32>
    %163 = vector.extract_strided_slice %161 {offsets = [0, 64], sizes = [2, 64], strides = [1, 1]} : vector<2x256xf32> to vector<2x64xf32>
    %164 = arith.maximumf %162, %163 : vector<2x64xf32>
    %165 = vector.extract_strided_slice %161 {offsets = [0, 128], sizes = [2, 64], strides = [1, 1]} : vector<2x256xf32> to vector<2x64xf32>
    %166 = vector.extract_strided_slice %161 {offsets = [0, 192], sizes = [2, 64], strides = [1, 1]} : vector<2x256xf32> to vector<2x64xf32>
    %167 = arith.maximumf %165, %166 : vector<2x64xf32>
    %168 = tpu.concatenate %164, %167 in 1 : vector<2x64xf32>, vector<2x64xf32> -> vector<2x128xf32>
    %c0_96 = arith.constant 0 : index
    %c0_97 = arith.constant 0 : index
    %169 = vector.load %arg11[%c0_96, %c0_97] : memref<1x64xf32, #tpu.memory_space<vmem>>, vector<1x64xf32>
    %170 = vector.extract_strided_slice %168 {offsets = [0, 0], sizes = [1, 128], strides = [1, 1]} : vector<2x128xf32> to vector<1x128xf32>
    %c0_98 = arith.constant 0 : index
    %c0_99 = arith.constant 0 : index
    %c0_100 = arith.constant 0 : index
    %171 = vector.load %arg10[%c0_98, %c0_99, %c0_100] : memref<2x128x64xf32, #tpu.memory_space<vmem>>, vector<1x128x64xf32>
    %172 = vector.shape_cast %171 : vector<1x128x64xf32> to vector<128x64xf32>
    %cst_101 = arith.constant dense<0.000000e+00> : vector<1x64xf32>
    %173 = tpu.matmul %170, %172, %cst_101 {dimension_numbers = #tpu.dot_dimension_numbers<[1], [0], [0], [1], [0, 0, 1, 1], [], []>} : vector<1x128xf32>, vector<128x64xf32>, vector<1x64xf32> -> vector<1x64xf32>
    %174 = arith.addf %169, %173 : vector<1x64xf32>
    %175 = vector.extract_strided_slice %168 {offsets = [1, 0], sizes = [1, 128], strides = [1, 1]} : vector<2x128xf32> to vector<1x128xf32>
    %c1_102 = arith.constant 1 : index
    %c0_103 = arith.constant 0 : index
    %c0_104 = arith.constant 0 : index
    %176 = vector.load %arg10[%c1_102, %c0_103, %c0_104] : memref<2x128x64xf32, #tpu.memory_space<vmem>>, vector<1x128x64xf32>
    %177 = vector.shape_cast %176 : vector<1x128x64xf32> to vector<128x64xf32>
    %cst_105 = arith.constant dense<0.000000e+00> : vector<1x64xf32>
    %178 = tpu.matmul %175, %177, %cst_105 {dimension_numbers = #tpu.dot_dimension_numbers<[1], [0], [0], [1], [0, 0, 1, 1], [], []>} : vector<1x128xf32>, vector<128x64xf32>, vector<1x64xf32> -> vector<1x64xf32>
    %179 = arith.addf %174, %178 : vector<1x64xf32>
    %cst_106 = arith.constant 0.000000e+00 : f32
    %180 = vector.broadcast %cst_106 : f32 to vector<1x64xf32>
    %181 = arith.cmpf oge, %179, %180 : vector<1x64xf32>
    %cst_107 = arith.constant 0.00999999977 : f32
    %182 = vector.broadcast %cst_107 : f32 to vector<1x64xf32>
    %183 = arith.mulf %182, %179 : vector<1x64xf32>
    %184 = arith.select %181, %179, %183 : vector<1x64xi1>, vector<1x64xf32>
    %c0_108 = arith.constant 0 : index
    %c0_109 = arith.constant 0 : index
    %185 = vector.load %arg12[%c0_108, %c0_109] : memref<64x32xf32, #tpu.memory_space<vmem>>, vector<64x32xf32>
    %cst_110 = arith.constant dense<0.000000e+00> : vector<1x32xf32>
    %186 = tpu.matmul %184, %185, %cst_110 {dimension_numbers = #tpu.dot_dimension_numbers<[1], [0], [0], [1], [0, 0, 1, 1], [], []>} : vector<1x64xf32>, vector<64x32xf32>, vector<1x32xf32> -> vector<1x32xf32>
    %c0_111 = arith.constant 0 : index
    %c0_112 = arith.constant 0 : index
    %187 = vector.load %arg13[%c0_111, %c0_112] : memref<1x32xf32, #tpu.memory_space<vmem>>, vector<1x32xf32>
    %188 = arith.addf %186, %187 : vector<1x32xf32>
    %cst_113 = arith.constant 0.000000e+00 : f32
    %189 = vector.broadcast %cst_113 : f32 to vector<1x32xf32>
    %190 = arith.cmpf oge, %188, %189 : vector<1x32xf32>
    %cst_114 = arith.constant 0.00999999977 : f32
    %191 = vector.broadcast %cst_114 : f32 to vector<1x32xf32>
    %192 = arith.mulf %191, %188 : vector<1x32xf32>
    %193 = arith.select %190, %188, %192 : vector<1x32xi1>, vector<1x32xf32>
    %c0_115 = arith.constant 0 : index
    %c0_116 = arith.constant 0 : index
    %194 = vector.load %arg14[%c0_115, %c0_116] : memref<32x16xf32, #tpu.memory_space<vmem>>, vector<32x16xf32>
    %cst_117 = arith.constant dense<0.000000e+00> : vector<1x16xf32>
    %195 = tpu.matmul %193, %194, %cst_117 {dimension_numbers = #tpu.dot_dimension_numbers<[1], [0], [0], [1], [0, 0, 1, 1], [], []>} : vector<1x32xf32>, vector<32x16xf32>, vector<1x16xf32> -> vector<1x16xf32>
    %c0_118 = arith.constant 0 : index
    %c0_119 = arith.constant 0 : index
    %196 = vector.load %arg15[%c0_118, %c0_119] : memref<1x16xf32, #tpu.memory_space<vmem>>, vector<1x16xf32>
    %197 = arith.addf %195, %196 : vector<1x16xf32>
    %cst_120 = arith.constant 0.000000e+00 : f32
    %198 = vector.broadcast %cst_120 : f32 to vector<1x16xf32>
    %199 = arith.cmpf oge, %197, %198 : vector<1x16xf32>
    %cst_121 = arith.constant 0.00999999977 : f32
    %200 = vector.broadcast %cst_121 : f32 to vector<1x16xf32>
    %201 = arith.mulf %200, %197 : vector<1x16xf32>
    %202 = arith.select %199, %197, %201 : vector<1x16xi1>, vector<1x16xf32>
    %c0_122 = arith.constant 0 : index
    %c0_123 = arith.constant 0 : index
    %203 = vector.load %arg16[%c0_122, %c0_123] : memref<16x10xf32, #tpu.memory_space<vmem>>, vector<16x10xf32>
    %cst_124 = arith.constant dense<0.000000e+00> : vector<1x10xf32>
    %204 = tpu.matmul %202, %203, %cst_124 {dimension_numbers = #tpu.dot_dimension_numbers<[1], [0], [0], [1], [0, 0, 1, 1], [], []>} : vector<1x16xf32>, vector<16x10xf32>, vector<1x10xf32> -> vector<1x10xf32>
    %c0_125 = arith.constant 0 : index
    %c0_126 = arith.constant 0 : index
    %205 = vector.load %arg17[%c0_125, %c0_126] : memref<1x10xf32, #tpu.memory_space<vmem>>, vector<1x10xf32>
    %206 = arith.addf %204, %205 : vector<1x10xf32>
    %c0_127 = arith.constant 0 : index
    %c0_128 = arith.constant 0 : index
    %c0_129 = arith.constant 0 : index
    %207 = vector.load %arg18[%c0_127, %c0_128, %c0_129] : memref<1x1x10xf32, #tpu.memory_space<vmem>>, vector<1x1x10xf32>
    %208 = vector.shape_cast %207 : vector<1x1x10xf32> to vector<1x10xf32>
    %209 = vector.shape_cast %206 : vector<1x10xf32> to vector<1x1x10xf32>
    tpu.vector_store %arg18[%c0_127, %c0_128, %c0_129], %209 {strides = array<i32>} : memref<1x1x10xf32, #tpu.memory_space<vmem>>, vector<1x1x10xf32>,
    return
  }
  func.func @transform_0(%arg0: i32) -> (i32, i32, i32) {
    %c0_i32 = arith.constant 0 : i32
    %c0_i32_0 = arith.constant 0 : i32
    %c0_i32_1 = arith.constant 0 : i32
    return %arg0, %c0_i32, %c0_i32_0 : i32, i32, i32
  }
  func.func @transform_1(%arg0: i32) -> (i32, i32, i32) {
    %c0_i32 = arith.constant 0 : i32
    %c0_i32_0 = arith.constant 0 : i32
    %c0_i32_1 = arith.constant 0 : i32
    %c0_i32_2 = arith.constant 0 : i32
    return %c0_i32, %c0_i32_0, %c0_i32_1 : i32, i32, i32
  }
  func.func @transform_2(%arg0: i32) -> (i32, i32) {
    %c0_i32 = arith.constant 0 : i32
    %c0_i32_0 = arith.constant 0 : i32
    %c0_i32_1 = arith.constant 0 : i32
    return %c0_i32, %c0_i32_0 : i32, i32
  }
  func.func @transform_3(%arg0: i32) -> (i32, i32) {
    %c0_i32 = arith.constant 0 : i32
    %c0_i32_0 = arith.constant 0 : i32
    %c0_i32_1 = arith.constant 0 : i32
    return %c0_i32, %c0_i32_0 : i32, i32
  }
  func.func @transform_4(%arg0: i32) -> (i32, i32) {
    %c0_i32 = arith.constant 0 : i32
    %c0_i32_0 = arith.constant 0 : i32
    %c0_i32_1 = arith.constant 0 : i32
    return %c0_i32, %c0_i32_0 : i32, i32
  }
  func.func @transform_5(%arg0: i32) -> (i32, i32, i32) {
    %c0_i32 = arith.constant 0 : i32
    %c0_i32_0 = arith.constant 0 : i32
    %c0_i32_1 = arith.constant 0 : i32
    %c0_i32_2 = arith.constant 0 : i32
    return %c0_i32, %c0_i32_0, %c0_i32_1 : i32, i32, i32
  }
  func.func @transform_6(%arg0: i32) -> (i32, i32) {
    %c0_i32 = arith.constant 0 : i32
    %c0_i32_0 = arith.constant 0 : i32
    %c0_i32_1 = arith.constant 0 : i32
    return %c0_i32, %c0_i32_0 : i32, i32
  }
  func.func @transform_7(%arg0: i32) -> (i32, i32, i32) {
    %c0_i32 = arith.constant 0 : i32
    %c0_i32_0 = arith.constant 0 : i32
    %c0_i32_1 = arith.constant 0 : i32
    %c0_i32_2 = arith.constant 0 : i32
    return %c0_i32, %c0_i32_0, %c0_i32_1 : i32, i32, i32
  }
  func.func @transform_8(%arg0: i32) -> (i32, i32) {
    %c0_i32 = arith.constant 0 : i32
    %c0_i32_0 = arith.constant 0 : i32
    %c0_i32_1 = arith.constant 0 : i32
    return %c0_i32, %c0_i32_0 : i32, i32
  }
  func.func @transform_9(%arg0: i32) -> (i32, i32, i32) {
    %c0_i32 = arith.constant 0 : i32
    %c0_i32_0 = arith.constant 0 : i32
    %c0_i32_1 = arith.constant 0 : i32
    %c0_i32_2 = arith.constant 0 : i32
    return %c0_i32, %c0_i32_0, %c0_i32_1 : i32, i32, i32
  }
  func.func @transform_10(%arg0: i32) -> (i32, i32) {
    %c0_i32 = arith.constant 0 : i32
    %c0_i32_0 = arith.constant 0 : i32
    %c0_i32_1 = arith.constant 0 : i32
    return %c0_i32, %c0_i32_0 : i32, i32
  }
  func.func @transform_11(%arg0: i32) -> (i32, i32) {
    %c0_i32 = arith.constant 0 : i32
    %c0_i32_0 = arith.constant 0 : i32
    %c0_i32_1 = arith.constant 0 : i32
    return %c0_i32, %c0_i32_0 : i32, i32
  }
  func.func @transform_12(%arg0: i32) -> (i32, i32) {
    %c0_i32 = arith.constant 0 : i32
    %c0_i32_0 = arith.constant 0 : i32
    %c0_i32_1 = arith.constant 0 : i32
    return %c0_i32, %c0_i32_0 : i32, i32
  }
  func.func @transform_13(%arg0: i32) -> (i32, i32) {
    %c0_i32 = arith.constant 0 : i32
    %c0_i32_0 = arith.constant 0 : i32
    %c0_i32_1 = arith.constant 0 : i32
    return %c0_i32, %c0_i32_0 : i32, i32
  }
  func.func @transform_14(%arg0: i32) -> (i32, i32) {
    %c0_i32 = arith.constant 0 : i32
    %c0_i32_0 = arith.constant 0 : i32
    %c0_i32_1 = arith.constant 0 : i32
    return %c0_i32, %c0_i32_0 : i32, i32
  }
  func.func @transform_15(%arg0: i32) -> (i32, i32) {
    %c0_i32 = arith.constant 0 : i32
    %c0_i32_0 = arith.constant 0 : i32
    %c0_i32_1 = arith.constant 0 : i32
    return %c0_i32, %c0_i32_0 : i32, i32
  }
  func.func @transform_16(%arg0: i32) -> (i32, i32) {
    %c0_i32 = arith.constant 0 : i32
    %c0_i32_0 = arith.constant 0 : i32
    %c0_i32_1 = arith.constant 0 : i32
    return %c0_i32, %c0_i32_0 : i32, i32
  }
  func.func @transform_17(%arg0: i32) -> (i32, i32, i32) {
    %c0_i32 = arith.constant 0 : i32
    %c0_i32_0 = arith.constant 0 : i32
    %c0_i32_1 = arith.constant 0 : i32
    return %arg0, %c0_i32, %c0_i32_0 : i32, i32, i32
  }
}

</mosaic_0001>

<bundles_post_ra>
// kernel: observer_forward.1
= control target key start
LH: loop header
LB: loop body
LE: loop exit
PB: predicated region body
PF: predicated region fallthrough
CT: control target
= control target key end

     0   :  { %s8208_s0 = inlined_call_operand.vmem [shape: f32[2,36,36], index: 0, kind: input, shape index: {}]   ;;  %s8209_s1 = inlined_call_operand.vmem [shape: f32[8,36,464], index: 1, kind: input, shape index: {}]   ;;  %s8210_s2 = inlined_call_operand.vmem [shape: f32[1,464], index: 2, kind: input, shape index: {}]   ;;  %s8211_s3 = inlined_call_operand.vmem [shape: f32[12,29], index: 3, kind: input, shape index: {}]   ;;  %s8212_s4 = inlined_call_operand.vmem [shape: f32[464,192], index: 4, kind: input, shape index: {}]   ;;  %s8213_s5 = inlined_call_operand.hbm [shape: f32[6,192,224], index: 5, kind: input, shape index: {}]   ;;  %s8214_s6 = inlined_call_operand.vmem [shape: f32[1,224], index: 6, kind: input, shape index: {}]   ;;  %s8215_s7 = inlined_call_operand.vmem [shape: f32[5,256,256], index: 7, kind: input, shape index: {}]   ;;  %s8216_s8 = inlined_call_operand.vmem [shape: f32[1,256], index: 8, kind: input, shape index: {}]   ;;  %s8217_s9 = inlined_call_operand.vmem [shape: f32[2,128,64], index: 9, kind: input, shape index: {}]   ;;  %s8218_s10 = inlined_call_operand.vmem [shape: f32[1,64], index: 10, kind: input, shape index: {}]   ;;  %s8219_s11 = inlined_call_operand.vmem [shape: f32[64,32], index: 11, kind: input, shape index: {}]   ;;  %s8220_s12 = inlined_call_operand.vmem [shape: f32[1,32], index: 12, kind: input, shape index: {}]   ;;  %s8221_s13 = inlined_call_operand.vmem [shape: f32[32,16], index: 13, kind: input, shape index: {}]   ;;  %s8222_s14 = inlined_call_operand.vmem [shape: f32[1,16], index: 14, kind: input, shape index: {}]   ;;  %s8223_s15 = inlined_call_operand.vmem [shape: f32[16,10], index: 15, kind: input, shape index: {}]   ;;  %s8224_s16 = inlined_call_operand.vmem [shape: f32[1,10], index: 16, kind: input, shape index: {}]   ;;  %s8225_s17 = inlined_call_operand.hbm [shape: f32[2,1,10], index: 17, kind: output, shape index: {}]  }
   0x1   :  { %8236 = sst [smem:[#allocation61_spill]] %s8208_s0 }
   0x2   :  { %8237 = sst [smem:[#allocation62_spill]] %s8209_s1 }
   0x3   :  { %8238 = sst [smem:[#allocation63_spill]] %s8213_s5 }
   0x4   :  { %22 = vsyncpa [#allocation3], 0 }
   0x5   :  { %23 = vsyncpa [#allocation4], 0 }
   0x6   :  { %25 = vsyncpa [#allocation4 + $0x1], 0  ;;  %s5380_s24 = smov 0   ;;  %s5382_s25 = smov 0  }
   0x7   :  { %s5384_s26 = smov 0   ;;  %s5386_s27 = smov 0  }
   0x8 LB: > { %8239 = sst [smem:[#allocation8_spill]] %s5270_s24  ;;  %s5401_s28 = sadd.s32 4294967295, %s5282_s27   ;;  %s5282_s27 = sphi %s5386_s27, %s8348_s27   ;;  %s5278_s26 = sphi %s5384_s26, %s8353_s26   ;;  %s5274_s25 = sphi %s5382_s25, %s8352_s25   ;;  %s5270_s24 = sphi %s5380_s24, %s8351_s24  }
   0x9   : > { %8240 = sst [smem:[#allocation9_spill]] %s5278_s26  ;;  %s4507_s29 = sadd.s32 4294967294, %s5282_s27  }
   0xa   : > { %8241 = sst [smem:[#allocation10_spill]] %s5282_s27  ;;  %s5405_s0 = sadd.s32 1, %s5282_s27  }
   0xb   : > { %8242 = sst [smem:[#allocation11_spill]] %s5405_s0  ;;  %s400_s30 = sadd.s32 1, %s5278_s26 }
   0xc   : > { %s397_s18 = ssub.s32 %s5282_s27, %s5405_s0  ;;  %p410_p0 = scmp.ne.s32.totalorder %s5278_s26, %s5274_s25 }
   0xd   : > { %p398_p1 = scmp.eq.s32.totalorder %s397_s18, 0  ;;  %p411_p2 = scmp.eq.s32.totalorder %s5401_s28, 1 }
   0xe   : > { %p416_p3 = scmp.ne.s32.totalorder %s5274_s25, %s5270_s24  ;;  %p417_p4 = scmp.eq.s32.totalorder %s4507_s29, 1 }
   0xf   : > { %s5416_s19 = scalar_select %p398_p1, %s5278_s26, %s400_s30  }
  0x10   : > { %p5418_p5 = por %p411_p2, %p410_p0  ;;  %p5422_p6 = por %p417_p4, %p416_p3 }
  0x11   : > { %8243 = sst [smem:[#allocation12_spill]] %s5416_s19  ;;  %p4508_p7 = scmp.ge.s32.totalorder %s5282_s27, 1 }
  0x12   : > { %s8244_s1 = scalar_select %p5418_p5, 1, 0 }
  0x13   : > { %s8246_s20 = scalar_select %p5422_p6, 1, 0 }
  0x14   : > { %8245 = sst [smem:[#allocation13_spill]] %s8244_s1  ;;  %p424_p8 = scmp.lt.s32.totalorder %s5282_s27, 3 }
  0x15   : > { %8247 = sst [smem:[#allocation14_spill]] %s8246_s20  ;;  %p5138_p9 = scmp.eq.s32.totalorder %s5401_s28, 0 }
  0x16   : > { %p425_p10 = pnand %p4508_p7, %p424_p8  ;;  %s8248_s5 = sld [smem:[#allocation63_spill]] }
  0x17   : > { %s5284_s29 = smov [#allocation2]   ;;  %s5285_s18 = smov 256  }
  0x18   : > { %p5130_p11 = pneg %p425_p10  ;;  %s449_s30 = sshll.u32 %s5284_s29, 4  ;;  %s450_s30 = int_to_ptr.vmem [resolvable:$true] %s449_s30 }
  0x19   : > { %s5286_s19 = smov 16   ;;  %506 = sbr.rel (%p425_p10) target bundleno = 2248 (0x8c8), region = 88 }
  0x1a   : > { %p5131_p12 = pnand %p5138_p9, %p5130_p11 }
  0x1c   : > { %s447_s23 = sshll.u32 %s8248_s5, 4  ;;  %s448_s23 = int_to_ptr.hbm [resolvable:$true] %s447_s23 }
  0x1d   : > { %5133 = dma.hbm_to_vmem [thread:$0]  (!%p5131_p12), %s448_s23, 36864, %s450_s30, [#allocation3], %s5285_s18, %s5285_s18, %s5286_s19  }
  0x1e   : > { %5261 = dma.done.wait (%p5138_p9), [#allocation3], 36864  }
  0x1f   : > { %5263 = vsyncadd (%p5138_p9), [#allocation3], 4294930432  ;;  %p558_p13 = scmp.lt.s32.totalorder %s5401_s28, 1  ;;  %vm630_vm0 = vcmask 1043456   ;;  %s8249_s26 = sld [smem:[#allocation62_spill]]  ;;  %vm613_vm1 = vcmask 1046528  }
  0x20   : > { %s8251_s19 = sld [smem:[#allocation61_spill]]  ;;  %vm621_vm2 = vcmask 293888   ;;  %vm916_vm3 = vcmask 1045504   ;;  %vm1097_vm4 = vcmask 1044480   ;;  %vm1461_vm5 = vcmask 1042432   ;;  %s5287_s30 = smov 96  }
  0x21   : > { %s559_s21 = scalar_select %p558_p13, %s5401_s28, 1  ;;  %vm1644_vm6 = vcmask 1041408   ;;  %vm1827_vm7 = vcmask 1040384  }
  0x22   : > { %s5288_s27 = smov 64   ;;  %s5289_s23 = smov 32  }
  0x23   : > { %s5123_s22 = smul.u32 40, %s559_s21  ;;  %s4436_s29 = scalar_lea.hbm %s8225_s17, %s5401_s28 }
  0x24   : > { %s4440_s5 = sshll.u32 %s4436_s29, 4  ;;  %s5236_s20 = scalar_lea.hbm %s8225_s17, 2  ;;  %s4441_s5 = int_to_ptr.hbm [resolvable:$true] %s4440_s5 }
  0x25   : > { %s8250_s0 = smov %s8249_s26  ;;  %v4530_v0 = vld [vmem:[%s8249_s26 + $0x120] sm:$0xf]  ;;  %s5230_s26 = sshra.s32 %s4441_s5, 4  ;;  %s5231_s26 = int_to_ptr.hbm [resolvable:$true] %s5230_s26 }
  0x26   : > { %v4531_v1 = vld [vmem:[%s8250_s0 + $0x128] sm:$0xf]  ;;  %v4532_v2 = vld [vmem:[%s8250_s0 + $0x130] sm:$0xf]  ;;  %4534 = vmatpush.msk.msra.mxu0 %vm630_vm0, %v4530_v0  ;;  %v4533_v3 = vld [vmem:[%s8250_s0 + $0x138] sm:$0xf]  ;;  %s5483_s1 = scalar_lea.vmem %s8251_s19, %s5123_s22  ;;  %p5237_p3 = scmp.lt.s32.totalorder %s5231_s26, %s8225_s17 }
  0x27   : > { %4539 = vmatpush.msk.msra.mxu1 %vm630_vm0, %v4531_v1  ;;  %v4526_v4 = vld [vmem:[%s8250_s0 + $0x100] sm:$0xff]  ;;  %v4527_v5 = vld [vmem:[%s8250_s0 + $0x108] sm:$0xff]  ;;  %4544 = vmatpush.msk.msra.mxu2 %vm630_vm0, %v4532_v2  ;;  %v4528_v6 = vld [vmem:[%s8250_s0 + $0x110] sm:$0xff] }
  0x28   : > { %4549 = vmatpush.msk.msra.mxu3 %vm630_vm0, %v4533_v3  ;;  %v4529_v7 = vld [vmem:[%s8250_s0 + $0x118] sm:$0xff]  ;;  %v4522_v8 = vld [vmem:[%s8250_s0 + $0xe0] sm:$0xff]  ;;  %655 = vmatpush.msra.mxu0 %v4526_v4  ;;  %v4523_v9 = vld [vmem:[%s8250_s0 + $0xe8] sm:$0xff] }
  0x29   : > { %684 = vmatpush.msra.mxu1 %v4527_v5  ;;  %v4524_v10 = vld [vmem:[%s8250_s0 + $0xf0] sm:$0xff]  ;;  %v4525_v11 = vld [vmem:[%s8250_s0 + $0xf8] sm:$0xff]  ;;  %713 = vmatpush.msra.mxu2 %v4528_v6  ;;  %v4518_v12 = vld [vmem:[%s8250_s0 + $0xc0] sm:$0xff] }
  0x2a   : > { %742 = vmatpush.msra.mxu3 %v4529_v7  ;;  %v4519_v13 = vld [vmem:[%s8250_s0 + $0xc8] sm:$0xff]  ;;  %656 = vmatpush.msra.mxu0 %v4522_v8  ;;  %v4520_v14 = vld [vmem:[%s8250_s0 + $0xd0] sm:$0xff]  ;;  %v4521_v15 = vld [vmem:[%s8250_s0 + $0xd8] sm:$0xff] }
  0x2b   : > { %685 = vmatpush.msra.mxu1 %v4523_v9  ;;  %714 = vmatpush.msra.mxu2 %v4524_v10  ;;  %v4514_v16 = vld [vmem:[%s8250_s0 + $0xa0] sm:$0xff]  ;;  %v4515_v17 = vld [vmem:[%s8250_s0 + $0xa8] sm:$0xff]  ;;  %v4516_v19 = vld [vmem:[%s8250_s0 + $0xb0] sm:$0xff] }
  0x2c   : > { %743 = vmatpush.msra.mxu3 %v4525_v11  ;;  %v5504_v18 = vld [vmem:[%s5483_s1] sm:$0xff]  ;;  %657 = vmatpush.msra.mxu0 %v4518_v12  ;;  %v4517_v20 = vld [vmem:[%s8250_s0 + $0xb8] sm:$0xff]  ;;  %v5513_v21 = vld [vmem:[%s5483_s1 + $0x8] sm:$0xff] }
  0x2d   : > { %686 = vmatpush.msra.mxu1 %v4519_v13  ;;  %v614_v22 = vrot.slane %v5504_v18, 1  ;;  %715 = vmatpush.msra.mxu2 %v4520_v14  ;;  %v615_v23 = vrot.slane %v5513_v21, 1  ;;  %v5518_v24 = vld [vmem:[%s5483_s1 + $0x10] sm:$0xff]  ;;  %v584_v26 = vld [vmem:[%s8250_s0 + $0x80] sm:$0xf]  ;;  %v581_v32 = vld [vmem:[%s8250_s0 + $0x68] sm:$0xff] }
  0x2e   : > { %744 = vmatpush.msra.mxu3 %v4521_v15  ;;  %658 = vmatpush.msra.mxu0 %v4514_v16  ;;  %v585_v27 = vld [vmem:[%s8250_s0 + $0x88] sm:$0xf]  ;;  %v586_v28 = vld [vmem:[%s8250_s0 + $0x90] sm:$0xf]  ;;  %v587_v29 = vld [vmem:[%s8250_s0 + $0x98] sm:$0xf] }
  0x2f   : > { %687 = vmatpush.msra.mxu1 %v4515_v17  ;;  %716 = vmatpush.msra.mxu2 %v4516_v19  ;;  %v616_v25 = vsel %vm613_vm1, %v614_v22, %v615_v23  ;;  %v617_v30 = vrot.slane %v5518_v24, 1  ;;  %v580_v31 = vld [vmem:[%s8250_s0 + $0x60] sm:$0xff]  ;;  %v582_v33 = vld [vmem:[%s8250_s0 + $0x70] sm:$0xff]  ;;  %v583_v34 = vld [vmem:[%s8250_s0 + $0x78] sm:$0xff]  ;;  %v917_v11 = vrot.slane %v5504_v18, 2  ;;  %v918_v12 = vrot.slane %v5513_v21, 2 }
  0x30   : > { %745 = vmatpush.msra.mxu3 %v4517_v20  ;;  %4535 = vmatmul.msk.f32.vlgmr.msra.gmra.mxu0 %vm621_vm2, %v616_v25  ;;  %v576_v35 = vld [vmem:[%s8250_s0 + $0x40] sm:$0xff]  ;;  %v577_v36 = vld [vmem:[%s8250_s0 + $0x48] sm:$0xff]  ;;  %v578_v37 = vld [vmem:[%s8250_s0 + $0x50] sm:$0xff] }
  0x31   : > { %4540 = vmatmul.msk.f32.vlgmr.msra.gmra.mxu1 %vm621_vm2, %v616_v25  ;;  %4545 = vmatmul.msk.f32.vlgmr.msra.gmra.mxu2 %vm621_vm2, %v616_v25  ;;  %v579_v38 = vld [vmem:[%s8250_s0 + $0x58] sm:$0xff]  ;;  %v618_v39 = vsel %vm613_vm1, %v615_v23, %v617_v30  ;;  %v572_v41 = vld [vmem:[%s8250_s0 + $0x20] sm:$0xff]  ;;  %v573_v42 = vld [vmem:[%s8250_s0 + $0x28] sm:$0xff] }
  0x32   : > { %4550 = vmatmul.msk.f32.vlgmr.msra.gmra.mxu3 %vm621_vm2, %v616_v25  ;;  %4554 = vmatpush.msk.msrb.mxu0 %vm630_vm0, %v584_v26  ;;  %v5568_v40 = vld [vmem:[%s5483_s1 + $0x18] sm:$0xff]  ;;  %v574_v43 = vld [vmem:[%s8250_s0 + $0x30] sm:$0xff]  ;;  %v568_v46 = vld [vmem:[%s8250_s0] sm:$0xff] }
  0x33   : > { %4559 = vmatpush.msk.msrb.mxu1 %vm630_vm0, %v585_v27  ;;  %4564 = vmatpush.msk.msrb.mxu2 %vm630_vm0, %v586_v28  ;;  %v575_v44 = vld [vmem:[%s8250_s0 + $0x38] sm:$0xff]  ;;  %v619_v45 = vrot.slane %v5568_v40, 1  ;;  %v569_v47 = vld [vmem:[%s8250_s0 + $0x8] sm:$0xff]  ;;  %v570_v48 = vld [vmem:[%s8250_s0 + $0x10] sm:$0xff]  ;;  %v919_v28 = vsel %vm916_vm3, %v917_v11, %v918_v12 }
  0x34   : > { %4569 = vmatpush.msk.msrb.mxu3 %vm630_vm0, %v587_v29  ;;  %791 = vmatpush.msrb.mxu0 %v580_v31  ;;  %v571_v49 = vld [vmem:[%s8250_s0 + $0x18] sm:$0xff]  ;;  %v4590_v51 = vld [vmem:[%s8250_s0 + $0x1c0] sm:$0xf]  ;;  %v4591_v52 = vld [vmem:[%s8250_s0 + $0x1c8] sm:$0xf] }
  0x35   : > { %820 = vmatpush.msrb.mxu1 %v581_v32  ;;  %849 = vmatpush.msrb.mxu2 %v582_v33  ;;  %v620_v50 = vsel %vm613_vm1, %v617_v30, %v619_v45  ;;  %v4592_v53 = vld [vmem:[%s8250_s0 + $0x1d0] sm:$0xf]  ;;  %v4593_v54 = vld [vmem:[%s8250_s0 + $0x1d8] sm:$0xf]  ;;  %v4586_v55 = vld [vmem:[%s8250_s0 + $0x1a0] sm:$0xff]  ;;  %v920_v33 = vrot.slane %v5518_v24, 2 }
  0x36   : > { %878 = vmatpush.msrb.mxu3 %v583_v34  ;;  %792 = vmatpush.msrb.mxu0 %v576_v35  ;;  %v4587_v56 = vld [vmem:[%s8250_s0 + $0x1a8] sm:$0xff]  ;;  %v4588_v57 = vld [vmem:[%s8250_s0 + $0x1b0] sm:$0xff]  ;;  %v4589_v58 = vld [vmem:[%s8250_s0 + $0x1b8] sm:$0xff]  ;;  %v922_v35 = vrot.slane %v5568_v40, 2 }
  0x37   : > { %821 = vmatpush.msrb.mxu1 %v577_v36  ;;  %850 = vmatpush.msrb.mxu2 %v578_v37  ;;  %v4582_v59 = vld [vmem:[%s8250_s0 + $0x180] sm:$0xff]  ;;  %v4583_v60 = vld [vmem:[%s8250_s0 + $0x188] sm:$0xff]  ;;  %v4584_v61 = vld [vmem:[%s8250_s0 + $0x190] sm:$0xff]  ;;  %v921_v34 = vsel %vm916_vm3, %v918_v12, %v920_v33 }
  0x38   : > { %879 = vmatpush.msrb.mxu3 %v579_v38  ;;  %4536 = vmatmul.msk.f32.gmra.mxu0 %vm621_vm2, %v618_v39  ;;  %v4585_v62 = vld [vmem:[%s8250_s0 + $0x198] sm:$0xff]  ;;  %v4578_v63 = vld [vmem:[%s8250_s0 + $0x160] sm:$0xff]  ;;  %v4579_v0 = vld [vmem:[%s8250_s0 + $0x168] sm:$0xff]  ;;  %v923_v36 = vsel %vm916_vm3, %v920_v33, %v922_v35 }
  0x39   : > { %4541 = vmatmul.msk.f32.gmra.mxu1 %vm621_vm2, %v618_v39  ;;  %4546 = vmatmul.msk.f32.gmra.mxu2 %vm621_vm2, %v618_v39  ;;  %v4580_v1 = vld [vmem:[%s8250_s0 + $0x170] sm:$0xff]  ;;  %v4581_v2 = vld [vmem:[%s8250_s0 + $0x178] sm:$0xff]  ;;  %v4574_v3 = vld [vmem:[%s8250_s0 + $0x140] sm:$0xff] }
  0x3a   : > { %4551 = vmatmul.msk.f32.gmra.mxu3 %vm621_vm2, %v618_v39  ;;  %793 = vmatpush.msrb.mxu0 %v572_v41  ;;  %v4575_v4 = vld [vmem:[%s8250_s0 + $0x148] sm:$0xff]  ;;  %v4576_v5 = vld [vmem:[%s8250_s0 + $0x150] sm:$0xff]  ;;  %v4577_v6 = vld [vmem:[%s8250_s0 + $0x158] sm:$0xff] }
  0x3b   : > { %822 = vmatpush.msrb.mxu1 %v573_v42  ;;  %851 = vmatpush.msrb.mxu2 %v574_v43  ;;  %v4630_v7 = vld [vmem:[%s8250_s0 + $0x260] sm:$0xf]  ;;  %v4631_v8 = vld [vmem:[%s8250_s0 + $0x268] sm:$0xf]  ;;  %v4632_v9 = vld [vmem:[%s8250_s0 + $0x270] sm:$0xf] }
  0x3c   : > { %880 = vmatpush.msrb.mxu3 %v575_v44  ;;  %794 = vmatpush.msrb.mxu0 %v568_v46  ;;  %v4633_v10 = vld [vmem:[%s8250_s0 + $0x278] sm:$0xf]  ;;  %v4626_v13 = vld [vmem:[%s8250_s0 + $0x240] sm:$0xff]  ;;  %v4627_v14 = vld [vmem:[%s8250_s0 + $0x248] sm:$0xff]  ;;  %v1098_v42 = vrot.slane %v5504_v18, 3  ;;  %v1099_v43 = vrot.slane %v5513_v21, 3 }
  0x3d   : > { %823 = vmatpush.msrb.mxu1 %v569_v47  ;;  %852 = vmatpush.msrb.mxu2 %v570_v48  ;;  %v4628_v15 = vld [vmem:[%s8250_s0 + $0x250] sm:$0xff]  ;;  %v4629_v16 = vld [vmem:[%s8250_s0 + $0x258] sm:$0xff]  ;;  %v4622_v17 = vld [vmem:[%s8250_s0 + $0x220] sm:$0xff] }
  0x3e   : > { %881 = vmatpush.msrb.mxu3 %v571_v49  ;;  %4594 = vmatpush.msk.msra.mxu0 %vm630_vm0, %v4590_v51  ;;  %v4623_v19 = vld [vmem:[%s8250_s0 + $0x228] sm:$0xff]  ;;  %v4624_v20 = vld [vmem:[%s8250_s0 + $0x230] sm:$0xff]  ;;  %v4625_v22 = vld [vmem:[%s8250_s0 + $0x238] sm:$0xff] }
  0x3f   : > { %4599 = vmatpush.msk.msra.mxu1 %vm630_vm0, %v4591_v52  ;;  %4604 = vmatpush.msk.msra.mxu2 %vm630_vm0, %v4592_v53  ;;  %v4618_v23 = vld [vmem:[%s8250_s0 + $0x200] sm:$0xff]  ;;  %v4619_v25 = vld [vmem:[%s8250_s0 + $0x208] sm:$0xff]  ;;  %v4620_v26 = vld [vmem:[%s8250_s0 + $0x210] sm:$0xff]  ;;  %v1100_v52 = vsel %vm1097_vm4, %v1098_v42, %v1099_v43 }
  0x40   : > { %4537 = vmatmul.msk.f32.gmra.mxu0 %vm621_vm2, %v620_v50  ;;  %4609 = vmatpush.msk.msra.mxu3 %vm630_vm0, %v4593_v54  ;;  %v4621_v27 = vld [vmem:[%s8250_s0 + $0x218] sm:$0xff]  ;;  %v4614_v29 = vld [vmem:[%s8250_s0 + $0x1e0] sm:$0xff]  ;;  %v4615_v30 = vld [vmem:[%s8250_s0 + $0x1e8] sm:$0xff] }
  0x41   : > { %4542 = vmatmul.msk.f32.gmra.mxu1 %vm621_vm2, %v620_v50  ;;  %4547 = vmatmul.msk.f32.gmra.mxu2 %vm621_vm2, %v620_v50  ;;  %v4616_v31 = vld [vmem:[%s8250_s0 + $0x1f0] sm:$0xff]  ;;  %v4617_v32 = vld [vmem:[%s8250_s0 + $0x1f8] sm:$0xff]  ;;  %v4670_v37 = vld [vmem:[%s8250_s0 + $0x300] sm:$0xf] }
  0x42   : > { %4552 = vmatmul.msk.f32.gmra.mxu3 %vm621_vm2, %v620_v50  ;;  %956 = vmatpush.msra.mxu0 %v4586_v55  ;;  %v4671_v38 = vld [vmem:[%s8250_s0 + $0x308] sm:$0xf]  ;;  %v4672_v39 = vld [vmem:[%s8250_s0 + $0x310] sm:$0xf]  ;;  %v4673_v41 = vld [vmem:[%s8250_s0 + $0x318] sm:$0xf] }
  0x43   : > { %985 = vmatpush.msra.mxu1 %v4587_v56  ;;  %1014 = vmatpush.msra.mxu2 %v4588_v57  ;;  %v4666_v44 = vld [vmem:[%s8250_s0 + $0x2e0] sm:$0xff]  ;;  %v4668_v46 = vld [vmem:[%s8250_s0 + $0x2f0] sm:$0xff]  ;;  %v4669_v47 = vld [vmem:[%s8250_s0 + $0x2f8] sm:$0xff] }
  0x44   : > { %1043 = vmatpush.msra.mxu3 %v4589_v58  ;;  %957 = vmatpush.msra.mxu0 %v4582_v59  ;;  %v4662_v48 = vld [vmem:[%s8250_s0 + $0x2c0] sm:$0xff]  ;;  %v4663_v49 = vld [vmem:[%s8250_s0 + $0x2c8] sm:$0xff]  ;;  %v4664_v50 = vld [vmem:[%s8250_s0 + $0x2d0] sm:$0xff] }
  0x45   : > { %986 = vmatpush.msra.mxu1 %v4583_v60  ;;  %1015 = vmatpush.msra.mxu2 %v4584_v61  ;;  %v4665_v51 = vld [vmem:[%s8250_s0 + $0x2d8] sm:$0xff]  ;;  %v4658_v53 = vld [vmem:[%s8250_s0 + $0x2a0] sm:$0xff]  ;;  %v4659_v54 = vld [vmem:[%s8250_s0 + $0x2a8] sm:$0xff]  ;;  %v1101_v61 = vrot.slane %v5518_v24, 3 }
  0x46   : > { %1044 = vmatpush.msra.mxu3 %v4585_v62  ;;  %958 = vmatpush.msra.mxu0 %v4578_v63  ;;  %v4660_v55 = vld [vmem:[%s8250_s0 + $0x2b0] sm:$0xff]  ;;  %v4661_v56 = vld [vmem:[%s8250_s0 + $0x2b8] sm:$0xff]  ;;  %v4654_v57 = vld [vmem:[%s8250_s0 + $0x280] sm:$0xff]  ;;  %v1103_v63 = vrot.slane %v5568_v40, 3 }
  0x47   : > { %987 = vmatpush.msra.mxu1 %v4579_v0  ;;  %1016 = vmatpush.msra.mxu2 %v4580_v1  ;;  %v4655_v58 = vld [vmem:[%s8250_s0 + $0x288] sm:$0xff]  ;;  %v4656_v59 = vld [vmem:[%s8250_s0 + $0x290] sm:$0xff]  ;;  %v4657_v60 = vld [vmem:[%s8250_s0 + $0x298] sm:$0xff]  ;;  %v1102_v62 = vsel %vm1097_vm4, %v1099_v43, %v1101_v61 }
  0x48   : > { %4538 = vmatmul.msk.f32.gmra.mxu0 %vm621_vm2, %v619_v45  ;;  %1045 = vmatpush.msra.mxu3 %v4581_v2  ;;  %v1104_v0 = vsel %vm1097_vm4, %v1101_v61, %v1103_v63  ;;  %v4710_v1 = vld [vmem:[%s8250_s0 + $0x3a0] sm:$0xf]  ;;  %v4711_v2 = vld [vmem:[%s8250_s0 + $0x3a8] sm:$0xf]  ;;  %v4744_v61 = vld [vmem:[%s8250_s0 + $0x410] sm:$0xff] }
  0x49   : > { %4543 = vmatmul.msk.f32.gmra.mxu1 %vm621_vm2, %v619_v45  ;;  %4548 = vmatmul.msk.f32.gmra.mxu2 %vm621_vm2, %v619_v45  ;;  %v4702_v11 = vld [vmem:[%s8250_s0 + $0x360] sm:$0xff]  ;;  %v4703_v12 = vld [vmem:[%s8250_s0 + $0x368] sm:$0xff] }
  0x4a   : > { %4553 = vmatmul.msk.f32.gmra.mxu3 %vm621_vm2, %v619_v45  ;;  %959 = vmatpush.msra.mxu0 %v4574_v3  ;;  %v4667_v45 = vld [vmem:[%s8250_s0 + $0x2e8] sm:$0xff]  ;;  %v4712_v3 = vld [vmem:[%s8250_s0 + $0x3b0] sm:$0xf]  ;;  %v5978_v42 = vld [vmem:[%s5483_s1 + $0x20] sm:$0xf] }
  0x4b   : > { %988 = vmatpush.msra.mxu1 %v4575_v4  ;;  %1017 = vmatpush.msra.mxu2 %v4576_v5  ;;  %v4713_v4 = vld [vmem:[%s8250_s0 + $0x3b8] sm:$0xf]  ;;  %v1279_v5 = vrot.slane %v5504_v18, 4  ;;  %v1286_v43 = vrot.slane %v5978_v42, 4 }
  0x4c   : > { %1046 = vmatpush.msra.mxu3 %v4577_v6  ;;  %v1280_v6 = vrot.slane %v5513_v21, 4 }
  0x50   : > { %4555 = vmatmul.msk.f32.vlgmr.msrb.gmra.mxu0 %vm621_vm2, %v5504_v18 }
  0x51   : > { %4560 = vmatmul.msk.f32.vlgmr.msrb.gmra.mxu1 %vm621_vm2, %v5504_v18  ;;  %4565 = vmatmul.msk.f32.vlgmr.msrb.gmra.mxu2 %vm621_vm2, %v5504_v18 }
  0x52   : > { %4570 = vmatmul.msk.f32.vlgmr.msrb.gmra.mxu3 %vm621_vm2, %v5504_v18  ;;  %4634 = vmatpush.msk.msrb.mxu0 %vm630_vm0, %v4630_v7  ;;  %v4706_v7 = vld [vmem:[%s8250_s0 + $0x380] sm:$0xff] }
  0x53   : > { %4639 = vmatpush.msk.msrb.mxu1 %vm630_vm0, %v4631_v8  ;;  %4644 = vmatpush.msk.msrb.mxu2 %vm630_vm0, %v4632_v9  ;;  %v4707_v8 = vld [vmem:[%s8250_s0 + $0x388] sm:$0xff]  ;;  %v4708_v9 = vld [vmem:[%s8250_s0 + $0x390] sm:$0xff] }
  0x54   : > { %4649 = vmatpush.msk.msrb.mxu3 %vm630_vm0, %v4633_v10  ;;  %1137 = vmatpush.msrb.mxu0 %v4626_v13  ;;  %v4709_v10 = vld [vmem:[%s8250_s0 + $0x398] sm:$0xff]  ;;  %v4704_v13 = vld [vmem:[%s8250_s0 + $0x370] sm:$0xff] }
  0x55   : > { %1166 = vmatpush.msrb.mxu1 %v4627_v14  ;;  %1195 = vmatpush.msrb.mxu2 %v4628_v15  ;;  %v4705_v14 = vld [vmem:[%s8250_s0 + $0x378] sm:$0xff] }
  0x56   : > { %1224 = vmatpush.msrb.mxu3 %v4629_v16  ;;  %1138 = vmatpush.msrb.mxu0 %v4622_v17  ;;  %v1281_v17 = vsel %vm630_vm0, %v1279_v5, %v1280_v6  ;;  %v4739_v5 = vld [vmem:[%s8250_s0 + $0x3e8] sm:$0xff] }
  0x57   : > { %1167 = vmatpush.msrb.mxu1 %v4623_v19  ;;  %1196 = vmatpush.msrb.mxu2 %v4624_v20  ;;  %v4698_v19 = vld [vmem:[%s8250_s0 + $0x340] sm:$0xff]  ;;  %v4699_v20 = vld [vmem:[%s8250_s0 + $0x348] sm:$0xff] }
  0x58   : > { %4556 = vmatmul.msk.f32.gmra.mxu0 %vm621_vm2, %v5513_v21  ;;  %1225 = vmatpush.msrb.mxu3 %v4625_v22  ;;  %v4700_v22 = vld [vmem:[%s8250_s0 + $0x350] sm:$0xff] }
  0x59   : > { %4561 = vmatmul.msk.f32.gmra.mxu1 %vm621_vm2, %v5513_v21  ;;  %4566 = vmatmul.msk.f32.gmra.mxu2 %vm621_vm2, %v5513_v21 }
  0x5a   : > { %4571 = vmatmul.msk.f32.gmra.mxu3 %vm621_vm2, %v5513_v21  ;;  %1139 = vmatpush.msrb.mxu0 %v4618_v23  ;;  %v4701_v23 = vld [vmem:[%s8250_s0 + $0x358] sm:$0xff] }
  0x5b   : > { %1168 = vmatpush.msrb.mxu1 %v4619_v25  ;;  %1197 = vmatpush.msrb.mxu2 %v4620_v26  ;;  %v4694_v25 = vld [vmem:[%s8250_s0 + $0x320] sm:$0xff]  ;;  %v4695_v26 = vld [vmem:[%s8250_s0 + $0x328] sm:$0xff] }
  0x5c   : > { %1226 = vmatpush.msrb.mxu3 %v4621_v27  ;;  %1140 = vmatpush.msrb.mxu0 %v4614_v29  ;;  %v4696_v27 = vld [vmem:[%s8250_s0 + $0x330] sm:$0xff]  ;;  %v1282_v29 = vrot.slane %v5518_v24, 4 }
  0x5d   : > { %1169 = vmatpush.msrb.mxu1 %v4615_v30  ;;  %1198 = vmatpush.msrb.mxu2 %v4616_v31 }
  0x5e   : > { %1227 = vmatpush.msrb.mxu3 %v4617_v32 }
  0x60   : > { %4557 = vmatmul.msk.f32.gmra.mxu0 %vm621_vm2, %v5518_v24 }
  0x61   : > { %4562 = vmatmul.msk.f32.gmra.mxu1 %vm621_vm2, %v5518_v24  ;;  %4567 = vmatmul.msk.f32.gmra.mxu2 %vm621_vm2, %v5518_v24 }
  0x62   : > { %4572 = vmatmul.msk.f32.gmra.mxu3 %vm621_vm2, %v5518_v24 }
  0x68   : > { %4558 = vmatmul.msk.f32.gmra.mxu0 %vm621_vm2, %v5568_v40 }
  0x69   : > { %4563 = vmatmul.msk.f32.gmra.mxu1 %vm621_vm2, %v5568_v40  ;;  %4568 = vmatmul.msk.f32.gmra.mxu2 %vm621_vm2, %v5568_v40 }
  0x6a   : > { %4573 = vmatmul.msk.f32.gmra.mxu3 %vm621_vm2, %v5568_v40 }
  0x70   : > { %4595 = vmatmul.msk.f32.vlgmr.msra.gmra.mxu0 %vm621_vm2, %v919_v28 }
  0x71   : > { %4600 = vmatmul.msk.f32.vlgmr.msra.gmra.mxu1 %vm621_vm2, %v919_v28  ;;  %4605 = vmatmul.msk.f32.vlgmr.msra.gmra.mxu2 %vm621_vm2, %v919_v28 }
  0x72   : > { %4610 = vmatmul.msk.f32.vlgmr.msra.gmra.mxu3 %vm621_vm2, %v919_v28  ;;  %4674 = vmatpush.msk.msra.mxu0 %vm630_vm0, %v4670_v37  ;;  %v4697_v28 = vld [vmem:[%s8250_s0 + $0x338] sm:$0xff] }
  0x73   : > { %4679 = vmatpush.msk.msra.mxu1 %vm630_vm0, %v4671_v38  ;;  %4684 = vmatpush.msk.msra.mxu2 %vm630_vm0, %v4672_v39 }
  0x74   : > { %4689 = vmatpush.msk.msra.mxu3 %vm630_vm0, %v4673_v41  ;;  %1320 = vmatpush.msra.mxu0 %v4666_v44 }
  0x75   : > { %1349 = vmatpush.msra.mxu1 %v4667_v45  ;;  %1378 = vmatpush.msra.mxu2 %v4668_v46 }
  0x76   : > { %1407 = vmatpush.msra.mxu3 %v4669_v47  ;;  %1321 = vmatpush.msra.mxu0 %v4662_v48 }
  0x77   : > { %1350 = vmatpush.msra.mxu1 %v4663_v49  ;;  %1379 = vmatpush.msra.mxu2 %v4664_v50  ;;  %v4750_v49 = vld [vmem:[%s8250_s0 + $0x440] sm:$0xf]  ;;  %v4751_v50 = vld [vmem:[%s8250_s0 + $0x448] sm:$0xf] }
  0x78   : > { %4596 = vmatmul.msk.f32.gmra.mxu0 %vm621_vm2, %v921_v34  ;;  %1408 = vmatpush.msra.mxu3 %v4665_v51  ;;  %v4752_v51 = vld [vmem:[%s8250_s0 + $0x450] sm:$0xf] }
  0x79   : > { %4601 = vmatmul.msk.f32.gmra.mxu1 %vm621_vm2, %v921_v34  ;;  %4606 = vmatmul.msk.f32.gmra.mxu2 %vm621_vm2, %v921_v34 }
  0x7a   : > { %4611 = vmatmul.msk.f32.gmra.mxu3 %vm621_vm2, %v921_v34  ;;  %1322 = vmatpush.msra.mxu0 %v4658_v53  ;;  %v1283_v34 = vsel %vm630_vm0, %v1280_v6, %v1282_v29  ;;  %v1462_v53 = vrot.slane %v5504_v18, 5  ;;  %v4740_v6 = vld [vmem:[%s8250_s0 + $0x3f0] sm:$0xff] }
  0x7b   : > { %1351 = vmatpush.msra.mxu1 %v4659_v54  ;;  %1380 = vmatpush.msra.mxu2 %v4660_v55  ;;  %v1463_v54 = vrot.slane %v5513_v21, 5  ;;  %v4746_v55 = vld [vmem:[%s8250_s0 + $0x420] sm:$0xff] }
  0x7c   : > { %1409 = vmatpush.msra.mxu3 %v4661_v56  ;;  %1323 = vmatpush.msra.mxu0 %v4654_v57  ;;  %v4747_v56 = vld [vmem:[%s8250_s0 + $0x428] sm:$0xff]  ;;  %v4748_v57 = vld [vmem:[%s8250_s0 + $0x430] sm:$0xff] }
  0x7d   : > { %1352 = vmatpush.msra.mxu1 %v4655_v58  ;;  %1381 = vmatpush.msra.mxu2 %v4656_v59  ;;  %v4749_v58 = vld [vmem:[%s8250_s0 + $0x438] sm:$0xff]  ;;  %v4742_v59 = vld [vmem:[%s8250_s0 + $0x400] sm:$0xff] }
  0x7e   : > { %1410 = vmatpush.msra.mxu3 %v4657_v60  ;;  %v4743_v60 = vld [vmem:[%s8250_s0 + $0x408] sm:$0xff] }
  0x80   : > { %4597 = vmatmul.msk.f32.gmra.mxu0 %vm621_vm2, %v923_v36 }
  0x81   : > { %4602 = vmatmul.msk.f32.gmra.mxu1 %vm621_vm2, %v923_v36  ;;  %4607 = vmatmul.msk.f32.gmra.mxu2 %vm621_vm2, %v923_v36 }
  0x82   : > { %4612 = vmatmul.msk.f32.gmra.mxu3 %vm621_vm2, %v923_v36 }
  0x88   : > { %4598 = vmatmul.msk.f32.gmra.mxu0 %vm621_vm2, %v922_v35 }
  0x89   : > { %4603 = vmatmul.msk.f32.gmra.mxu1 %vm621_vm2, %v922_v35  ;;  %4608 = vmatmul.msk.f32.gmra.mxu2 %vm621_vm2, %v922_v35 }
  0x8a   : > { %4613 = vmatmul.msk.f32.gmra.mxu3 %vm621_vm2, %v922_v35  ;;  %v1284_v35 = vrot.slane %v5568_v40, 4 }
  0x8c   : > { %v1285_v41 = vsel %vm630_vm0, %v1282_v29, %v1284_v35  ;;  %v1287_v48 = vsel %vm630_vm0, %v1284_v35, %v1286_v43  ;;  %v1469_v35 = vrot.slane %v5978_v42, 5 }
  0x90   : > { %4635 = vmatmul.msk.f32.vlgmr.msrb.gmra.mxu0 %vm621_vm2, %v1100_v52 }
  0x91   : > { %4640 = vmatmul.msk.f32.vlgmr.msrb.gmra.mxu1 %vm621_vm2, %v1100_v52  ;;  %4645 = vmatmul.msk.f32.vlgmr.msrb.gmra.mxu2 %vm621_vm2, %v1100_v52 }
  0x92   : > { %4650 = vmatmul.msk.f32.vlgmr.msrb.gmra.mxu3 %vm621_vm2, %v1100_v52  ;;  %4714 = vmatpush.msk.msrb.mxu0 %vm630_vm0, %v4710_v1  ;;  %v4753_v52 = vld [vmem:[%s8250_s0 + $0x458] sm:$0xf] }
  0x93   : > { %4719 = vmatpush.msk.msrb.mxu1 %vm630_vm0, %v4711_v2  ;;  %4724 = vmatpush.msk.msrb.mxu2 %vm630_vm0, %v4712_v3  ;;  %v1464_v3 = vsel %vm1461_vm5, %v1462_v53, %v1463_v54  ;;  %v1645_v53 = vrot.slane %v5504_v18, 6  ;;  %v4789_v18 = vld [vmem:[%s8250_s0 + $0x4d8] sm:$0xff] }
  0x94   : > { %4729 = vmatpush.msk.msrb.mxu3 %vm630_vm0, %v4713_v4  ;;  %1503 = vmatpush.msrb.mxu0 %v4706_v7  ;;  %v4738_v4 = vld [vmem:[%s8250_s0 + $0x3e0] sm:$0xff]  ;;  %v4741_v7 = vld [vmem:[%s8250_s0 + $0x3f8] sm:$0xff] }
  0x95   : > { %1532 = vmatpush.msrb.mxu1 %v4707_v8  ;;  %1561 = vmatpush.msrb.mxu2 %v4708_v9  ;;  %v4734_v8 = vld [vmem:[%s8250_s0 + $0x3c0] sm:$0xff]  ;;  %v4735_v9 = vld [vmem:[%s8250_s0 + $0x3c8] sm:$0xff] }
  0x96   : > { %1590 = vmatpush.msrb.mxu3 %v4709_v10  ;;  %1504 = vmatpush.msrb.mxu0 %v4702_v11  ;;  %v1465_v10 = vrot.slane %v5518_v24, 5  ;;  %v4736_v11 = vld [vmem:[%s8250_s0 + $0x3d0] sm:$0xff] }
  0x97   : > { %1533 = vmatpush.msrb.mxu1 %v4703_v12  ;;  %1562 = vmatpush.msrb.mxu2 %v4704_v13  ;;  %v4737_v12 = vld [vmem:[%s8250_s0 + $0x3d8] sm:$0xff] }
  0x98   : > { %4636 = vmatmul.msk.f32.gmra.mxu0 %vm621_vm2, %v1102_v62  ;;  %1591 = vmatpush.msrb.mxu3 %v4705_v14 }
  0x99   : > { %4641 = vmatmul.msk.f32.gmra.mxu1 %vm621_vm2, %v1102_v62  ;;  %4646 = vmatmul.msk.f32.gmra.mxu2 %vm621_vm2, %v1102_v62 }
  0x9a   : > { %4651 = vmatmul.msk.f32.gmra.mxu3 %vm621_vm2, %v1102_v62  ;;  %1505 = vmatpush.msrb.mxu0 %v4698_v19 }
  0x9b   : > { %1534 = vmatpush.msrb.mxu1 %v4699_v20  ;;  %1563 = vmatpush.msrb.mxu2 %v4700_v22 }
  0x9c   : > { %1592 = vmatpush.msrb.mxu3 %v4701_v23  ;;  %1506 = vmatpush.msrb.mxu0 %v4694_v25  ;;  %v1466_v23 = vsel %vm1461_vm5, %v1463_v54, %v1465_v10  ;;  %v1467_v25 = vrot.slane %v5568_v40, 5  ;;  %v1646_v54 = vrot.slane %v5513_v21, 6 }
  0x9d   : > { %1535 = vmatpush.msrb.mxu1 %v4695_v26  ;;  %1564 = vmatpush.msrb.mxu2 %v4696_v27 }
  0x9e   : > { %1593 = vmatpush.msrb.mxu3 %v4697_v28 }
  0xa0   : > { %4637 = vmatmul.msk.f32.gmra.mxu0 %vm621_vm2, %v1104_v0 }
  0xa1   : > { %4642 = vmatmul.msk.f32.gmra.mxu1 %vm621_vm2, %v1104_v0  ;;  %4647 = vmatmul.msk.f32.gmra.mxu2 %vm621_vm2, %v1104_v0 }
  0xa2   : > { %4652 = vmatmul.msk.f32.gmra.mxu3 %vm621_vm2, %v1104_v0  ;;  %v4745_v0 = vld [vmem:[%s8250_s0 + $0x418] sm:$0xff] }
  0xa8   : > { %4638 = vmatmul.msk.f32.gmra.mxu0 %vm621_vm2, %v1103_v63 }
  0xa9   : > { %4643 = vmatmul.msk.f32.gmra.mxu1 %vm621_vm2, %v1103_v63  ;;  %4648 = vmatmul.msk.f32.gmra.mxu2 %vm621_vm2, %v1103_v63 }
  0xaa   : > { %4653 = vmatmul.msk.f32.gmra.mxu3 %vm621_vm2, %v1103_v63 }
  0xad   : > { %v5920_v15 = vpop.f32.mrf.mxu0 }
  0xae   : > { %v5922_v16 = vpop.f32.mrf.mxu1 }
  0xb0   : > { %4675 = vmatmul.msk.f32.vlgmr.msra.gmra.mxu0 %vm621_vm2, %v1281_v17 }
  0xb1   : > { %4680 = vmatmul.msk.f32.vlgmr.msra.gmra.mxu1 %vm621_vm2, %v1281_v17  ;;  %4685 = vmatmul.msk.f32.vlgmr.msra.gmra.mxu2 %vm621_vm2, %v1281_v17 }
  0xb2   : > { %4690 = vmatmul.msk.f32.vlgmr.msra.gmra.mxu3 %vm621_vm2, %v1281_v17  ;;  %4754 = vmatpush.msk.msra.mxu0 %vm630_vm0, %v4750_v49 }
  0xb3   : > { %4759 = vmatpush.msk.msra.mxu1 %vm630_vm0, %v4751_v50  ;;  %4764 = vmatpush.msk.msra.mxu2 %vm630_vm0, %v4752_v51  ;;  %v1470_v50 = vsel %vm1461_vm5, %v1467_v25, %v1469_v35  ;;  %v4790_v51 = vld [vmem:[%s8250_s0 + $0x4e0] sm:$0xf]  ;;  %v1650_v35 = vrot.slane %v5568_v40, 6 }
  0xb4   : > { %v5954_v30 = vpop.f32.mrf.mxu2  ;;  %4769 = vmatpush.msk.msra.mxu3 %vm630_vm0, %v4753_v52  ;;  %1686 = vmatpush.msra.mxu0 %v4746_v55  ;;  %v4791_v52 = vld [vmem:[%s8250_s0 + $0x4e8] sm:$0xf]  ;;  %v4786_v55 = vld [vmem:[%s8250_s0 + $0x4c0] sm:$0xff] }
  0xb5   : > { %v5956_v31 = vpop.f32.mrf.mxu3  ;;  %v5958_v32 = vpop.f32.mrf.mxu0  ;;  %1715 = vmatpush.msra.mxu1 %v4747_v56  ;;  %1744 = vmatpush.msra.mxu2 %v4748_v57  ;;  %v4787_v56 = vld [vmem:[%s8250_s0 + $0x4c8] sm:$0xff]  ;;  %v4788_v57 = vld [vmem:[%s8250_s0 + $0x4d0] sm:$0xff] }
  0xb6   : > { %v5960_v33 = vpop.f32.mrf.mxu1  ;;  %1773 = vmatpush.msra.mxu3 %v4749_v58  ;;  %1687 = vmatpush.msra.mxu0 %v4742_v59  ;;  %v4782_v58 = vld [vmem:[%s8250_s0 + $0x4a0] sm:$0xff]  ;;  %v4783_v59 = vld [vmem:[%s8250_s0 + $0x4a8] sm:$0xff] }
  0xb7   : > { %1716 = vmatpush.msra.mxu1 %v4743_v60  ;;  %1745 = vmatpush.msra.mxu2 %v4744_v61  ;;  %v4784_v60 = vld [vmem:[%s8250_s0 + $0x4b0] sm:$0xff] }
  0xb8   : > { %4676 = vmatmul.msk.f32.gmra.mxu0 %vm621_vm2, %v1283_v34  ;;  %1774 = vmatpush.msra.mxu3 %v4745_v0 }
  0xb9   : > { %4681 = vmatmul.msk.f32.gmra.mxu1 %vm621_vm2, %v1283_v34  ;;  %4686 = vmatmul.msk.f32.gmra.mxu2 %vm621_vm2, %v1283_v34 }
  0xba   : > { %4691 = vmatmul.msk.f32.gmra.mxu3 %vm621_vm2, %v1283_v34  ;;  %1688 = vmatpush.msra.mxu0 %v4738_v4  ;;  %v1468_v34 = vsel %vm1461_vm5, %v1465_v10, %v1467_v25  ;;  %v4781_v10 = vld [vmem:[%s8250_s0 + $0x498] sm:$0xff] }
  0xbb   : > { %1717 = vmatpush.msra.mxu1 %v4739_v5  ;;  %1746 = vmatpush.msra.mxu2 %v4740_v6 }
  0xbc   : > { %v5968_v36 = vpop.f32.mrf.mxu2  ;;  %1775 = vmatpush.msra.mxu3 %v4741_v7  ;;  %1689 = vmatpush.msra.mxu0 %v4734_v8  ;;  %v1647_v8 = vsel %vm1644_vm6, %v1645_v53, %v1646_v54 }
  0xbd   : > { %v5970_v37 = vpop.f32.mrf.mxu3  ;;  %v5972_v38 = vpop.f32.mrf.mxu0  ;;  %1718 = vmatpush.msra.mxu1 %v4735_v9  ;;  %1747 = vmatpush.msra.mxu2 %v4736_v11  ;;  %v4778_v9 = vld [vmem:[%s8250_s0 + $0x480] sm:$0xff] }
  0xbe   : > { %v5974_v39 = vpop.f32.mrf.mxu1  ;;  %1776 = vmatpush.msra.mxu3 %v4737_v12  ;;  %v4774_v11 = vld [vmem:[%s8250_s0 + $0x460] sm:$0xff]  ;;  %v4775_v12 = vld [vmem:[%s8250_s0 + $0x468] sm:$0xff] }
  0xc0   : > { %4677 = vmatmul.msk.f32.gmra.mxu0 %vm621_vm2, %v1285_v41 }
  0xc1   : > { %4682 = vmatmul.msk.f32.gmra.mxu1 %vm621_vm2, %v1285_v41  ;;  %4687 = vmatmul.msk.f32.gmra.mxu2 %vm621_vm2, %v1285_v41 }
  0xc2   : > { %4692 = vmatmul.msk.f32.gmra.mxu3 %vm621_vm2, %v1285_v41 }
  0xc4   : > { %v5985_v44 = vpop.f32.mrf.mxu2 }
  0xc5   : > { %v5987_v45 = vpop.f32.mrf.mxu3  ;;  %v5989_v46 = vpop.f32.mrf.mxu0 }
  0xc6   : > { %v5991_v47 = vpop.f32.mrf.mxu1 }
  0xc8   : > { %4678 = vmatmul.msk.f32.gmra.mxu0 %vm621_vm2, %v1287_v48 }
  0xc9   : > { %4683 = vmatmul.msk.f32.gmra.mxu1 %vm621_vm2, %v1287_v48  ;;  %4688 = vmatmul.msk.f32.gmra.mxu2 %vm621_vm2, %v1287_v48 }
  0xca   : > { %4693 = vmatmul.msk.f32.gmra.mxu3 %vm621_vm2, %v1287_v48 }
  0xcc   : > { %v6037_v62 = vpop.f32.mrf.mxu2 }
  0xcd   : > { %v6039_v63 = vpop.f32.mrf.mxu3  ;;  %v6044_v1 = vpop.f32.mrf.mxu0 }
  0xce   : > { %v6046_v2 = vpop.f32.mrf.mxu1 }
  0xd0   : > { %4715 = vmatmul.msk.f32.vlgmr.msrb.gmra.mxu0 %vm621_vm2, %v1464_v3 }
  0xd1   : > { %4720 = vmatmul.msk.f32.vlgmr.msrb.gmra.mxu1 %vm621_vm2, %v1464_v3  ;;  %4725 = vmatmul.msk.f32.vlgmr.msrb.gmra.mxu2 %vm621_vm2, %v1464_v3 }
  0xd2   : > { %4730 = vmatmul.msk.f32.vlgmr.msrb.gmra.mxu3 %vm621_vm2, %v1464_v3  ;;  %4794 = vmatpush.msk.msrb.mxu0 %vm630_vm0, %v4790_v51  ;;  %v4785_v3 = vld [vmem:[%s8250_s0 + $0x4b8] sm:$0xff] }
  0xd3   : > { %4799 = vmatpush.msk.msrb.mxu1 %vm630_vm0, %v4791_v52 }
  0xd4   : > { %v854_v13 = vpop.f32.mrf.mxu2  ;;  %1869 = vmatpush.msrb.mxu0 %v4786_v55 }
  0xd5   : > { %v883_v14 = vpop.f32.mrf.mxu3  ;;  %v6079_v17 = vadd.f32 %v854_v13, %v5954_v30  ;;  %v6084_v20 = vpop.f32.mrf.mxu0  ;;  %1898 = vmatpush.msrb.mxu1 %v4787_v56  ;;  %v1648_v13 = vrot.slane %v5518_v24, 6 }
  0xd6   : > { %v6082_v19 = vadd.f32 %v883_v14, %v5956_v31  ;;  %v6086_v22 = vpop.f32.mrf.mxu1  ;;  %1870 = vmatpush.msrb.mxu0 %v4782_v58  ;;  %v4776_v14 = vld [vmem:[%s8250_s0 + $0x470] sm:$0xff]  ;;  %v1829_v58 = vrot.slane %v5513_v21, 7 }
  0xd7   : > { %1899 = vmatpush.msrb.mxu1 %v4783_v59  ;;  %v1651_v52 = vsel %vm1644_vm6, %v1648_v13, %v1650_v35  ;;  %v5185_v21 = vld [vmem:[%s5483_s1 + $0x10] sm:$0xff] }
  0xd8   : > { %4716 = vmatmul.msk.f32.gmra.mxu0 %vm621_vm2, %v1466_v23 }
  0xd9   : > { %4721 = vmatmul.msk.f32.gmra.mxu1 %vm621_vm2, %v1466_v23  ;;  %4726 = vmatmul.msk.f32.gmra.mxu2 %vm621_vm2, %v1466_v23 }
  0xda   : > { %4731 = vmatmul.msk.f32.gmra.mxu3 %vm621_vm2, %v1466_v23  ;;  %1871 = vmatpush.msrb.mxu0 %v4778_v9  ;;  %v4777_v23 = vld [vmem:[%s8250_s0 + $0x478] sm:$0xff] }
  0xdc   : > { %v857_v26 = vpop.f32.mrf.mxu2  ;;  %1872 = vmatpush.msrb.mxu0 %v4774_v11 }
  0xdd   : > { %v886_v27 = vpop.f32.mrf.mxu3  ;;  %v6095_v28 = vadd.f32 %v857_v26, %v5968_v36  ;;  %v6100_v30 = vpop.f32.mrf.mxu0 }
  0xde   : > { %v6098_v29 = vadd.f32 %v886_v27, %v5970_v37  ;;  %v6102_v31 = vpop.f32.mrf.mxu1 }
  0xe0   : > { %4717 = vmatmul.msk.f32.gmra.mxu0 %vm621_vm2, %v1468_v34 }
  0xe1   : > { %4722 = vmatmul.msk.f32.gmra.mxu1 %vm621_vm2, %v1468_v34  ;;  %4727 = vmatmul.msk.f32.gmra.mxu2 %vm621_vm2, %v1468_v34 }
  0xe2   : > { %4732 = vmatmul.msk.f32.gmra.mxu3 %vm621_vm2, %v1468_v34  ;;  %v1649_v34 = vsel %vm1644_vm6, %v1646_v54, %v1648_v13 }
  0xe4   : > { %v860_v36 = vpop.f32.mrf.mxu2 }
  0xe5   : > { %v889_v41 = vpop.f32.mrf.mxu3  ;;  %v6111_v37 = vadd.f32 %v860_v36, %v5985_v44  ;;  %v6116_v48 = vpop.f32.mrf.mxu0  ;;  %v4792_v44 = vld [vmem:[%s8250_s0 + $0x4f0] sm:$0xf] }
  0xe6   : > { %v6114_v43 = vadd.f32 %v889_v41, %v5987_v45  ;;  %v6118_v49 = vpop.f32.mrf.mxu1  ;;  %v4793_v45 = vld [vmem:[%s8250_s0 + $0x4f8] sm:$0xf]  ;;  %4804 = vmatpush.msk.msrb.mxu2 %vm630_vm0, %v4792_v44  ;;  %v1652_v44 = vrot.slane %v5978_v42, 6 }
  0xe7   : > { %4809 = vmatpush.msk.msrb.mxu3 %vm630_vm0, %v4793_v45 }
  0xe8   : > { %4718 = vmatmul.msk.f32.gmra.mxu0 %vm621_vm2, %v1470_v50  ;;  %1927 = vmatpush.msrb.mxu2 %v4788_v57  ;;  %v1653_v56 = vsel %vm1644_vm6, %v1650_v35, %v1652_v44  ;;  %v5184_v57 = vld [vmem:[%s5483_s1] sm:$0xff]  ;;  %s556_s1 = sand.u32 1, %s5274_s25  }
  0xe9   : > { %4723 = vmatmul.msk.f32.gmra.mxu1 %vm621_vm2, %v1470_v50  ;;  %4728 = vmatmul.msk.f32.gmra.mxu2 %vm621_vm2, %v1470_v50  ;;  %s557_s18 = scalar_lea.vmem [#allocation5], %s556_s1  ;;  %s4428_s22 = scalar_lea.sflag [#allocation4], %s556_s1 }
  0xea   : > { %4733 = vmatmul.msk.f32.gmra.mxu3 %vm621_vm2, %v1470_v50  ;;  %1928 = vmatpush.msrb.mxu2 %v4784_v60  ;;  %s4438_s21 = sshll.u32 %s557_s18, 4  ;;  %s4439_s21 = int_to_ptr.vmem [resolvable:$true] %s4438_s21 }
  0xeb   : > { %1956 = vmatpush.msrb.mxu3 %v4789_v18  ;;  %v1828_v18 = vrot.slane %v5184_v57, 7 }
  0xec   : > { %v863_v61 = vpop.f32.mrf.mxu2 }
  0xed   : > { %v892_v0 = vpop.f32.mrf.mxu3  ;;  %v6168_v4 = vadd.f32 %v863_v61, %v6037_v62  ;;  %v6173_v6 = vpop.f32.mrf.mxu0  ;;  %v4779_v62 = vld [vmem:[%s8250_s0 + $0x488] sm:$0xff]  ;;  %1957 = vmatpush.msrb.mxu3 %v4785_v3  ;;  %v1830_v3 = vsel %vm1827_vm7, %v1828_v18, %v1829_v58 }
  0xee   : > { %v6171_v5 = vadd.f32 %v892_v0, %v6039_v63  ;;  %v6175_v7 = vpop.f32.mrf.mxu1  ;;  %1900 = vmatpush.msrb.mxu1 %v4779_v62  ;;  %v4780_v63 = vld [vmem:[%s8250_s0 + $0x490] sm:$0xff] }
  0xef   : > { %1929 = vmatpush.msrb.mxu2 %v4780_v63  ;;  %1958 = vmatpush.msrb.mxu3 %v4781_v10 }
  0xf0   : > { %4755 = vmatmul.msk.f32.vlgmr.msra.gmra.mxu0 %vm621_vm2, %v1647_v8  ;;  %1901 = vmatpush.msrb.mxu1 %v4775_v12  ;;  %v1833_v12 = vrot.slane %v5568_v40, 7  ;;  %v1835_v40 = vrot.slane %v5978_v42, 7 }
  0xf1   : > { %4760 = vmatmul.msk.f32.vlgmr.msra.gmra.mxu1 %vm621_vm2, %v1647_v8  ;;  %4765 = vmatmul.msk.f32.vlgmr.msra.gmra.mxu2 %vm621_vm2, %v1647_v8 }
  0xf2   : > { %4770 = vmatmul.msk.f32.vlgmr.msra.gmra.mxu3 %vm621_vm2, %v1647_v8  ;;  %1930 = vmatpush.msrb.mxu2 %v4776_v14  ;;  %v1831_v8 = vrot.slane %v5185_v21, 7  ;;  %v1836_v18 = vsel %vm1827_vm7, %v1833_v12, %v1835_v40 }
  0xf3   : > { %1959 = vmatpush.msrb.mxu3 %v4777_v23 }
  0xf4   : > { %v6207_v25 = vpop.f32.mrf.mxu2  ;;  %v1832_v11 = vsel %vm1827_vm7, %v1829_v58, %v1831_v8  ;;  %v1834_v35 = vsel %vm1827_vm7, %v1831_v8, %v1833_v12 }
  0xf5   : > { %v6209_v26 = vpop.f32.mrf.mxu3  ;;  %v6211_v27 = vpop.f32.mrf.mxu0 }
  0xf6   : > { %v6213_v24 = vpop.f32.mrf.mxu1 }
  0xf8   : > { %4756 = vmatmul.msk.f32.gmra.mxu0 %vm621_vm2, %v1649_v34 }
  0xf9   : > { %4761 = vmatmul.msk.f32.gmra.mxu1 %vm621_vm2, %v1649_v34  ;;  %4766 = vmatmul.msk.f32.gmra.mxu2 %vm621_vm2, %v1649_v34 }
  0xfa   : > { %4771 = vmatmul.msk.f32.gmra.mxu3 %vm621_vm2, %v1649_v34 }
  0xfc   : > { %v6221_v36 = vpop.f32.mrf.mxu2 }
  0xfd   : > { %v6223_v41 = vpop.f32.mrf.mxu3  ;;  %v6225_v50 = vpop.f32.mrf.mxu0 }
  0xfe   : > { %v6227_v51 = vpop.f32.mrf.mxu1 }
 0x100   : > { %4757 = vmatmul.msk.f32.gmra.mxu0 %vm621_vm2, %v1651_v52 }
 0x101   : > { %4762 = vmatmul.msk.f32.gmra.mxu1 %vm621_vm2, %v1651_v52  ;;  %4767 = vmatmul.msk.f32.gmra.mxu2 %vm621_vm2, %v1651_v52 }
 0x102   : > { %4772 = vmatmul.msk.f32.gmra.mxu3 %vm621_vm2, %v1651_v52 }
 0x104   : > { %v6235_v45 = vpop.f32.mrf.mxu2 }
 0x105   : > { %v6237_v53 = vpop.f32.mrf.mxu3  ;;  %v6239_v54 = vpop.f32.mrf.mxu0 }
 0x106   : > { %v6241_v55 = vpop.f32.mrf.mxu1 }
 0x108   : > { %4758 = vmatmul.msk.f32.gmra.mxu0 %vm621_vm2, %v1653_v56 }
 0x109   : > { %4763 = vmatmul.msk.f32.gmra.mxu1 %vm621_vm2, %v1653_v56  ;;  %4768 = vmatmul.msk.f32.gmra.mxu2 %vm621_vm2, %v1653_v56 }
 0x10a   : > { %4773 = vmatmul.msk.f32.gmra.mxu3 %vm621_vm2, %v1653_v56 }
 0x10c   : > { %v6250_v59 = vpop.f32.mrf.mxu2 }
 0x10d   : > { %v6252_v60 = vpop.f32.mrf.mxu3  ;;  %v6254_v61 = vpop.f32.mrf.mxu0 }
 0x10e   : > { %v6256_v0 = vpop.f32.mrf.mxu1 }
 0x110   : > { %4795 = vmatmul.msk.f32.vlgmr.msrb.gmra.mxu0 %vm621_vm2, %v1830_v3 }
 0x111   : > { %4800 = vmatmul.msk.f32.vlgmr.msrb.gmra.mxu1 %vm621_vm2, %v1830_v3  ;;  %4805 = vmatmul.msk.f32.vlgmr.msrb.gmra.mxu2 %vm621_vm2, %v1830_v3 }
 0x112   : > { %4810 = vmatmul.msk.f32.vlgmr.msrb.gmra.mxu3 %vm621_vm2, %v1830_v3 }
 0x114   : > { %v6264_v9 = vpop.f32.mrf.mxu2 }
 0x115   : > { %v6266_v62 = vpop.f32.mrf.mxu3  ;;  %v6268_v63 = vpop.f32.mrf.mxu0 }
 0x116   : > { %v6270_v10 = vpop.f32.mrf.mxu1 }
 0x118   : > { %4796 = vmatmul.msk.f32.gmra.mxu0 %vm621_vm2, %v1832_v11 }
 0x119   : > { %4801 = vmatmul.msk.f32.gmra.mxu1 %vm621_vm2, %v1832_v11  ;;  %4806 = vmatmul.msk.f32.gmra.mxu2 %vm621_vm2, %v1832_v11 }
 0x11a   : > { %4811 = vmatmul.msk.f32.gmra.mxu3 %vm621_vm2, %v1832_v11 }
 0x11c   : > { %v6278_v13 = vpop.f32.mrf.mxu2 }
 0x11d   : > { %v6280_v14 = vpop.f32.mrf.mxu3  ;;  %v6282_v23 = vpop.f32.mrf.mxu0 }
 0x11e   : > { %v6284_v34 = vpop.f32.mrf.mxu1 }
 0x120   : > { %4797 = vmatmul.msk.f32.gmra.mxu0 %vm621_vm2, %v1834_v35 }
 0x121   : > { %4802 = vmatmul.msk.f32.gmra.mxu1 %vm621_vm2, %v1834_v35  ;;  %4807 = vmatmul.msk.f32.gmra.mxu2 %vm621_vm2, %v1834_v35 }
 0x122   : > { %4812 = vmatmul.msk.f32.gmra.mxu3 %vm621_vm2, %v1834_v35 }
 0x124   : > { %v6292_v52 = vpop.f32.mrf.mxu2 }
 0x125   : > { %v6294_v44 = vpop.f32.mrf.mxu3  ;;  %v6296_v56 = vpop.f32.mrf.mxu0 }
 0x126   : > { %v6298_v57 = vpop.f32.mrf.mxu1 }
 0x127   : > { %8252 = vst [vmem:[#allocation15_spill] sm:$0xff] %v6298_v57 }
 0x128   : > { %4798 = vmatmul.msk.f32.gmra.mxu0 %vm621_vm2, %v1836_v18 }
 0x129   : > { %4803 = vmatmul.msk.f32.gmra.mxu1 %vm621_vm2, %v1836_v18  ;;  %4808 = vmatmul.msk.f32.gmra.mxu2 %vm621_vm2, %v1836_v18 }
 0x12a   : > { %4813 = vmatmul.msk.f32.gmra.mxu3 %vm621_vm2, %v1836_v18 }
 0x12c   : > { %v6305_v58 = vpop.f32.mrf.mxu2 }
 0x12d   : > { %8253 = vst [vmem:[#allocation16_spill] sm:$0xff] %v6305_v58  ;;  %v6307_v42 = vpop.f32.mrf.mxu3  ;;  %v6309_v3 = vpop.f32.mrf.mxu0 }
 0x12e   : > { %8254 = vst [vmem:[#allocation17_spill] sm:$0xff] %v6307_v42  ;;  %v6311_v21 = vpop.f32.mrf.mxu1 }
 0x12f   : > { %8255 = vst [vmem:[#allocation18_spill] sm:$0xff] %v6309_v3 }
 0x130   : > { %8256 = vst [vmem:[#allocation19_spill] sm:$0xff] %v6311_v21 }
 0x134   : > { %v6313_v8 = vpop.f32.mrf.mxu2 }
 0x135   : > { %8257 = vst [vmem:[#allocation20_spill] sm:$0xff] %v6313_v8  ;;  %v6315_v11 = vpop.f32.mrf.mxu3  ;;  %v6317_v12 = vpop.f32.mrf.mxu0 }
 0x136   : > { %8258 = vst [vmem:[#allocation21_spill] sm:$0xff] %v6315_v11  ;;  %v6319_v35 = vpop.f32.mrf.mxu1 }
 0x137   : > { %8259 = vst [vmem:[#allocation22_spill] sm:$0xff] %v6317_v12 }
 0x138   : > { %8260 = vst [vmem:[#allocation23_spill] sm:$0xff] %v6319_v35 }
 0x13c   : > { %v6321_v40 = vpop.f32.mrf.mxu2 }
 0x13d   : > { %8261 = vst [vmem:[#allocation24_spill] sm:$0xff] %v6321_v40  ;;  %v6323_v57 = vpop.f32.mrf.mxu3  ;;  %v6325_v18 = vpop.f32.mrf.mxu0 }
 0x13e   : > { %8262 = vst [vmem:[#allocation25_spill] sm:$0xff] %v6323_v57  ;;  %v6327_v58 = vpop.f32.mrf.mxu1 }
 0x13f   : > { %8263 = vst [vmem:[#allocation26_spill] sm:$0xff] %v6325_v18 }
 0x140   : > { %8264 = vst [vmem:[#allocation27_spill] sm:$0xff] %v6327_v58 }
 0x144   : > { %v6329_v42 = vpop.f32.mrf.mxu2 }
 0x145   : > { %8265 = vst [vmem:[#allocation28_spill] sm:$0xff] %v6329_v42  ;;  %v6331_v3 = vpop.f32.mrf.mxu3  ;;  %v6333_v21 = vpop.f32.mrf.mxu0 }
 0x146   : > { %8266 = vst [vmem:[#allocation29_spill] sm:$0xff] %v6331_v3  ;;  %v6335_v8 = vpop.f32.mrf.mxu1 }
 0x147   : > { %8267 = vst [vmem:[#allocation30_spill] sm:$0xff] %v6333_v21 }
 0x148   : > { %8268 = vst [vmem:[#allocation31_spill] sm:$0xff] %v6335_v8 }
 0x14c   : > { %v6337_v11 = vpop.f32.mrf.mxu2 }
 0x14d   : > { %8269 = vst [vmem:[#allocation32_spill] sm:$0xff] %v6337_v11  ;;  %v6339_v12 = vpop.f32.mrf.mxu3  ;;  %v6341_v35 = vpop.f32.mrf.mxu0 }
 0x14e   : > { %8270 = vst [vmem:[#allocation33_spill] sm:$0xff] %v6339_v12  ;;  %v6343_v40 = vpop.f32.mrf.mxu1 }
 0x14f   : > { %8271 = vst [vmem:[#allocation34_spill] sm:$0xff] %v6341_v35 }
 0x150   : > { %8272 = vst [vmem:[#allocation35_spill] sm:$0xff] %v6343_v40 }
 0x154   : > { %v6345_v57 = vpop.f32.mrf.mxu2 }
 0x155   : > { %8273 = vst [vmem:[#allocation36_spill] sm:$0xff] %v6345_v57  ;;  %v6347_v18 = vpop.f32.mrf.mxu3  ;;  %v6349_v58 = vpop.f32.mrf.mxu0 }
 0x156   : > { %8274 = vst [vmem:[#allocation37_spill] sm:$0xff] %v6347_v18  ;;  %v6351_v42 = vpop.f32.mrf.mxu1 }
 0x157   : > { %8275 = vst [vmem:[#allocation38_spill] sm:$0xff] %v6349_v58 }
 0x158   : > { %8276 = vst [vmem:[#allocation39_spill] sm:$0xff] %v6351_v42 }
 0x15c   : > { %v6353_v3 = vpop.f32.mrf.mxu2 }
 0x15d   : > { %8277 = vst [vmem:[#allocation40_spill] sm:$0xff] %v6353_v3  ;;  %v6355_v21 = vpop.f32.mrf.mxu3  ;;  %v6357_v8 = vpop.f32.mrf.mxu0 }
 0x15e   : > { %8278 = vst [vmem:[#allocation41_spill] sm:$0xff] %v6355_v21  ;;  %v6359_v11 = vpop.f32.mrf.mxu1 }
 0x15f   : > { %8279 = vst [vmem:[#allocation42_spill] sm:$0xff] %v6357_v8 }
 0x160   : > { %8280 = vst [vmem:[#allocation43_spill] sm:$0xff] %v6359_v11 }
 0x164   : > { %v6361_v12 = vpop.f32.mrf.mxu2 }
 0x165   : > { %8281 = vst [vmem:[#allocation44_spill] sm:$0xff] %v6361_v12  ;;  %v6363_v35 = vpop.f32.mrf.mxu3  ;;  %v6365_v40 = vpop.f32.mrf.mxu0 }
 0x166   : > { %8282 = vst [vmem:[#allocation45_spill] sm:$0xff] %v6363_v35  ;;  %v6367_v57 = vpop.f32.mrf.mxu1 }
 0x167   : > { %8283 = vst [vmem:[#allocation46_spill] sm:$0xff] %v6365_v40 }
 0x168   : > { %8284 = vst [vmem:[#allocation47_spill] sm:$0xff] %v6367_v57 }
 0x16c   : > { %v6369_v18 = vpop.f32.mrf.mxu2 }
 0x16d   : > { %8285 = vst [vmem:[#allocation48_spill] sm:$0xff] %v6369_v18  ;;  %v6371_v58 = vpop.f32.mrf.mxu3  ;;  %v6373_v42 = vpop.f32.mrf.mxu0 }
 0x16e   : > { %8286 = vst [vmem:[#allocation49_spill] sm:$0xff] %v6371_v58  ;;  %v6375_v3 = vpop.f32.mrf.mxu1 }
 0x16f   : > { %8287 = vst [vmem:[#allocation50_spill] sm:$0xff] %v6373_v42 }
 0x170   : > { %8288 = vst [vmem:[#allocation51_spill] sm:$0xff] %v6375_v3 }
 0x174   : > { %v6377_v21 = vpop.f32.mrf.mxu2 }
 0x175   : > { %8289 = vst [vmem:[#allocation52_spill] sm:$0xff] %v6377_v21  ;;  %v6379_v8 = vpop.f32.mrf.mxu3  ;;  %v6381_v11 = vpop.f32.mrf.mxu0 }
 0x176   : > { %8290 = vst [vmem:[#allocation53_spill] sm:$0xff] %v6379_v8  ;;  %v6383_v12 = vpop.f32.mrf.mxu1  ;;  %v797_v8 = vadd.f32 %v6044_v1, %v5920_v15  ;;  %v806_v15 = vadd.f32 %v6116_v48, %v5989_v46 }
 0x177   : > { %8291 = vst [vmem:[#allocation54_spill] sm:$0xff] %v6383_v12  ;;  %v829_v12 = vadd.f32 %v6086_v22, %v5960_v33  ;;  %v1067_v22 = vadd.f32 %v6223_v41, %v6098_v29  ;;  %v1075_v29 = vadd.f32 %v6252_v60, %v6171_v5  ;;  %v8300_v60 = vld [vmem:[#allocation17_spill] sm:$0xff] }
 0x178   : > { %v1072_v48 = vadd.f32 %v6239_v54, %v806_v15  ;;  %v8309_v15 = vld [vmem:[#allocation34_spill] sm:$0xff] }
 0x179   : > { %v1065_v46 = vadd.f32 %v6213_v24, %v829_v12  ;;  %v1248_v24 = vadd.f32 %v6280_v14, %v1067_v22  ;;  %v8303_v14 = vld [vmem:[#allocation20_spill] sm:$0xff] }
 0x17c   : > { %v6385_v35 = vpop.f32.mrf.mxu2 }
 0x17d   : > { %8292 = vst [vmem:[#allocation55_spill] sm:$0xff] %v6385_v35  ;;  %v6387_v40 = vpop.f32.mrf.mxu3  ;;  %v6389_v57 = vpop.f32.mrf.mxu0  ;;  %v826_v35 = vadd.f32 %v6046_v2, %v5922_v16  ;;  %v835_v16 = vadd.f32 %v6118_v49, %v5991_v47  ;;  %v1062_v2 = vadd.f32 %v6207_v25, %v6079_v17  ;;  %v1066_v47 = vadd.f32 %v6221_v36, %v6095_v28 }
 0x17e   : > { %8293 = vst [vmem:[#allocation56_spill] sm:$0xff] %v6387_v40  ;;  %v6391_v18 = vpop.f32.mrf.mxu1  ;;  %v800_v40 = vadd.f32 %v6084_v20, %v5958_v32  ;;  %v1060_v32 = vadd.f32 %v6173_v6, %v797_v8  ;;  %v1063_v20 = vadd.f32 %v6209_v26, %v6082_v19  ;;  %v1070_v17 = vadd.f32 %v6235_v45, %v6111_v37  ;;  %v8307_v8 = vld [vmem:[#allocation24_spill] sm:$0xff] }
 0x17f   : > { %v1071_v19 = vadd.f32 %v6237_v53, %v6114_v43  ;;  %v1073_v49 = vadd.f32 %v6241_v55, %v835_v16  ;;  %v1074_v28 = vadd.f32 %v6250_v59, %v6168_v4  ;;  %v1243_v25 = vadd.f32 %v6264_v9, %v1062_v2  ;;  %v8298_v53 = vld [vmem:[#allocation15_spill] sm:$0xff]  ;;  %v8299_v55 = vld [vmem:[#allocation16_spill] sm:$0xff] }
 0x180   : > { %v1241_v6 = vadd.f32 %v6254_v61, %v1060_v32  ;;  %v1244_v37 = vadd.f32 %v6266_v62, %v1063_v20  ;;  %v1246_v26 = vadd.f32 %v6270_v10, %v1065_v46  ;;  %v1251_v36 = vadd.f32 %v6292_v52, %v1070_v17  ;;  %v8302_v10 = vld [vmem:[#allocation19_spill] sm:$0xff]  ;;  %v8310_v32 = vld [vmem:[#allocation26_spill] sm:$0xff] }
 0x181   : > { %v1252_v41 = vadd.f32 %v6294_v44, %v1071_v19  ;;  %v1254_v54 = vadd.f32 %v8298_v53, %v1073_v49  ;;  %v1255_v59 = vadd.f32 %v8299_v55, %v1074_v28  ;;  %v1256_v61 = vadd.f32 %v8300_v60, %v1075_v29  ;;  %v8305_v44 = vld [vmem:[#allocation22_spill] sm:$0xff]  ;;  %v8311_v2 = vld [vmem:[#allocation27_spill] sm:$0xff]  ;;  %v8316_v49 = vld [vmem:[#allocation32_spill] sm:$0xff] }
 0x182   : > { %v8315_v19 = vld [vmem:[#allocation31_spill] sm:$0xff]  ;;  %v8317_v29 = vld [vmem:[#allocation50_spill] sm:$0xff]  ;;  %v8324_v60 = vld [vmem:[#allocation40_spill] sm:$0xff] }
 0x183   : > { %v1438_v28 = vadd.f32 %v8316_v49, %v1255_v59  ;;  %v8336_v49 = vld [vmem:[#allocation53_spill] sm:$0xff] }
 0x184   : > { %v6393_v58 = vpop.f32.mrf.mxu2 }
 0x185   : > { %8294 = vst [vmem:[#allocation57_spill] sm:$0xff] %v6393_v58  ;;  %v6395_v42 = vpop.f32.mrf.mxu3  ;;  %v6397_v3 = vpop.f32.mrf.mxu0  ;;  %v803_v58 = vadd.f32 %v6100_v30, %v5972_v38  ;;  %v1061_v38 = vadd.f32 %v6175_v7, %v826_v35  ;;  %v8308_v35 = vld [vmem:[#allocation25_spill] sm:$0xff] }
 0x186   : > { %8295 = vst [vmem:[#allocation58_spill] sm:$0xff] %v6395_v42  ;;  %v6399_v21 = vpop.f32.mrf.mxu1 }
 0x187   : > { %8296 = vst [vmem:[#allocation59_spill] sm:$0xff] %v6397_v3  ;;  %v1068_v30 = vadd.f32 %v6225_v50, %v803_v58  ;;  %v1242_v7 = vadd.f32 %v6256_v0, %v1061_v38  ;;  %v1253_v50 = vadd.f32 %v6296_v56, %v1072_v48  ;;  %v8301_v0 = vld [vmem:[#allocation18_spill] sm:$0xff]  ;;  %v8306_v58 = vld [vmem:[#allocation23_spill] sm:$0xff]  ;;  %v1437_v48 = vadd.f32 %v8315_v19, %v1254_v54  ;;  %v8335_v19 = vld [vmem:[#allocation52_spill] sm:$0xff] }
 0x188   : > { %8297 = vst [vmem:[#allocation60_spill] sm:$0xff] %v6399_v21  ;;  %v832_v21 = vadd.f32 %v6102_v31, %v5974_v39  ;;  %v1064_v39 = vadd.f32 %v6211_v27, %v800_v40  ;;  %v1247_v27 = vadd.f32 %v6278_v13, %v1066_v47  ;;  %v1424_v9 = vadd.f32 %v8301_v0, %v1241_v6  ;;  %v8313_v47 = vld [vmem:[#allocation29_spill] sm:$0xff] }
 0x189   : > { %v1249_v4 = vadd.f32 %v6282_v23, %v1068_v30  ;;  %v1425_v13 = vadd.f32 %v8302_v10, %v1242_v7  ;;  %v1426_v23 = vadd.f32 %v8303_v14, %v1243_v25  ;;  %v1431_v40 = vadd.f32 %v8308_v35, %v1248_v24  ;;  %v1989_v30 = vld [vmem:[%s8210_s2] sm:$0xf]  ;;  %v8318_v7 = vld [vmem:[#allocation33_spill] sm:$0xff] }
 0x18a   : > { %v1069_v31 = vadd.f32 %v6227_v51, %v832_v21  ;;  %v1245_v43 = vadd.f32 %v6268_v63, %v1064_v39  ;;  %v1429_v21 = vadd.f32 %v8306_v58, %v1246_v26  ;;  %v1430_v12 = vadd.f32 %v8307_v8, %v1247_v27  ;;  %v8312_v39 = vld [vmem:[#allocation28_spill] sm:$0xff]  ;;  %v8321_v24 = vld [vmem:[#allocation37_spill] sm:$0xff]  ;;  %v8327_v14 = vld [vmem:[#allocation51_spill] sm:$0xff] }
 0x18b   : > { %v1607_v16 = vadd.f32 %v8309_v15, %v1424_v9  ;;  %v1432_v38 = vadd.f32 %v8310_v32, %v1249_v4  ;;  %v1434_v46 = vadd.f32 %v8312_v39, %v1251_v36  ;;  %v1435_v22 = vadd.f32 %v8313_v47, %v1252_v41  ;;  %v8320_v26 = vld [vmem:[#allocation36_spill] sm:$0xff]  ;;  %v8323_v41 = vld [vmem:[#allocation39_spill] sm:$0xff]  ;;  %v8325_v0 = vld [vmem:[#allocation41_spill] sm:$0xff] }
 0x18c   : > { %v6411_v42 = vpop.f32.mrf.mxu2  ;;  %v1250_v5 = vadd.f32 %v6284_v34, %v1069_v31  ;;  %v8304_v34 = vld [vmem:[#allocation21_spill] sm:$0xff]  ;;  %v1428_v56 = vadd.f32 %v8305_v44, %v1245_v43  ;;  %v8314_v31 = vld [vmem:[#allocation30_spill] sm:$0xff]  ;;  %v1439_v25 = vadd.f32 %v8318_v7, %v1256_v61  ;;  %v1609_v27 = vadd.f32 %v8320_v26, %v1426_v23  ;;  %v8328_v23 = vld [vmem:[#allocation43_spill] sm:$0xff] }
 0x18d   : > { %v6413_v3 = vpop.f32.mrf.mxu3  ;;  %v1874_v1 = vpop.f32.mrf.mxu0  ;;  %v1427_v52 = vadd.f32 %v8304_v34, %v1244_v37  ;;  %v1436_v17 = vadd.f32 %v8314_v31, %v1253_v50  ;;  %v1790_v6 = vadd.f32 %v8317_v29, %v1607_v16  ;;  %v8319_v37 = vld [vmem:[#allocation35_spill] sm:$0xff]  ;;  %v1612_v53 = vadd.f32 %v8323_v41, %v1429_v21  ;;  %v8326_v9 = vld [vmem:[#allocation42_spill] sm:$0xff]  ;;  %v8334_v31 = vld [vmem:[#allocation49_spill] sm:$0xff] }
 0x18e   : > { %v6422_v33 = vpop.f32.mrf.mxu1  ;;  %v1433_v20 = vadd.f32 %v8311_v2, %v1250_v5  ;;  %v1608_v43 = vadd.f32 %v8319_v37, %v1425_v13  ;;  %v8322_v5 = vld [vmem:[#allocation38_spill] sm:$0xff]  ;;  %v1991_v50 = vperm.slane %v1989_v30, 0  ;;  %v1613_v54 = vadd.f32 %v8324_v60, %v1430_v12  ;;  %v8332_v12 = vld [vmem:[#allocation47_spill] sm:$0xff]  ;;  %v8339_v26 = vld [vmem:[#allocation56_spill] sm:$0xff] }
 0x18f   : > { %v1610_v4 = vadd.f32 %v8321_v24, %v1427_v52  ;;  %v1611_v36 = vadd.f32 %v8322_v5, %v1428_v56  ;;  %v1973_v55 = vadd.f32 %v1874_v1, %v1790_v6  ;;  %v1614_v59 = vadd.f32 %v8325_v0, %v1431_v40  ;;  %v8329_v52 = vld [vmem:[#allocation44_spill] sm:$0xff]  ;;  %v8330_v56 = vld [vmem:[#allocation45_spill] sm:$0xff]  ;;  %v8331_v21 = vld [vmem:[#allocation46_spill] sm:$0xff] }
 0x190   : > { %v1615_v10 = vadd.f32 %v8326_v9, %v1432_v38  ;;  %v1791_v61 = vadd.f32 %v8327_v14, %v1608_v43  ;;  %v1616_v44 = vadd.f32 %v8328_v23, %v1433_v20  ;;  %v1617_v58 = vadd.f32 %v8329_v52, %v1434_v46  ;;  %v8333_v40 = vld [vmem:[#allocation48_spill] sm:$0xff]  ;;  %v8338_v43 = vld [vmem:[#allocation55_spill] sm:$0xff]  ;;  %v8340_v5 = vld [vmem:[#allocation57_spill] sm:$0xff] }
 0x191   : > { %v1618_v8 = vadd.f32 %v8330_v56, %v1435_v22  ;;  %v1619_v1 = vadd.f32 %v8331_v21, %v1436_v17  ;;  %v1620_v16 = vadd.f32 %v8332_v12, %v1437_v48  ;;  %v1621_v32 = vadd.f32 %v8333_v40, %v1438_v28  ;;  %v8337_v48 = vld [vmem:[#allocation54_spill] sm:$0xff]  ;;  %v8342_v60 = vld [vmem:[#allocation59_spill] sm:$0xff] }
 0x192   : > { %v1974_v38 = vadd.f32 %v6422_v33, %v1791_v61  ;;  %v1992_v2 = vperm.slane %v1989_v30, 1  ;;  %v1794_v39 = vadd.f32 %v6381_v11, %v1611_v36  ;;  %v1798_v47 = vadd.f32 %v6389_v57, %v1615_v10  ;;  %v8341_v41 = vld [vmem:[#allocation58_spill] sm:$0xff] }
 0x193   : > { %v1799_v20 = vadd.f32 %v6391_v18, %v1616_v44  ;;  %v1999_v46 = vadd.f32 %v1991_v50, %v1973_v55  ;;  %v1622_v22 = vadd.f32 %v8334_v31, %v1439_v25  ;;  %v1792_v17 = vadd.f32 %v8335_v19, %v1609_v27 }
 0x194   : > { %v6460_v51 = vpop.f32.mrf.mxu2  ;;  %v1793_v29 = vadd.f32 %v8336_v49, %v1610_v4  ;;  %v6512_v6 = vperm.slane %v1989_v30, 2  ;;  %v1795_v28 = vadd.f32 %v8337_v48, %v1612_v53  ;;  %v1796_v11 = vadd.f32 %v8338_v43, %v1613_v54 }
 0x195   : > { %v6462_v45 = vpop.f32.mrf.mxu3  ;;  %v1877_v62 = vpop.f32.mrf.mxu0  ;;  %v1797_v57 = vadd.f32 %v8339_v26, %v1614_v59  ;;  %v6517_v24 = vadd.f32 %v1992_v2, %v1974_v38  ;;  %v1994_v18 = vperm.slane %v1989_v30, 3  ;;  %v1800_v25 = vadd.f32 %v8340_v5, %v1617_v58 }
 0x196   : > { %v1906_v63 = vpop.f32.mrf.mxu1  ;;  %v1977_v7 = vadd.f32 %v1877_v62, %v1794_v39  ;;  %v1975_v27 = vadd.f32 %v6460_v51, %v1792_v17  ;;  %v2031_v4 = vmul.f32 0.01, %v1999_v46  ;;  %v1801_v55 = vadd.f32 %v8341_v41, %v1618_v8  ;;  %v8343_v62 = vld [vmem:[#allocation60_spill] sm:$0xff] }
 0x197   : > { %v1978_v36 = vadd.f32 %v1906_v63, %v1795_v28  ;;  %v1802_v53 = vadd.f32 %v8342_v60, %v1619_v1  ;;  %v1803_v0 = vadd.f32 %v8343_v62, %v1620_v16  ;;  %vm2015_vm8 = vcmp.ge.f32.partialorder %v1999_v46, 0.0  ;;  %v2204_v62 = vld [vmem:[%s8212_s4 + $0xe0] sm:$0xff] }
 0x198   : > { %v1804_v54 = vadd.f32 %v6411_v42, %v1621_v32  ;;  %v2003_v59 = vadd.f32 %v1991_v50, %v1977_v7  ;;  %v1805_v51 = vadd.f32 %v6413_v3, %v1622_v22  ;;  %v2032_v52 = vmul.f32 0.01, %v6517_v24 }
 0x199   : > { %v6528_v58 = vadd.f32 %v6512_v6, %v1975_v27  ;;  %v1976_v56 = vadd.f32 %v6462_v45, %v1793_v29  ;;  %v2004_v8 = vadd.f32 %v1992_v2, %v1978_v36  ;;  %v2047_v21 = vsel %vm2015_vm8, %v1999_v46, %v2031_v4  ;;  %v2206_v36 = vld [vmem:[%s8212_s4 + $0xf0] sm:$0xff] }
 0x19a   : > { %v2035_v32 = vmul.f32 0.01, %v2003_v59  ;;  %vm2019_vm13 = vcmp.ge.f32.partialorder %v2003_v59, 0.0  ;;  %vm2016_vm15 = vcmp.ge.f32.partialorder %v6517_v24, 0.0  ;;  %vm2065_vm8 = vcmask 236544  }
 0x19b   : > { %vm2020_vm14 = vcmp.ge.f32.partialorder %v2004_v8, 0.0  ;;  %v2002_v19 = vadd.f32 %v1994_v18, %v1976_v56  ;;  %v2288_v56 = vld [vmem:[%s8212_s4 + $0x380] sm:$0xff] }
 0x19c   : > { %v1935_v34 = vpop.f32.mrf.mxu2  ;;  %v2051_v7 = vsel %vm2019_vm13, %v2003_v59, %v2035_v32  ;;  %vm2017_vm13 = vcmp.ge.f32.partialorder %v6528_v58, 0.0  ;;  %v2234_v59 = vld [vmem:[%s8212_s4 + $0x1d0] sm:$0xff]  ;;  %v2284_v32 = vld [vmem:[%s8212_s4 + $0x360] sm:$0xff] }
 0x19d   : > { %v6497_v13 = vpop.f32.mrf.mxu3  ;;  %v1880_v35 = vpop.f32.mrf.mxu0  ;;  %v1979_v12 = vadd.f32 %v1935_v34, %v1796_v11  ;;  %v2034_v60 = vmul.f32 0.01, %v2002_v19 }
 0x19e   : > { %v1909_v15 = vpop.f32.mrf.mxu1  ;;  %v1981_v33 = vadd.f32 %v1880_v35, %v1798_v47  ;;  %v1980_v39 = vadd.f32 %v6497_v13, %v1797_v57  ;;  %v2036_v47 = vmul.f32 0.01, %v2004_v8  ;;  %v2048_v57 = vsel %vm2016_vm15, %v6517_v24, %v2032_v52  ;;  %v2238_v24 = vld [vmem:[%s8212_s4 + $0x1f0] sm:$0xff] }
 0x19f   : > { %v1982_v37 = vadd.f32 %v1909_v15, %v1799_v20  ;;  %v2005_v13 = vadd.f32 %v6512_v6, %v1979_v12  ;;  %v2198_v52 = vld [vmem:[%s8212_s4 + $0xb0] sm:$0xff]  ;;  %v2224_v12 = vld [vmem:[%s8212_s4 + $0x180] sm:$0xff]  ;;  %vm2292_vm15 = vcmask 654336  }
 0x1a0   : > { %v2007_v14 = vadd.f32 %v1991_v50, %v1981_v33  ;;  %v2006_v29 = vadd.f32 %v1994_v18, %v1980_v39  ;;  %v2052_v33 = vsel %vm2020_vm14, %v2004_v8, %v2036_v47  ;;  %vm2018_vm14 = vcmp.ge.f32.partialorder %v2002_v19, 0.0  ;;  %v2228_v8 = vld [vmem:[%s8212_s4 + $0x1a0] sm:$0xff]  ;;  %v2262_v39 = vld [vmem:[%s8212_s4 + $0x2b0] sm:$0xff] }
 0x1a1   : > { %v2008_v30 = vadd.f32 %v1992_v2, %v1982_v37  ;;  %v2282_v47 = vld [vmem:[%s8212_s4 + $0x350] sm:$0xff] }
 0x1a2   : > { %v2039_v16 = vmul.f32 0.01, %v2007_v14  ;;  %vm2023_vm11 = vcmp.ge.f32.partialorder %v2007_v14, 0.0  ;;  %v2038_v27 = vmul.f32 0.01, %v2006_v29 }
 0x1a3   : > { %v2040_v40 = vmul.f32 0.01, %v2008_v30  ;;  %vm2024_vm12 = vcmp.ge.f32.partialorder %v2008_v30, 0.0 }
 0x1a4   : > { %v1938_v9 = vpop.f32.mrf.mxu2  ;;  %v2055_v17 = vsel %vm2023_vm11, %v2007_v14, %v2039_v16  ;;  %vm2021_vm11 = vcmp.ge.f32.partialorder %v2005_v13, 0.0  ;;  %v2202_v14 = vld [vmem:[%s8212_s4 + $0xd0] sm:$0xff]  ;;  %v2192_v16 = vld [vmem:[%s8212_s4 + $0x80] sm:$0xff] }
 0x1a5   : > { %v1967_v10 = vpop.f32.mrf.mxu3  ;;  %v1883_v61 = vpop.f32.mrf.mxu0  ;;  %v1983_v1 = vadd.f32 %v1938_v9, %v1800_v25  ;;  %v2056_v49 = vsel %vm2024_vm12, %v2008_v30, %v2040_v40  ;;  %v2037_v25 = vmul.f32 0.01, %v2005_v13  ;;  %vm2022_vm12 = vcmp.ge.f32.partialorder %v2006_v29, 0.0  ;;  %v2064_v30 = vld [vmem:[%s8211_s3 + $0x8] sm:$0xf]  ;;  %v2264_v40 = vld [vmem:[%s8212_s4 + $0x2c0] sm:$0xff] }
 0x1a6   : > { %v1912_v23 = vpop.f32.mrf.mxu1  ;;  %v1985_v63 = vadd.f32 %v1883_v61, %v1802_v53  ;;  %v1984_v42 = vadd.f32 %v1967_v10, %v1801_v55  ;;  %v2033_v55 = vmul.f32 0.01, %v6528_v58  ;;  %v2236_v53 = vld [vmem:[%s8212_s4 + $0x1e0] sm:$0xff]  ;;  %v2054_v9 = vsel %vm2022_vm12, %v2006_v29, %v2038_v27  ;;  %v2214_v29 = vld [vmem:[%s8212_s4 + $0x130] sm:$0xff]  ;;  %v2271_v27 = vld [vmem:[%s8212_s4 + $0x2f8] sm:$0xff] }
 0x1a7   : > { %v1986_v44 = vadd.f32 %v1912_v23, %v1803_v0  ;;  %v2009_v45 = vadd.f32 %v6512_v6, %v1983_v1  ;;  %v2053_v0 = vsel %vm2021_vm11, %v2005_v13, %v2037_v25  ;;  %v2232_v61 = vld [vmem:[%s8212_s4 + $0x1c0] sm:$0xff]  ;;  %v2226_v1 = vld [vmem:[%s8212_s4 + $0x190] sm:$0xff]  ;;  %vm3357_vm11 = vcmask 1045507  }
 0x1a8   : > { %v2011_v35 = vadd.f32 %v1991_v50, %v1985_v63  ;;  %v2010_v20 = vadd.f32 %v1994_v18, %v1984_v42  ;;  %v2049_v10 = vsel %vm2017_vm13, %v6528_v58, %v2033_v55  ;;  %v2200_v23 = vld [vmem:[%s8212_s4 + $0xc0] sm:$0xff]  ;;  %v2290_v63 = vld [vmem:[%s8212_s4 + $0x390] sm:$0xff]  ;;  %v2235_v55 = vld [vmem:[%s8212_s4 + $0x1d8] sm:$0xff]  ;;  %vm3373_vm13 = vcmask 1046533  }
 0x1a9   : > { %v2012_v15 = vadd.f32 %v1992_v2, %v1986_v44  ;;  %v2041_v37 = vmul.f32 0.01, %v2009_v45  ;;  %v2230_v44 = vld [vmem:[%s8212_s4 + $0x1b0] sm:$0xff]  ;;  %v2268_v58 = vld [vmem:[%s8212_s4 + $0x2e0] sm:$0xff] }
 0x1aa   : > { %vm2027_vm9 = vcmp.ge.f32.partialorder %v2011_v35, 0.0  ;;  %v2043_v3 = vmul.f32 0.01, %v2011_v35  ;;  %v2042_v43 = vmul.f32 0.01, %v2010_v20  ;;  %v2194_v42 = vld [vmem:[%s8212_s4 + $0x90] sm:$0xff] }
 0x1ab   : > { %vm2028_vm10 = vcmp.ge.f32.partialorder %v2012_v15, 0.0  ;;  %v2044_v38 = vmul.f32 0.01, %v2012_v15  ;;  %v2184_v13 = vld [vmem:[%s8212_s4 + $0x40] sm:$0xff] }
 0x1ac   : > { %v1941_v46 = vpop.f32.mrf.mxu2  ;;  %v2059_v50 = vsel %vm2027_vm9, %v2011_v35, %v2043_v3  ;;  %vm2025_vm9 = vcmp.ge.f32.partialorder %v2009_v45, 0.0  ;;  %v2266_v35 = vld [vmem:[%s8212_s4 + $0x2d0] sm:$0xff]  ;;  %v2176_v25 = vld [vmem:[%s8212_s4] sm:$0xff] }
 0x1ad   : > { %v1970_v31 = vpop.f32.mrf.mxu3  ;;  %v2060_v2 = vsel %vm2028_vm10, %v2012_v15, %v2044_v38  ;;  %v1987_v34 = vadd.f32 %v1941_v46, %v1804_v54  ;;  %4814 = vmatpush.msk.msra.mxu0 %vm1097_vm4, %v2059_v50  ;;  %vm2026_vm10 = vcmp.ge.f32.partialorder %v2010_v20, 0.0  ;;  %v2057_v4 = vsel %vm2025_vm9, %v2009_v45, %v2041_v37  ;;  %v2286_v15 = vld [vmem:[%s8212_s4 + $0x370] sm:$0xff]  ;;  %v2220_v45 = vld [vmem:[%s8212_s4 + $0x160] sm:$0xff] }
 0x1ae   : > { %v1988_v22 = vadd.f32 %v1970_v31, %v1805_v51  ;;  %4817 = vmatpush.msk.msra.mxu1 %vm1097_vm4, %v2060_v2  ;;  %v2058_v41 = vsel %vm2026_vm10, %v2010_v20, %v2042_v43  ;;  %v2050_v54 = vsel %vm2018_vm14, %v2002_v19, %v2034_v60  ;;  %v2270_v51 = vld [vmem:[%s8212_s4 + $0x2f0] sm:$0xff]  ;;  %v2188_v20 = vld [vmem:[%s8212_s4 + $0x60] sm:$0xff]  ;;  %v2265_v60 = vld [vmem:[%s8212_s4 + $0x2c8] sm:$0xff]  ;;  %vm3381_vm9 = vcmask 784389  }
 0x1af   : > { %v2013_v48 = vadd.f32 %v6512_v6, %v1987_v34  ;;  %2097 = vmatpush.msra.mxu0 %v2055_v17  ;;  %v2063_v6 = vld [vmem:[%s8211_s3] sm:$0xff]  ;;  %v2222_v3 = vld [vmem:[%s8212_s4 + $0x170] sm:$0xff]  ;;  %vm3341_vm10 = vcmask 1043457   ;;  %vm3427_vm14 = vcmask 785408  }
 0x1b0   : > { %v2014_v28 = vadd.f32 %v1994_v18, %v1988_v22  ;;  %2120 = vmatpush.msra.mxu1 %v2056_v49  ;;  %v2190_v38 = vld [vmem:[%s8212_s4 + $0x70] sm:$0xff]  ;;  %v2260_v46 = vld [vmem:[%s8212_s4 + $0x2a0] sm:$0xff] }
 0x1b1   : > { %vm2029_vm1 = vcmp.ge.f32.partialorder %v2013_v48, 0.0  ;;  %v2045_v11 = vmul.f32 0.01, %v2013_v48  ;;  %2098 = vmatpush.msra.mxu0 %v2051_v7  ;;  %v2280_v31 = vld [vmem:[%s8212_s4 + $0x340] sm:$0xff]  ;;  %v2218_v50 = vld [vmem:[%s8212_s4 + $0x150] sm:$0xff] }
 0x1b2   : > { %vm2030_vm2 = vcmp.ge.f32.partialorder %v2014_v28, 0.0  ;;  %v2046_v26 = vmul.f32 0.01, %v2014_v28  ;;  %2121 = vmatpush.msra.mxu1 %v2052_v33  ;;  %v2186_v2 = vld [vmem:[%s8212_s4 + $0x50] sm:$0xff]  ;;  %v2216_v19 = vld [vmem:[%s8212_s4 + $0x140] sm:$0xff] }
 0x1b3   : > { %2099 = vmatpush.msra.mxu0 %v2047_v21  ;;  %v2061_v18 = vsel %vm2029_vm1, %v2013_v48, %v2045_v11  ;;  %v2196_v21 = vld [vmem:[%s8212_s4 + $0xa0] sm:$0xff]  ;;  %v2258_v34 = vld [vmem:[%s8212_s4 + $0x290] sm:$0xff]  ;;  %vm2585_vm1 = vcmask 523264  }
 0x1b4   : > { %2122 = vmatpush.msra.mxu1 %v2048_v57  ;;  %v2062_v5 = vsel %vm2030_vm2, %v2014_v28, %v2046_v26  ;;  %4820 = vmatpush.msk.msra.mxu2 %vm1097_vm4, %v2061_v18  ;;  %v2278_v22 = vld [vmem:[%s8212_s4 + $0x330] sm:$0xff]  ;;  %v2256_v17 = vld [vmem:[%s8212_s4 + $0x280] sm:$0xff] }
 0x1b5   : > { %4823 = vmatpush.msk.msra.mxu3 %vm1097_vm4, %v2062_v5  ;;  %4818 = vmatmul.msk.f32.vlgmr.msra.gmra.mxu1 %vm2065_vm8, %v2063_v6  ;;  %v2276_v49 = vld [vmem:[%s8212_s4 + $0x320] sm:$0xff]  ;;  %v2182_v48 = vld [vmem:[%s8212_s4 + $0x30] sm:$0xff] }
 0x1b6   : > { %4815 = vmatmul.msk.f32.vlgmr.msra.gmra.mxu0 %vm2065_vm8, %v2063_v6  ;;  %2143 = vmatpush.msra.mxu2 %v2057_v4  ;;  %v2254_v28 = vld [vmem:[%s8212_s4 + $0x270] sm:$0xff]  ;;  %v2212_v33 = vld [vmem:[%s8212_s4 + $0x120] sm:$0xff]  ;;  %v2237_v4 = vld [vmem:[%s8212_s4 + $0x1e8] sm:$0xff] }
 0x1b7   : > { %2166 = vmatpush.msra.mxu3 %v2058_v41  ;;  %2322 = vmatpush.msrb.mxu1 %v2238_v24  ;;  %v2274_v7 = vld [vmem:[%s8212_s4 + $0x310] sm:$0xff]  ;;  %v2180_v37 = vld [vmem:[%s8212_s4 + $0x20] sm:$0xff]  ;;  %v2239_v24 = vld [vmem:[%s8212_s4 + $0x1f8] sm:$0xff] }
 0x1b8   : > { %2299 = vmatpush.msrb.mxu0 %v2206_v36  ;;  %2144 = vmatpush.msra.mxu2 %v2053_v0  ;;  %v2252_v43 = vld [vmem:[%s8212_s4 + $0x260] sm:$0xff]  ;;  %v2210_v26 = vld [vmem:[%s8212_s4 + $0x110] sm:$0xff]  ;;  %v2269_v36 = vld [vmem:[%s8212_s4 + $0x2e8] sm:$0xff] }
 0x1b9   : > { %2167 = vmatpush.msra.mxu3 %v2054_v9  ;;  %2323 = vmatpush.msrb.mxu1 %v2236_v53  ;;  %v2272_v11 = vld [vmem:[%s8212_s4 + $0x300] sm:$0xff]  ;;  %v2178_v57 = vld [vmem:[%s8212_s4 + $0x10] sm:$0xff]  ;;  %v2267_v41 = vld [vmem:[%s8212_s4 + $0x2d8] sm:$0xff] }
 0x1ba   : > { %2300 = vmatpush.msrb.mxu0 %v2204_v62  ;;  %2145 = vmatpush.msra.mxu2 %v2049_v10  ;;  %v2250_v18 = vld [vmem:[%s8212_s4 + $0x250] sm:$0xff]  ;;  %v2208_v5 = vld [vmem:[%s8212_s4 + $0x100] sm:$0xff]  ;;  %v2233_v53 = vld [vmem:[%s8212_s4 + $0x1c8] sm:$0xff] }
 0x1bb   : > { %2168 = vmatpush.msra.mxu3 %v2050_v54  ;;  %4821 = vmatmul.msk.f32.vlgmr.msra.gmra.mxu2 %vm2065_vm8, %v2063_v6  ;;  %v2263_v62 = vld [vmem:[%s8212_s4 + $0x2b8] sm:$0xff]  ;;  %v2261_v9 = vld [vmem:[%s8212_s4 + $0x2a8] sm:$0xff] }
 0x1bc   : > { %4824 = vmatmul.msk.f32.vlgmr.msra.gmra.mxu3 %vm2065_vm8, %v2063_v6  ;;  %2324 = vmatpush.msrb.mxu1 %v2234_v59  ;;  %v2207_v6 = vld [vmem:[%s8212_s4 + $0xf8] sm:$0xff]  ;;  %v2205_v54 = vld [vmem:[%s8212_s4 + $0xe8] sm:$0xff] }
 0x1bd   : > { %2301 = vmatpush.msrb.mxu0 %v2202_v14  ;;  %4819 = vmatmul.msk.f32.gmra.mxu1 %vm2065_vm8, %v2064_v30  ;;  %v2231_v0 = vld [vmem:[%s8212_s4 + $0x1b8] sm:$0xff]  ;;  %v2229_v59 = vld [vmem:[%s8212_s4 + $0x1a8] sm:$0xff] }
 0x1be   : > { %4816 = vmatmul.msk.f32.gmra.mxu0 %vm2065_vm8, %v2064_v30  ;;  %2325 = vmatpush.msrb.mxu1 %v2232_v61  ;;  %v2259_v10 = vld [vmem:[%s8212_s4 + $0x298] sm:$0xff]  ;;  %v2257_v14 = vld [vmem:[%s8212_s4 + $0x288] sm:$0xff] }
 0x1bf   : > { %2302 = vmatpush.msrb.mxu0 %v2200_v23  ;;  %2345 = vmatpush.msrb.mxu2 %v2270_v51  ;;  %v2203_v61 = vld [vmem:[%s8212_s4 + $0xd8] sm:$0xff] }
 0x1c0   : > { %2374 = vmatpush.msrb.mxu3 %v2290_v63  ;;  %2326 = vmatpush.msrb.mxu1 %v2230_v44  ;;  %v2227_v23 = vld [vmem:[%s8212_s4 + $0x198] sm:$0xff]  ;;  %v2246_v63 = vld [vmem:[%s8212_s4 + $0x230] sm:$0xff]  ;;  %v2201_v44 = vld [vmem:[%s8212_s4 + $0xc8] sm:$0xff] }
 0x1c1   : > { %2303 = vmatpush.msrb.mxu0 %v2198_v52  ;;  %2346 = vmatpush.msrb.mxu2 %v2268_v58  ;;  %v2255_v51 = vld [vmem:[%s8212_s4 + $0x278] sm:$0xff]  ;;  %v2225_v52 = vld [vmem:[%s8212_s4 + $0x188] sm:$0xff] }
 0x1c2   : > { %2375 = vmatpush.msrb.mxu3 %v2288_v56  ;;  %2327 = vmatpush.msrb.mxu1 %v2228_v8  ;;  %v2253_v58 = vld [vmem:[%s8212_s4 + $0x268] sm:$0xff]  ;;  %v2244_v56 = vld [vmem:[%s8212_s4 + $0x220] sm:$0xff]  ;;  %v2199_v8 = vld [vmem:[%s8212_s4 + $0xb8] sm:$0xff] }
 0x1c3   : > { %2304 = vmatpush.msrb.mxu0 %v2196_v21  ;;  %4822 = vmatmul.msk.f32.gmra.mxu2 %vm2065_vm8, %v2064_v30  ;;  %v2223_v21 = vld [vmem:[%s8212_s4 + $0x178] sm:$0xff] }
 0x1c4   : > { %4825 = vmatmul.msk.f32.gmra.mxu3 %vm2065_vm8, %v2064_v30  ;;  %2328 = vmatpush.msrb.mxu1 %v2226_v1  ;;  %v2248_v30 = vld [vmem:[%s8212_s4 + $0x240] sm:$0xff]  ;;  %v2251_v1 = vld [vmem:[%s8212_s4 + $0x258] sm:$0xff]  ;;  %vm3365_vm8 = vcmask 783363  }
 0x1c5   : > { %2305 = vmatpush.msrb.mxu0 %v2194_v42  ;;  %2347 = vmatpush.msrb.mxu2 %v2266_v35  ;;  %v2242_v42 = vld [vmem:[%s8212_s4 + $0x210] sm:$0xff]  ;;  %v2197_v35 = vld [vmem:[%s8212_s4 + $0xa8] sm:$0xff] }
 0x1c6   : > { %2376 = vmatpush.msrb.mxu3 %v2286_v15  ;;  %2329 = vmatpush.msrb.mxu1 %v2224_v12  ;;  %v2221_v15 = vld [vmem:[%s8212_s4 + $0x168] sm:$0xff] }
 0x1c7   : > { %2306 = vmatpush.msrb.mxu0 %v2192_v16  ;;  %2348 = vmatpush.msrb.mxu2 %v2264_v40  ;;  %v2249_v12 = vld [vmem:[%s8212_s4 + $0x248] sm:$0xff]  ;;  %v2240_v16 = vld [vmem:[%s8212_s4 + $0x200] sm:$0xff]  ;;  %v2195_v40 = vld [vmem:[%s8212_s4 + $0x98] sm:$0xff] }
 0x1c8   : > { %2377 = vmatpush.msrb.mxu3 %v2284_v32  ;;  %2330 = vmatpush.msrb.mxu1 %v2222_v3  ;;  %v2219_v32 = vld [vmem:[%s8212_s4 + $0x158] sm:$0xff] }
 0x1c9   : > { %2307 = vmatpush.msrb.mxu0 %v2190_v38  ;;  %2349 = vmatpush.msrb.mxu2 %v2262_v39  ;;  %v2247_v3 = vld [vmem:[%s8212_s4 + $0x238] sm:$0xff]  ;;  %v2193_v39 = vld [vmem:[%s8212_s4 + $0x88] sm:$0xff] }
 0x1ca   : > { %2378 = vmatpush.msrb.mxu3 %v2282_v47  ;;  %2331 = vmatpush.msrb.mxu1 %v2220_v45  ;;  %v2291_v38 = vld [vmem:[%s8212_s4 + $0x398] sm:$0xff]  ;;  %v2217_v47 = vld [vmem:[%s8212_s4 + $0x148] sm:$0xff] }
 0x1cb   : > { %2308 = vmatpush.msrb.mxu0 %v2188_v20  ;;  %2350 = vmatpush.msrb.mxu2 %v2260_v46  ;;  %v2245_v45 = vld [vmem:[%s8212_s4 + $0x228] sm:$0xff]  ;;  %v2191_v46 = vld [vmem:[%s8212_s4 + $0x78] sm:$0xff] }
 0x1cc   : > { %2379 = vmatpush.msrb.mxu3 %v2280_v31  ;;  %2332 = vmatpush.msrb.mxu1 %v2218_v50  ;;  %v2289_v20 = vld [vmem:[%s8212_s4 + $0x388] sm:$0xff]  ;;  %v2215_v31 = vld [vmem:[%s8212_s4 + $0x138] sm:$0xff] }
 0x1cd   : > { %2309 = vmatpush.msrb.mxu0 %v2186_v2  ;;  %2351 = vmatpush.msrb.mxu2 %v2258_v34  ;;  %v2243_v50 = vld [vmem:[%s8212_s4 + $0x218] sm:$0xff]  ;;  %v2189_v34 = vld [vmem:[%s8212_s4 + $0x68] sm:$0xff] }
 0x1ce   : > { %2380 = vmatpush.msrb.mxu3 %v2278_v22  ;;  %2333 = vmatpush.msrb.mxu1 %v2216_v19  ;;  %v2287_v2 = vld [vmem:[%s8212_s4 + $0x378] sm:$0xff]  ;;  %v2213_v22 = vld [vmem:[%s8212_s4 + $0x128] sm:$0xff] }
 0x1cf   : > { %2310 = vmatpush.msrb.mxu0 %v2184_v13  ;;  %2352 = vmatpush.msrb.mxu2 %v2256_v17  ;;  %v2241_v19 = vld [vmem:[%s8212_s4 + $0x208] sm:$0xff]  ;;  %v2187_v17 = vld [vmem:[%s8212_s4 + $0x58] sm:$0xff] }
 0x1d0   : > { %2381 = vmatpush.msrb.mxu3 %v2276_v49  ;;  %2334 = vmatpush.msrb.mxu1 %v2214_v29  ;;  %v2285_v13 = vld [vmem:[%s8212_s4 + $0x368] sm:$0xff]  ;;  %v2211_v49 = vld [vmem:[%s8212_s4 + $0x118] sm:$0xff] }
 0x1d1   : > { %2311 = vmatpush.msrb.mxu0 %v2182_v48  ;;  %2353 = vmatpush.msrb.mxu2 %v2254_v28  ;;  %v2283_v29 = vld [vmem:[%s8212_s4 + $0x358] sm:$0xff]  ;;  %v2185_v48 = vld [vmem:[%s8212_s4 + $0x48] sm:$0xff] }
 0x1d2   : > { %2382 = vmatpush.msrb.mxu3 %v2274_v7  ;;  %2335 = vmatpush.msrb.mxu1 %v2212_v33  ;;  %v2209_v28 = vld [vmem:[%s8212_s4 + $0x108] sm:$0xff]  ;;  %v2183_v33 = vld [vmem:[%s8212_s4 + $0x38] sm:$0xff] }
 0x1d3   : > { %2312 = vmatpush.msrb.mxu0 %v2180_v37  ;;  %2354 = vmatpush.msrb.mxu2 %v2252_v43  ;;  %v2281_v7 = vld [vmem:[%s8212_s4 + $0x348] sm:$0xff]  ;;  %v2279_v37 = vld [vmem:[%s8212_s4 + $0x338] sm:$0xff] }
 0x1d4   : > { %2383 = vmatpush.msrb.mxu3 %v2272_v11  ;;  %2336 = vmatpush.msrb.mxu1 %v2210_v26  ;;  %v2181_v43 = vld [vmem:[%s8212_s4 + $0x28] sm:$0xff]  ;;  %v2179_v26 = vld [vmem:[%s8212_s4 + $0x18] sm:$0xff] }
 0x1d5   : > { %2313 = vmatpush.msrb.mxu0 %v2178_v57  ;;  %2355 = vmatpush.msrb.mxu2 %v2250_v18  ;;  %v2277_v11 = vld [vmem:[%s8212_s4 + $0x328] sm:$0xff]  ;;  %v2275_v57 = vld [vmem:[%s8212_s4 + $0x318] sm:$0xff] }
 0x1d6   : > { %2391 = vmatpush.msra.mxu3 %v2207_v6  ;;  %2337 = vmatpush.msrb.mxu1 %v2208_v5  ;;  %v2177_v6 = vld [vmem:[%s8212_s4 + $0x8] sm:$0xff] }
 0x1d7   : > { %2314 = vmatpush.msrb.mxu0 %v2176_v25  ;;  %2356 = vmatpush.msrb.mxu2 %v2248_v30  ;;  %v2273_v18 = vld [vmem:[%s8212_s4 + $0x308] sm:$0xff]  ;;  %v2554_v30 = vld [vmem:[#allocation2 + $0x230] sm:$0xff] }
 0x1d8   : > { %2437 = vmatpush.msra.mxu1 %v2271_v27  ;;  %2392 = vmatpush.msra.mxu3 %v2205_v54  ;;  %v2578_v54 = vld [vmem:[#allocation2 + $0x2f0] sm:$0xff] }
 0x1d9   : > { %2414 = vmatpush.msra.mxu0 %v2239_v24  ;;  %2357 = vmatpush.msrb.mxu2 %v2246_v63  ;;  %v2576_v63 = vld [vmem:[#allocation2 + $0x2e0] sm:$0xff] }
 0x1da   : > { %2438 = vmatpush.msra.mxu1 %v2269_v36  ;;  %2393 = vmatpush.msra.mxu3 %v2203_v61  ;;  %v2563_v36 = vld [vmem:[#allocation2 + $0x278] sm:$0xff] }
 0x1db   : > { %2415 = vmatpush.msra.mxu0 %v2237_v4  ;;  %2358 = vmatpush.msrb.mxu2 %v2244_v56  ;;  %v2561_v4 = vld [vmem:[#allocation2 + $0x268] sm:$0xff]  ;;  %v2551_v61 = vld [vmem:[#allocation2 + $0x218] sm:$0xff] }
 0x1dc   : > { %2439 = vmatpush.msra.mxu1 %v2267_v41  ;;  %2394 = vmatpush.msra.mxu3 %v2201_v44  ;;  %v2562_v41 = vld [vmem:[#allocation2 + $0x270] sm:$0xff]  ;;  %v2552_v44 = vld [vmem:[#allocation2 + $0x220] sm:$0xff]  ;;  %v2547_v56 = vld [vmem:[#allocation2 + $0x1f8] sm:$0xff] }
 0x1dd   : > { %2416 = vmatpush.msra.mxu0 %v2235_v55  ;;  %2359 = vmatpush.msrb.mxu2 %v2242_v42  ;;  %v2559_v55 = vld [vmem:[#allocation2 + $0x258] sm:$0xff] }
 0x1de   : > { %2440 = vmatpush.msra.mxu1 %v2265_v60  ;;  %2395 = vmatpush.msra.mxu3 %v2199_v8  ;;  %v2548_v8 = vld [vmem:[#allocation2 + $0x200] sm:$0xff]  ;;  %v2543_v42 = vld [vmem:[#allocation2 + $0x1d8] sm:$0xff] }
 0x1df   : > { %2417 = vmatpush.msra.mxu0 %v2233_v53  ;;  %2360 = vmatpush.msrb.mxu2 %v2240_v16  ;;  %v2538_v16 = vld [vmem:[#allocation2 + $0x1b0] sm:$0xff] }
 0x1e0   : > { %2441 = vmatpush.msra.mxu1 %v2263_v62  ;;  %2396 = vmatpush.msra.mxu3 %v2197_v35  ;;  %v2560_v62 = vld [vmem:[#allocation2 + $0x260] sm:$0xff] }
 0x1e1   : > { %2418 = vmatpush.msra.mxu0 %v2231_v0  ;;  %2466 = vmatpush.msra.mxu2 %v2291_v38  ;;  %v2557_v0 = vld [vmem:[#allocation2 + $0x248] sm:$0xff]  ;;  %v2544_v35 = vld [vmem:[#allocation2 + $0x1e0] sm:$0xff]  ;;  %v2514_v38 = vld [vmem:[#allocation2 + $0xf8] sm:$0xff] }
 0x1e2   : > { %2442 = vmatpush.msra.mxu1 %v2261_v9  ;;  %2397 = vmatpush.msra.mxu3 %v2195_v40  ;;  %v2558_v9 = vld [vmem:[#allocation2 + $0x250] sm:$0xff]  ;;  %v2536_v40 = vld [vmem:[#allocation2 + $0x1a0] sm:$0xff] }
 0x1e3   : > { %2419 = vmatpush.msra.mxu0 %v2229_v59  ;;  %2467 = vmatpush.msra.mxu2 %v2289_v20  ;;  %v2556_v59 = vld [vmem:[#allocation2 + $0x240] sm:$0xff]  ;;  %v2574_v20 = vld [vmem:[#allocation2 + $0x2d0] sm:$0xff] }
 0x1e4   : > { %2443 = vmatpush.msra.mxu1 %v2259_v10  ;;  %2398 = vmatpush.msra.mxu3 %v2193_v39  ;;  %v2555_v10 = vld [vmem:[#allocation2 + $0x238] sm:$0xff]  ;;  %v2512_v39 = vld [vmem:[#allocation2 + $0xe8] sm:$0xff] }
 0x1e5   : > { %2420 = vmatpush.msra.mxu0 %v2227_v23  ;;  %2468 = vmatpush.msra.mxu2 %v2287_v2  ;;  %v2539_v2 = vld [vmem:[#allocation2 + $0x1b8] sm:$0xff] }
 0x1e6   : > { %2444 = vmatpush.msra.mxu1 %v2257_v14  ;;  %2399 = vmatpush.msra.mxu3 %v2191_v46  ;;  %v2553_v14 = vld [vmem:[#allocation2 + $0x228] sm:$0xff] }
 0x1e7   : > { %2421 = vmatpush.msra.mxu0 %v2225_v52  ;;  %2469 = vmatpush.msra.mxu2 %v2285_v13  ;;  %v2549_v52 = vld [vmem:[#allocation2 + $0x208] sm:$0xff]  ;;  %v2502_v13 = vld [vmem:[#allocation2 + $0x98] sm:$0xff] }
 0x1e8   : > { %2445 = vmatpush.msra.mxu1 %v2255_v51  ;;  %2400 = vmatpush.msra.mxu3 %v2189_v34  ;;  %v2541_v46 = vld [vmem:[#allocation2 + $0x1c8] sm:$0xff] }
 0x1e9   : > { %2422 = vmatpush.msra.mxu0 %v2223_v21  ;;  %2470 = vmatpush.msra.mxu2 %v2283_v29  ;;  %v2545_v21 = vld [vmem:[#allocation2 + $0x1e8] sm:$0xff] }
 0x1ea   : > { %2446 = vmatpush.msra.mxu1 %v2253_v58  ;;  %2401 = vmatpush.msra.mxu3 %v2187_v17  ;;  %v2550_v58 = vld [vmem:[#allocation2 + $0x210] sm:$0xff]  ;;  %v2504_v34 = vld [vmem:[#allocation2 + $0xa8] sm:$0xff]  ;;  %v2568_v17 = vld [vmem:[#allocation2 + $0x2a0] sm:$0xff] }
 0x1eb   : > { %2423 = vmatpush.msra.mxu0 %v2221_v15  ;;  %2471 = vmatpush.msra.mxu2 %v2281_v7  ;;  %v2542_v15 = vld [vmem:[#allocation2 + $0x1d0] sm:$0xff]  ;;  %v2500_v29 = vld [vmem:[#allocation2 + $0x88] sm:$0xff]  ;;  %v2498_v7 = vld [vmem:[#allocation2 + $0x78] sm:$0xff] }
 0x1ec   : > { %2447 = vmatpush.msra.mxu1 %v2251_v1  ;;  %2402 = vmatpush.msra.mxu3 %v2185_v48  ;;  %v2546_v1 = vld [vmem:[#allocation2 + $0x1f0] sm:$0xff] }
 0x1ed   : > { %2424 = vmatpush.msra.mxu0 %v2219_v32  ;;  %2472 = vmatpush.msra.mxu2 %v2279_v37  ;;  %v2534_v32 = vld [vmem:[#allocation2 + $0x190] sm:$0xff]  ;;  %v2564_v37 = vld [vmem:[#allocation2 + $0x280] sm:$0xff] }
 0x1ee   : > { %2448 = vmatpush.msra.mxu1 %v2249_v12  ;;  %2403 = vmatpush.msra.mxu3 %v2183_v33  ;;  %v2540_v12 = vld [vmem:[#allocation2 + $0x1c0] sm:$0xff]  ;;  %v2566_v48 = vld [vmem:[#allocation2 + $0x290] sm:$0xff]  ;;  %v2530_v33 = vld [vmem:[#allocation2 + $0x178] sm:$0xff] }
 0x1ef   : > { %2425 = vmatpush.msra.mxu0 %v2217_v47  ;;  %2473 = vmatpush.msra.mxu2 %v2277_v11  ;;  %v2510_v47 = vld [vmem:[#allocation2 + $0xd8] sm:$0xff]  ;;  %v2496_v11 = vld [vmem:[#allocation2 + $0x68] sm:$0xff] }
 0x1f0   : > { %2449 = vmatpush.msra.mxu1 %v2247_v3  ;;  %2404 = vmatpush.msra.mxu3 %v2181_v43  ;;  %v2532_v3 = vld [vmem:[#allocation2 + $0x180] sm:$0xff]  ;;  %v2513_v43 = vld [vmem:[#allocation2 + $0xf0] sm:$0xff] }
 0x1f1   : > { %2426 = vmatpush.msra.mxu0 %v2215_v31  ;;  %2474 = vmatpush.msra.mxu2 %v2275_v57  ;;  %v2506_v31 = vld [vmem:[#allocation2 + $0xb8] sm:$0xff] }
 0x1f2   : > { %2450 = vmatpush.msra.mxu1 %v2245_v45  ;;  %2405 = vmatpush.msra.mxu3 %v2179_v26  ;;  %v2508_v45 = vld [vmem:[#allocation2 + $0xc8] sm:$0xff]  ;;  %v2579_v57 = vld [vmem:[#allocation2 + $0x2f8] sm:$0xff] }
 0x1f3   : > { %2427 = vmatpush.msra.mxu0 %v2213_v22  ;;  %2475 = vmatpush.msra.mxu2 %v2273_v18  ;;  %v2570_v22 = vld [vmem:[#allocation2 + $0x2b0] sm:$0xff]  ;;  %v2528_v26 = vld [vmem:[#allocation2 + $0x168] sm:$0xff]  ;;  %v2494_v18 = vld [vmem:[#allocation2 + $0x58] sm:$0xff] }
 0x1f4   : > { %2451 = vmatpush.msra.mxu1 %v2243_v50  ;;  %2406 = vmatpush.msra.mxu3 %v2177_v6  ;;  %v2572_v50 = vld [vmem:[#allocation2 + $0x2c0] sm:$0xff] }
 0x1f5   : > { %2428 = vmatpush.msra.mxu0 %v2211_v49  ;;  %v2535_v49 = vld [vmem:[#allocation2 + $0x198] sm:$0xff]  ;;  %v2511_v6 = vld [vmem:[#allocation2 + $0xe0] sm:$0xff] }
 0x1f6   : > { %2452 = vmatpush.msra.mxu1 %v2241_v19  ;;  %v2537_v19 = vld [vmem:[#allocation2 + $0x1a8] sm:$0xff] }
 0x1f7   : > { %2429 = vmatpush.msra.mxu0 %v2209_v28  ;;  %v2533_v28 = vld [vmem:[#allocation2 + $0x188] sm:$0xff] }
 0x232   : > { %v2124_v5 = vpop.f32.mrf.mxu1 }
 0x233   : > { %v2101_v25 = vpop.f32.mrf.mxu0  ;;  %2338 = vmatmul.f32.vlgmr.msrb.gmra.mxu1 %v2124_v5 }
 0x234   : > { %2315 = vmatmul.f32.vlgmr.msrb.gmra.mxu0 %v2101_v25  ;;  %2656 = vmatpush.msrb.mxu1 %v2579_v57  ;;  %v2776_v57 = vld [vmem:[#allocation2 + $0x3c8] sm:$0xff] }
 0x235   : > { %2628 = vmatpush.msrb.mxu0 %v2563_v36  ;;  %v2524_v36 = vld [vmem:[#allocation2 + $0x148] sm:$0xff] }
 0x237   : > { %2629 = vmatpush.msrb.mxu0 %v2561_v4  ;;  %v2575_v4 = vld [vmem:[#allocation2 + $0x2d8] sm:$0xff] }
 0x239   : > { %2630 = vmatpush.msrb.mxu0 %v2559_v55  ;;  %v2490_v55 = vld [vmem:[#allocation2 + $0x38] sm:$0xff] }
 0x23a   : > { %v2127_v27 = vpop.f32.mrf.mxu1 }
 0x23b   : > { %v6910_v24 = vpop.f32.mrf.mxu0  ;;  %2341 = vmatmul.f32.gmra.mxu1 %v2127_v27  ;;  %2631 = vmatpush.msrb.mxu0 %v2557_v0  ;;  %v2488_v0 = vld [vmem:[#allocation2 + $0x28] sm:$0xff] }
 0x23c   : > { %2318 = vmatmul.f32.gmra.mxu0 %v6910_v24 }
 0x23d   : > { %2632 = vmatpush.msrb.mxu0 %v2555_v10  ;;  %v2571_v10 = vld [vmem:[#allocation2 + $0x2b8] sm:$0xff] }
 0x23e   : > { %v2147_v60 = vpop.f32.mrf.mxu2 }
 0x23f   : > { %v2170_v53 = vpop.f32.mrf.mxu3  ;;  %2361 = vmatmul.f32.vlgmr.msrb.gmra.mxu2 %v2147_v60  ;;  %2633 = vmatpush.msrb.mxu0 %v2553_v14  ;;  %v2518_v14 = vld [vmem:[#allocation2 + $0x118] sm:$0xff] }
 0x240   : > { %4826 = vmatmul.msk.f32.vlgmr.msrb.gmra.mxu3 %vm2292_vm15, %v2170_v53  ;;  %2588 = vmatpush.msrb.mxu2 %v2562_v41  ;;  %v2507_v41 = vld [vmem:[#allocation2 + $0xc0] sm:$0xff] }
 0x241   : > { %2616 = vmatpush.msrb.mxu3 %v2578_v54  ;;  %2634 = vmatpush.msrb.mxu0 %v2551_v61  ;;  %v2503_v54 = vld [vmem:[#allocation2 + $0xa0] sm:$0xff]  ;;  %v2501_v61 = vld [vmem:[#allocation2 + $0x90] sm:$0xff] }
 0x242   : > { %2589 = vmatpush.msrb.mxu2 %v2560_v62  ;;  %v2505_v62 = vld [vmem:[#allocation2 + $0xb0] sm:$0xff] }
 0x243   : > { %2453 = vmatmul.f32.vlgmr.msra.gmra.mxu1 %v2147_v60  ;;  %2617 = vmatpush.msrb.mxu3 %v2576_v63  ;;  %v2522_v60 = vld [vmem:[#allocation2 + $0x138] sm:$0xff] }
 0x244   : > { %2430 = vmatmul.f32.vlgmr.msra.gmra.mxu0 %v2124_v5  ;;  %2590 = vmatpush.msrb.mxu2 %v2558_v9  ;;  %v2526_v5 = vld [vmem:[#allocation2 + $0x158] sm:$0xff]  ;;  %v2520_v9 = vld [vmem:[#allocation2 + $0x128] sm:$0xff] }
 0x245   : > { %2635 = vmatpush.msrb.mxu0 %v2549_v52  ;;  %2618 = vmatpush.msrb.mxu3 %v2574_v20  ;;  %v2567_v63 = vld [vmem:[#allocation2 + $0x298] sm:$0xff]  ;;  %v2565_v52 = vld [vmem:[#allocation2 + $0x288] sm:$0xff] }
 0x246   : > { %v2150_v23 = vpop.f32.mrf.mxu2  ;;  %2591 = vmatpush.msrb.mxu2 %v2556_v59  ;;  %v2486_v59 = vld [vmem:[#allocation2 + $0x18] sm:$0xff] }
 0x247   : > { %v2173_v51 = vpop.f32.mrf.mxu3  ;;  %2364 = vmatmul.f32.gmra.mxu2 %v2150_v23  ;;  %2636 = vmatpush.msrb.mxu0 %v2547_v56  ;;  %v2529_v56 = vld [vmem:[#allocation2 + $0x170] sm:$0xff] }
 0x248   : > { %4827 = vmatmul.msk.f32.gmra.mxu3 %vm2292_vm15, %v2173_v51  ;;  %2592 = vmatpush.msrb.mxu2 %v2554_v30  ;;  %v2569_v30 = vld [vmem:[#allocation2 + $0x2a8] sm:$0xff] }
 0x249   : > { %2637 = vmatpush.msrb.mxu0 %v2545_v21  ;;  %2619 = vmatpush.msrb.mxu3 %v2572_v50  ;;  %v2527_v21 = vld [vmem:[#allocation2 + $0x160] sm:$0xff] }
 0x24a   : > { %2593 = vmatpush.msrb.mxu2 %v2552_v44  ;;  %v2499_v44 = vld [vmem:[#allocation2 + $0x80] sm:$0xff] }
 0x24b   : > { %2456 = vmatmul.f32.gmra.mxu1 %v2150_v23  ;;  %2638 = vmatpush.msrb.mxu0 %v2543_v42  ;;  %v2484_v23 = vld [vmem:[#allocation2 + $0x8] sm:$0xff]  ;;  %v2525_v42 = vld [vmem:[#allocation2 + $0x150] sm:$0xff] }
 0x24c   : > { %2433 = vmatmul.f32.gmra.mxu0 %v2127_v27  ;;  %2594 = vmatpush.msrb.mxu2 %v2550_v58  ;;  %v2509_v27 = vld [vmem:[#allocation2 + $0xd0] sm:$0xff] }
 0x24d   : > { %2639 = vmatpush.msrb.mxu0 %v2541_v46  ;;  %2620 = vmatpush.msrb.mxu3 %v2570_v22  ;;  %v2497_v58 = vld [vmem:[#allocation2 + $0x70] sm:$0xff] }
 0x24e   : > { %2595 = vmatpush.msrb.mxu2 %v2548_v8  ;;  %v2495_v8 = vld [vmem:[#allocation2 + $0x60] sm:$0xff] }
 0x24f   : > { %4828 = vmatmul.msk.f32.vlgmr.msra.gmra.mxu2 %vm2292_vm15, %v2170_v53  ;;  %2640 = vmatpush.msrb.mxu0 %v2539_v2  ;;  %v2573_v53 = vld [vmem:[#allocation2 + $0x2c8] sm:$0xff] }
 0x250   : > { %2407 = vmatmul.f32.vlgmr.msra.gmra.mxu3 %v2101_v25  ;;  %2596 = vmatpush.msrb.mxu2 %v2546_v1  ;;  %v2577_v25 = vld [vmem:[#allocation2 + $0x2e8] sm:$0xff]  ;;  %v2493_v1 = vld [vmem:[#allocation2 + $0x50] sm:$0xff] }
 0x251   : > { %2641 = vmatpush.msrb.mxu0 %v2537_v19  ;;  %2621 = vmatpush.msrb.mxu3 %v2568_v17 }
 0x252   : > { %2597 = vmatpush.msrb.mxu2 %v2544_v35  ;;  %2657 = vmatpush.msrb.mxu1 %v2577_v25  ;;  %v2491_v35 = vld [vmem:[#allocation2 + $0x40] sm:$0xff]  ;;  %v2790_v25 = vld [vmem:[#allocation2 + $0x438] sm:$0xff] }
 0x253   : > { %2642 = vmatpush.msrb.mxu0 %v2535_v49  ;;  %2622 = vmatpush.msrb.mxu3 %v2566_v48  ;;  %v2782_v49 = vld [vmem:[#allocation2 + $0x3f8] sm:$0xff]  ;;  %v2780_v48 = vld [vmem:[#allocation2 + $0x3e8] sm:$0xff] }
 0x254   : > { %2598 = vmatpush.msrb.mxu2 %v2542_v15  ;;  %2658 = vmatpush.msrb.mxu1 %v2575_v4  ;;  %v2523_v15 = vld [vmem:[#allocation2 + $0x140] sm:$0xff]  ;;  %v2788_v4 = vld [vmem:[#allocation2 + $0x428] sm:$0xff] }
 0x255   : > { %2643 = vmatpush.msrb.mxu0 %v2533_v28  ;;  %2623 = vmatpush.msrb.mxu3 %v2564_v37  ;;  %v2796_v28 = vld [vmem:[#allocation2 + $0x468] sm:$0xff] }
 0x256   : > { %2599 = vmatpush.msrb.mxu2 %v2540_v12  ;;  %2659 = vmatpush.msrb.mxu1 %v2573_v53  ;;  %v2489_v12 = vld [vmem:[#allocation2 + $0x30] sm:$0xff] }
 0x257   : > { %4829 = vmatmul.msk.f32.gmra.mxu2 %vm2292_vm15, %v2173_v51  ;;  %2738 = vmatpush.msra.mxu0 %v2530_v33  ;;  %v2516_v51 = vld [vmem:[#allocation2 + $0x108] sm:$0xff] }
 0x258   : > { %2410 = vmatmul.f32.gmra.mxu3 %v6910_v24  ;;  %2600 = vmatpush.msrb.mxu2 %v2538_v16  ;;  %v2492_v24 = vld [vmem:[#allocation2 + $0x48] sm:$0xff]  ;;  %v2521_v16 = vld [vmem:[#allocation2 + $0x130] sm:$0xff] }
 0x259   : > { %2670 = vmatpush.msra.mxu3 %v2513_v43  ;;  %2739 = vmatpush.msra.mxu0 %v2528_v26  ;;  %v2778_v43 = vld [vmem:[#allocation2 + $0x3d8] sm:$0xff] }
 0x25a   : > { %2601 = vmatpush.msrb.mxu2 %v2536_v40  ;;  %2660 = vmatpush.msrb.mxu1 %v2571_v10  ;;  %v2487_v40 = vld [vmem:[#allocation2 + $0x20] sm:$0xff] }
 0x25b   : > { %2671 = vmatpush.msra.mxu3 %v2511_v6  ;;  %2740 = vmatpush.msra.mxu0 %v2526_v5  ;;  %v2792_v6 = vld [vmem:[#allocation2 + $0x448] sm:$0xff]  ;;  %v2774_v5 = vld [vmem:[#allocation2 + $0x3b8] sm:$0xff] }
 0x25c   : > { %2602 = vmatpush.msrb.mxu2 %v2534_v32  ;;  %2661 = vmatpush.msrb.mxu1 %v2569_v30  ;;  %v2519_v32 = vld [vmem:[#allocation2 + $0x120] sm:$0xff] }
 0x25d   : > { %2672 = vmatpush.msra.mxu3 %v2509_v27  ;;  %2741 = vmatpush.msra.mxu0 %v2524_v36  ;;  %v2772_v36 = vld [vmem:[#allocation2 + $0x3a8] sm:$0xff] }
 0x25e   : > { %2603 = vmatpush.msrb.mxu2 %v2532_v3  ;;  %2662 = vmatpush.msrb.mxu1 %v2567_v63  ;;  %v2485_v3 = vld [vmem:[#allocation2 + $0x10] sm:$0xff] }
 0x25f   : > { %2673 = vmatpush.msra.mxu3 %v2507_v41  ;;  %2742 = vmatpush.msra.mxu0 %v2522_v60  ;;  %v2797_v63 = vld [vmem:[#allocation2 + $0x470] sm:$0xff] }
 0x260   : > { %2710 = vmatpush.msra.mxu2 %v2514_v38  ;;  %2663 = vmatpush.msrb.mxu1 %v2565_v52  ;;  %v2517_v38 = vld [vmem:[#allocation2 + $0x110] sm:$0xff] }
 0x261   : > { %2674 = vmatpush.msra.mxu3 %v2505_v62  ;;  %2743 = vmatpush.msra.mxu0 %v2520_v9  ;;  %v2770_v62 = vld [vmem:[#allocation2 + $0x398] sm:$0xff] }
 0x262   : > { %2711 = vmatpush.msra.mxu2 %v2512_v39  ;;  %2698 = vmatpush.msra.mxu1 %v2529_v56  ;;  %v2483_v39 = vld [vmem:[#allocation2] sm:$0xff]  ;;  %v2764_v56 = vld [vmem:[#allocation2 + $0x368] sm:$0xff] }
 0x263   : > { %2675 = vmatpush.msra.mxu3 %v2503_v54  ;;  %2744 = vmatpush.msra.mxu0 %v2518_v14  ;;  %v2768_v54 = vld [vmem:[#allocation2 + $0x388] sm:$0xff]  ;;  %v2924_v14 = vld [vmem:[#allocation2 + $0x578] sm:$0xff] }
 0x264   : > { %2712 = vmatpush.msra.mxu2 %v2510_v47  ;;  %2699 = vmatpush.msra.mxu1 %v2527_v21  ;;  %v2515_v47 = vld [vmem:[#allocation2 + $0x100] sm:$0xff]  ;;  %v2920_v21 = vld [vmem:[#allocation2 + $0x558] sm:$0xff] }
 0x265   : > { %2676 = vmatpush.msra.mxu3 %v2501_v61  ;;  %2745 = vmatpush.msra.mxu0 %v2516_v51  ;;  %v2766_v61 = vld [vmem:[#allocation2 + $0x378] sm:$0xff] }
 0x266   : > { %2713 = vmatpush.msra.mxu2 %v2508_v45  ;;  %2700 = vmatpush.msra.mxu1 %v2525_v42 }
 0x267   : > { %2677 = vmatpush.msra.mxu3 %v2499_v44 }
 0x268   : > { %2714 = vmatpush.msra.mxu2 %v2506_v31  ;;  %2701 = vmatpush.msra.mxu1 %v2523_v15  ;;  %v2762_v15 = vld [vmem:[#allocation2 + $0x358] sm:$0xff] }
 0x269   : > { %2678 = vmatpush.msra.mxu3 %v2497_v58  ;;  %v2781_v58 = vld [vmem:[#allocation2 + $0x3f0] sm:$0xff] }
 0x26a   : > { %2715 = vmatpush.msra.mxu2 %v2504_v34  ;;  %2702 = vmatpush.msra.mxu1 %v2521_v16  ;;  %v2918_v16 = vld [vmem:[#allocation2 + $0x548] sm:$0xff] }
 0x26b   : > { %2679 = vmatpush.msra.mxu3 %v2495_v8 }
 0x26c   : > { %2716 = vmatpush.msra.mxu2 %v2502_v13  ;;  %2703 = vmatpush.msra.mxu1 %v2519_v32 }
 0x26d   : > { %2680 = vmatpush.msra.mxu3 %v2493_v1  ;;  %v2795_v1 = vld [vmem:[#allocation2 + $0x460] sm:$0xff] }
 0x26e   : > { %2717 = vmatpush.msra.mxu2 %v2500_v29  ;;  %2704 = vmatpush.msra.mxu1 %v2517_v38  ;;  %v2798_v29 = vld [vmem:[#allocation2 + $0x478] sm:$0xff]  ;;  %v2760_v38 = vld [vmem:[#allocation2 + $0x348] sm:$0xff] }
 0x26f   : > { %2681 = vmatpush.msra.mxu3 %v2491_v35  ;;  %v2779_v35 = vld [vmem:[#allocation2 + $0x3e0] sm:$0xff] }
 0x270   : > { %2718 = vmatpush.msra.mxu2 %v2498_v7  ;;  %2705 = vmatpush.msra.mxu1 %v2515_v47  ;;  %v2916_v47 = vld [vmem:[#allocation2 + $0x538] sm:$0xff] }
 0x271   : > { %2682 = vmatpush.msra.mxu3 %v2489_v12 }
 0x272   : > { %2719 = vmatpush.msra.mxu2 %v2496_v11  ;;  %v2794_v11 = vld [vmem:[#allocation2 + $0x458] sm:$0xff] }
 0x273   : > { %2683 = vmatpush.msra.mxu3 %v2487_v40  ;;  %v2793_v40 = vld [vmem:[#allocation2 + $0x450] sm:$0xff] }
 0x274   : > { %2720 = vmatpush.msra.mxu2 %v2494_v18 }
 0x275   : > { %2684 = vmatpush.msra.mxu3 %v2485_v3  ;;  %v2777_v3 = vld [vmem:[#allocation2 + $0x3d0] sm:$0xff] }
 0x276   : > { %2721 = vmatpush.msra.mxu2 %v2492_v24 }
 0x277   : > { %2685 = vmatpush.msra.mxu3 %v2483_v39 }
 0x278   : > { %2722 = vmatpush.msra.mxu2 %v2490_v55 }
 0x27a   : > { %2723 = vmatpush.msra.mxu2 %v2488_v0  ;;  %v2786_v0 = vld [vmem:[#allocation2 + $0x418] sm:$0xff] }
 0x27c   : > { %2724 = vmatpush.msra.mxu2 %v2486_v59  ;;  %v2784_v59 = vld [vmem:[#allocation2 + $0x408] sm:$0xff] }
 0x27e   : > { %2725 = vmatpush.msra.mxu2 %v2484_v23  ;;  %v2922_v23 = vld [vmem:[#allocation2 + $0x568] sm:$0xff] }
 0x2b0   : > { %v2339_v45 = vpop.f32.mrf.mxu1 }
 0x2b1   : > { %v2316_v20 = vpop.f32.mrf.mxu0 }
 0x2b2   : > { %v2340_v46 = vadd.f32 %v2339_v45, %v2316_v20  ;;  %v2791_v45 = vld [vmem:[#allocation2 + $0x440] sm:$0xff] }
 0x2b3   : > { %v2775_v20 = vld [vmem:[#allocation2 + $0x3c0] sm:$0xff] }
 0x2b8   : > { %v2342_v22 = vpop.f32.mrf.mxu1 }
 0x2b9   : > { %v2319_v19 = vpop.f32.mrf.mxu0 }
 0x2ba   : > { %v2343_v13 = vadd.f32 %v2342_v22, %v2319_v19  ;;  %v2789_v22 = vld [vmem:[#allocation2 + $0x430] sm:$0xff] }
 0x2c0   : > { %v2454_v55 = vpop.f32.mrf.mxu1 }
 0x2c1   : > { %v2431_v24 = vpop.f32.mrf.mxu0 }
 0x2c2   : > { %v2362_v31 = vpop.f32.mrf.mxu2 }
 0x2c3   : > { %v2385_v50 = vpop.f32.mrf.mxu3  ;;  %v2363_v2 = vadd.f32 %v2362_v31, %v2340_v46  ;;  %v2758_v46 = vld [vmem:[#allocation2 + $0x338] sm:$0xff] }
 0x2c5   : > { %v6918_v34 = vadd.f32 %v2385_v50, %v2363_v2  ;;  %v2914_v2 = vld [vmem:[#allocation2 + $0x528] sm:$0xff] }
 0x2c7   : > { %v2582_v17 = vrot.slane %v6918_v34, 1  ;;  %v3221_v27 = vrot.slane %v6918_v34, 5 }
 0x2c8   : > { %v2457_v42 = vpop.f32.mrf.mxu1 }
 0x2c9   : > { %2604 = vmatmul.f32.vlgmr.msrb.gmra.mxu2 %v2582_v17  ;;  %2644 = vmatmul.f32.vlgmr.msrb.gmra.mxu0 %v2582_v17  ;;  %v2434_v44 = vpop.f32.mrf.mxu0  ;;  %v2773_v17 = vld [vmem:[#allocation2 + $0x3b0] sm:$0xff] }
 0x2ca   : > { %2850 = vmatpush.msrb.mxu0 %v2782_v49  ;;  %2878 = vmatpush.msrb.mxu2 %v2798_v29  ;;  %v2365_v7 = vpop.f32.mrf.mxu2  ;;  %v2756_v49 = vld [vmem:[#allocation2 + $0x328] sm:$0xff] }
 0x2cb   : > { %v2388_v33 = vpop.f32.mrf.mxu3  ;;  %v2366_v37 = vadd.f32 %v2365_v7, %v2343_v13  ;;  %v2912_v7 = vld [vmem:[#allocation2 + $0x518] sm:$0xff] }
 0x2cc   : > { %2851 = vmatpush.msrb.mxu0 %v2780_v48  ;;  %2879 = vmatpush.msrb.mxu2 %v2796_v28  ;;  %v2787_v48 = vld [vmem:[#allocation2 + $0x420] sm:$0xff] }
 0x2cd   : > { %v6921_v26 = vadd.f32 %v2388_v33, %v2366_v37  ;;  %v2771_v33 = vld [vmem:[#allocation2 + $0x3a0] sm:$0xff]  ;;  %v2754_v37 = vld [vmem:[#allocation2 + $0x318] sm:$0xff] }
 0x2ce   : > { %2852 = vmatpush.msrb.mxu0 %v2778_v43  ;;  %2880 = vmatpush.msrb.mxu2 %v2794_v11  ;;  %v2785_v43 = vld [vmem:[#allocation2 + $0x410] sm:$0xff] }
 0x2cf   : > { %v3222_v18 = vrot.slane %v6921_v26, 5  ;;  %v2802_v11 = vrot.slane %v6921_v26, 2 }
 0x2d0   : > { %2853 = vmatpush.msrb.mxu0 %v2776_v57  ;;  %2881 = vmatpush.msrb.mxu2 %v2792_v6  ;;  %v2910_v57 = vld [vmem:[#allocation2 + $0x508] sm:$0xff]  ;;  %v2769_v6 = vld [vmem:[#allocation2 + $0x390] sm:$0xff] }
 0x2d1   : > { %2726 = vmatmul.f32.vlgmr.msra.gmra.mxu2 %v6918_v34  ;;  %v6927_v41 = vsel %vm1461_vm5, %v3221_v27, %v3222_v18  ;;  %v2752_v18 = vld [vmem:[#allocation2 + $0x308] sm:$0xff]  ;;  %v2908_v27 = vld [vmem:[#allocation2 + $0x4f8] sm:$0xff] }
 0x2d2   : > { %2854 = vmatpush.msrb.mxu0 %v2774_v5  ;;  %2882 = vmatpush.msrb.mxu2 %v2790_v25  ;;  %v2477_v9 = vpop.f32.mrf.mxu2  ;;  %v2783_v5 = vld [vmem:[#allocation2 + $0x400] sm:$0xff]  ;;  %v2801_v25 = vrot.slane %v6918_v34, 2 }
 0x2d3   : > { %v2408_v60 = vpop.f32.mrf.mxu3 }
 0x2d4   : > { %v2432_v53 = vadd.f32 %v2431_v24, %v2408_v60  ;;  %2855 = vmatpush.msrb.mxu0 %v2772_v36  ;;  %2883 = vmatpush.msrb.mxu2 %v2788_v4  ;;  %v2940_v24 = vld [vmem:[#allocation2 + $0x5f8] sm:$0xff]  ;;  %v2767_v36 = vld [vmem:[#allocation2 + $0x380] sm:$0xff]  ;;  %v6953_v4 = vsel %vm916_vm3, %v2801_v25, %v2802_v11  ;;  %v2906_v60 = vld [vmem:[#allocation2 + $0x4e8] sm:$0xff] }
 0x2d5   : > { %v2903_v11 = vld [vmem:[#allocation2 + $0x4d0] sm:$0xff]  ;;  %v2933_v25 = vld [vmem:[#allocation2 + $0x5c0] sm:$0xff] }
 0x2d6   : > { %v2455_v10 = vadd.f32 %v2454_v55, %v2432_v53  ;;  %2856 = vmatpush.msrb.mxu0 %v2770_v62  ;;  %2884 = vmatpush.msrb.mxu2 %v2786_v0  ;;  %v2923_v55 = vld [vmem:[#allocation2 + $0x570] sm:$0xff]  ;;  %v2938_v53 = vld [vmem:[#allocation2 + $0x5e8] sm:$0xff]  ;;  %v2904_v0 = vld [vmem:[#allocation2 + $0x4d8] sm:$0xff] }
 0x2d7   : > { %v2765_v62 = vld [vmem:[#allocation2 + $0x370] sm:$0xff] }
 0x2d8   : > { %v6929_v30 = vadd.f32 %v2477_v9, %v2455_v10  ;;  %2857 = vmatpush.msrb.mxu0 %v2768_v54  ;;  %2885 = vmatpush.msrb.mxu2 %v2784_v59  ;;  %v2921_v9 = vld [vmem:[#allocation2 + $0x560] sm:$0xff]  ;;  %v2936_v10 = vld [vmem:[#allocation2 + $0x5d8] sm:$0xff]  ;;  %v2902_v59 = vld [vmem:[#allocation2 + $0x4c8] sm:$0xff] }
 0x2d9   : > { %v2763_v54 = vld [vmem:[#allocation2 + $0x360] sm:$0xff] }
 0x2da   : > { %2990 = vmatpush.msra.mxu2 %v2924_v14  ;;  %4833 = vmatmul.msk.f32.vlgmr.msra.gmra.mxu0 %vm2585_vm1, %v6929_v30  ;;  %v2583_v51 = vrot.slane %v6929_v30, 1  ;;  %v2480_v32 = vpop.f32.mrf.mxu2  ;;  %v2804_v19 = vrot.slane %v6929_v30, 2  ;;  %v3224_v13 = vrot.slane %v6929_v30, 5  ;;  %v2919_v14 = vld [vmem:[#allocation2 + $0x550] sm:$0xff] }
 0x2db   : > { %2858 = vmatpush.msrb.mxu0 %v2766_v61  ;;  %v2411_v52 = vpop.f32.mrf.mxu3  ;;  %v2934_v61 = vld [vmem:[#allocation2 + $0x5c8] sm:$0xff] }
 0x2dc   : > { %v2435_v8 = vadd.f32 %v2434_v44, %v2411_v52  ;;  %2991 = vmatpush.msra.mxu2 %v2922_v23  ;;  %4830 = vmatmul.msk.f32.vlgmr.msrb.gmra.mxu3 %vm2585_vm1, %v2583_v51  ;;  %v2761_v23 = vld [vmem:[#allocation2 + $0x350] sm:$0xff]  ;;  %v2932_v44 = vld [vmem:[#allocation2 + $0x5b8] sm:$0xff]  ;;  %v2759_v52 = vld [vmem:[#allocation2 + $0x340] sm:$0xff] }
 0x2dd   : > { %4831 = vmatmul.msk.f32.vlgmr.msrb.gmra.mxu1 %vm2585_vm1, %v2583_v51  ;;  %2838 = vmatpush.msrb.mxu3 %v2797_v63  ;;  %v2900_v51 = vld [vmem:[#allocation2 + $0x4b8] sm:$0xff]  ;;  %v2917_v63 = vld [vmem:[#allocation2 + $0x540] sm:$0xff] }
 0x2de   : > { %v2458_v12 = vadd.f32 %v2457_v42, %v2435_v8  ;;  %2810 = vmatpush.msrb.mxu1 %v2781_v58  ;;  %2859 = vmatpush.msrb.mxu0 %v2764_v56  ;;  %v2898_v58 = vld [vmem:[#allocation2 + $0x4a8] sm:$0xff]  ;;  %v2915_v56 = vld [vmem:[#allocation2 + $0x530] sm:$0xff]  ;;  %v2913_v42 = vld [vmem:[#allocation2 + $0x520] sm:$0xff] }
 0x2df   : > { %2992 = vmatpush.msra.mxu2 %v2920_v21  ;;  %2839 = vmatpush.msrb.mxu3 %v2795_v1  ;;  %v2930_v8 = vld [vmem:[#allocation2 + $0x5a8] sm:$0xff]  ;;  %v2757_v21 = vld [vmem:[#allocation2 + $0x330] sm:$0xff]  ;;  %v2896_v1 = vld [vmem:[#allocation2 + $0x498] sm:$0xff] }
 0x2e0   : > { %v6936_v39 = vadd.f32 %v2480_v32, %v2458_v12  ;;  %2811 = vmatpush.msrb.mxu1 %v2779_v35  ;;  %2860 = vmatpush.msrb.mxu0 %v2762_v15  ;;  %v2928_v35 = vld [vmem:[#allocation2 + $0x598] sm:$0xff]  ;;  %v2942_v15 = vrot.slane %v6921_v26, 3  ;;  %v2755_v12 = vld [vmem:[#allocation2 + $0x320] sm:$0xff]  ;;  %v2911_v32 = vld [vmem:[#allocation2 + $0x510] sm:$0xff] }
 0x2e1   : > { %2993 = vmatpush.msra.mxu2 %v2918_v16  ;;  %2840 = vmatpush.msrb.mxu3 %v2793_v40  ;;  %v2894_v16 = vld [vmem:[#allocation2 + $0x488] sm:$0xff] }
 0x2e2   : > { %v2805_v31 = vrot.slane %v6936_v39, 2  ;;  %v3225_v50 = vrot.slane %v6936_v39, 5  ;;  %2812 = vmatpush.msrb.mxu1 %v2777_v3  ;;  %2861 = vmatpush.msrb.mxu0 %v2760_v38  ;;  %v2945_v40 = vrot.slane %v6936_v39, 3  ;;  %v2926_v3 = vld [vmem:[#allocation2 + $0x588] sm:$0xff]  ;;  %v2753_v38 = vld [vmem:[#allocation2 + $0x310] sm:$0xff] }
 0x2e3   : > { %2994 = vmatpush.msra.mxu2 %v2916_v47  ;;  %2841 = vmatpush.msrb.mxu3 %v2791_v45  ;;  %v2941_v47 = vrot.slane %v6918_v34, 3  ;;  %v2944_v45 = vrot.slane %v6929_v30, 3 }
 0x2e4   : > { %2813 = vmatpush.msrb.mxu1 %v2775_v20  ;;  %2862 = vmatpush.msrb.mxu0 %v2758_v46  ;;  %v2806_v29 = vsel %vm916_vm3, %v2804_v19, %v2805_v31  ;;  %v6945_v28 = vsel %vm1461_vm5, %v3224_v13, %v3225_v50  ;;  %v3080_v20 = vld [vmem:[#allocation2 + $0x778] sm:$0xff]  ;;  %v2909_v50 = vld [vmem:[#allocation2 + $0x500] sm:$0xff]  ;;  %v3078_v19 = vld [vmem:[#allocation2 + $0x768] sm:$0xff] }
 0x2e5   : > { %2995 = vmatpush.msra.mxu2 %v2914_v2  ;;  %2686 = vmatmul.f32.vlgmr.msra.gmra.mxu3 %v6918_v34  ;;  %v6962_v46 = vsel %vm1097_vm4, %v2941_v47, %v2942_v15  ;;  %v3064_v31 = vld [vmem:[#allocation2 + $0x6f8] sm:$0xff]  ;;  %v6966_v2 = vsel %vm1097_vm4, %v2944_v45, %v2945_v40  ;;  %v3062_v13 = vld [vmem:[#allocation2 + $0x6e8] sm:$0xff]  ;;  %v3075_v15 = vld [vmem:[#allocation2 + $0x750] sm:$0xff]  ;;  %vm3349_vm4 = vcmask 781313  }
 0x2e6   : > { %4832 = vmatmul.msk.f32.vlgmr.msra.gmra.mxu1 %vm2585_vm1, %v6929_v30  ;;  %2842 = vmatpush.msrb.mxu3 %v2789_v22  ;;  %v2751_v22 = vld [vmem:[#allocation2 + $0x300] sm:$0xff]  ;;  %v3055_v47 = vld [vmem:[#allocation2 + $0x6b0] sm:$0xff] }
 0x2e7   : > { %2814 = vmatpush.msrb.mxu1 %v2773_v17  ;;  %2863 = vmatpush.msrb.mxu0 %v2756_v49  ;;  %v2907_v17 = vld [vmem:[#allocation2 + $0x4f0] sm:$0xff]  ;;  %v3057_v40 = vld [vmem:[#allocation2 + $0x6c0] sm:$0xff] }
 0x2e8   : > { %4835 = vmatmul.msk.f32.vlgmr.msrb.gmra.mxu2 %vm2585_vm1, %v2806_v29  ;;  %2843 = vmatpush.msrb.mxu3 %v2787_v48  ;;  %v2939_v49 = vld [vmem:[#allocation2 + $0x5f0] sm:$0xff]  ;;  %v3076_v48 = vld [vmem:[#allocation2 + $0x758] sm:$0xff] }
 0x2e9   : > { %2996 = vmatpush.msra.mxu2 %v2912_v7  ;;  %2815 = vmatpush.msrb.mxu1 %v2771_v33  ;;  %v2905_v7 = vld [vmem:[#allocation2 + $0x4e0] sm:$0xff]  ;;  %v3071_v45 = vld [vmem:[#allocation2 + $0x730] sm:$0xff] }
 0x2ea   : > { %2864 = vmatpush.msrb.mxu0 %v2754_v37  ;;  %2844 = vmatpush.msrb.mxu3 %v2785_v43  ;;  %v2937_v33 = vld [vmem:[#allocation2 + $0x5e0] sm:$0xff]  ;;  %v3058_v37 = vld [vmem:[#allocation2 + $0x6c8] sm:$0xff] }
 0x2eb   : > { %2997 = vmatpush.msra.mxu2 %v2910_v57  ;;  %2816 = vmatpush.msrb.mxu1 %v2769_v6  ;;  %v3074_v43 = vld [vmem:[#allocation2 + $0x748] sm:$0xff]  ;;  %v2935_v57 = vld [vmem:[#allocation2 + $0x5d0] sm:$0xff]  ;;  %v3056_v6 = vld [vmem:[#allocation2 + $0x6b8] sm:$0xff] }
 0x2ec   : > { %2865 = vmatpush.msrb.mxu0 %v2752_v18  ;;  %2845 = vmatpush.msrb.mxu3 %v2783_v5  ;;  %v3072_v18 = vld [vmem:[#allocation2 + $0x738] sm:$0xff]  ;;  %v2901_v5 = vld [vmem:[#allocation2 + $0x4c0] sm:$0xff] }
 0x2ed   : > { %2866 = vmatmul.f32.vlgmr.msrb.gmra.mxu0 %v6953_v4  ;;  %2998 = vmatpush.msra.mxu2 %v2908_v27  ;;  %v3054_v27 = vld [vmem:[#allocation2 + $0x6a8] sm:$0xff] }
 0x2ee   : > { %3018 = vmatpush.msra.mxu0 %v2940_v24  ;;  %2817 = vmatpush.msrb.mxu1 %v2767_v36  ;;  %v3070_v24 = vld [vmem:[#allocation2 + $0x728] sm:$0xff]  ;;  %v2899_v36 = vld [vmem:[#allocation2 + $0x4b0] sm:$0xff] }
 0x2ef   : > { %2950 = vmatpush.msra.mxu3 %v2923_v55  ;;  %2999 = vmatpush.msra.mxu2 %v2906_v60  ;;  %v3052_v55 = vld [vmem:[#allocation2 + $0x698] sm:$0xff] }
 0x2f0   : > { %3019 = vmatpush.msra.mxu0 %v2938_v53  ;;  %2818 = vmatpush.msrb.mxu1 %v2765_v62  ;;  %v3068_v60 = vld [vmem:[#allocation2 + $0x718] sm:$0xff]  ;;  %v2897_v53 = vld [vmem:[#allocation2 + $0x4a0] sm:$0xff] }
 0x2f1   : > { %4834 = vmatmul.msk.f32.vlgmr.msrb.gmra.mxu3 %vm2585_vm1, %v2806_v29  ;;  %3000 = vmatpush.msra.mxu2 %v2904_v0  ;;  %v3060_v29 = vld [vmem:[#allocation2 + $0x6d8] sm:$0xff]  ;;  %v2929_v62 = vld [vmem:[#allocation2 + $0x5a0] sm:$0xff]  ;;  %v3085_v0 = vrot.slane %v6936_v39, 4 }
 0x2f2   : > { %2951 = vmatpush.msra.mxu3 %v2921_v9  ;;  %3020 = vmatpush.msra.mxu0 %v2936_v10  ;;  %v3050_v9 = vld [vmem:[#allocation2 + $0x688] sm:$0xff] }
 0x2f3   : > { %2819 = vmatpush.msrb.mxu1 %v2763_v54  ;;  %3001 = vmatpush.msra.mxu2 %v2902_v59  ;;  %v3066_v10 = vld [vmem:[#allocation2 + $0x708] sm:$0xff]  ;;  %v2895_v54 = vld [vmem:[#allocation2 + $0x490] sm:$0xff] }
 0x2f4   : > { %2952 = vmatpush.msra.mxu3 %v2919_v14  ;;  %3021 = vmatpush.msra.mxu0 %v2934_v61  ;;  %v2927_v59 = vld [vmem:[#allocation2 + $0x590] sm:$0xff]  ;;  %v3084_v14 = vrot.slane %v6929_v30, 4  ;;  %v3048_v61 = vld [vmem:[#allocation2 + $0x678] sm:$0xff] }
 0x2f5   : > { %2820 = vmatpush.msrb.mxu1 %v2761_v23  ;;  %3002 = vmatpush.msra.mxu2 %v2900_v51  ;;  %v3204_v23 = vld [vmem:[#allocation2 + $0x878] sm:$0xff]  ;;  %v2893_v51 = vld [vmem:[#allocation2 + $0x480] sm:$0xff]  ;;  %v3079_v30 = vld [vmem:[#allocation2 + $0x770] sm:$0xff] }
 0x2f6   : > { %2953 = vmatpush.msra.mxu3 %v2917_v63  ;;  %3022 = vmatpush.msra.mxu0 %v2932_v44  ;;  %v6974_v39 = vsel %vm630_vm0, %v3084_v14, %v3085_v0  ;;  %v2925_v63 = vld [vmem:[#allocation2 + $0x580] sm:$0xff]  ;;  %v3202_v44 = vld [vmem:[#allocation2 + $0x868] sm:$0xff] }
 0x2f7   : > { %2821 = vmatpush.msrb.mxu1 %v2759_v52  ;;  %3003 = vmatpush.msra.mxu2 %v2898_v58  ;;  %v3063_v52 = vld [vmem:[#allocation2 + $0x6f0] sm:$0xff]  ;;  %v3046_v58 = vld [vmem:[#allocation2 + $0x668] sm:$0xff]  ;;  %v3193_v14 = vld [vmem:[#allocation2 + $0x820] sm:$0xff] }
 0x2f8   : > { %2954 = vmatpush.msra.mxu3 %v2915_v56  ;;  %3023 = vmatpush.msra.mxu0 %v2930_v8  ;;  %v3200_v56 = vld [vmem:[#allocation2 + $0x858] sm:$0xff]  ;;  %v3061_v8 = vld [vmem:[#allocation2 + $0x6e0] sm:$0xff]  ;;  %v3178_v0 = vld [vmem:[#allocation2 + $0x7a8] sm:$0xff] }
 0x2f9   : > { %2822 = vmatpush.msrb.mxu1 %v2757_v21  ;;  %3004 = vmatpush.msra.mxu2 %v2896_v1  ;;  %v3077_v21 = vld [vmem:[#allocation2 + $0x760] sm:$0xff]  ;;  %v3044_v1 = vld [vmem:[#allocation2 + $0x658] sm:$0xff] }
 0x2fa   : > { %2955 = vmatpush.msra.mxu3 %v2913_v42  ;;  %3024 = vmatpush.msra.mxu0 %v2928_v35  ;;  %v3198_v42 = vld [vmem:[#allocation2 + $0x848] sm:$0xff]  ;;  %v3059_v35 = vld [vmem:[#allocation2 + $0x6d0] sm:$0xff] }
 0x2fb   : > { %2823 = vmatpush.msrb.mxu1 %v2755_v12  ;;  %3005 = vmatpush.msra.mxu2 %v2894_v16  ;;  %v3042_v12 = vld [vmem:[#allocation2 + $0x648] sm:$0xff]  ;;  %v3196_v16 = vld [vmem:[#allocation2 + $0x838] sm:$0xff] }
 0x2fc   : > { %2956 = vmatpush.msra.mxu3 %v2911_v32  ;;  %3025 = vmatpush.msra.mxu0 %v2926_v3  ;;  %v3073_v32 = vld [vmem:[#allocation2 + $0x740] sm:$0xff]  ;;  %v3040_v3 = vld [vmem:[#allocation2 + $0x638] sm:$0xff] }
 0x2fd   : > { %2824 = vmatpush.msrb.mxu1 %v2753_v38  ;;  %3006 = vmatmul.f32.vlgmr.msra.gmra.mxu2 %v6962_v46  ;;  %v3194_v38 = vld [vmem:[#allocation2 + $0x828] sm:$0xff] }
 0x2fe   : > { %4837 = vmatmul.msk.f32.vlgmr.msra.gmra.mxu0 %vm2585_vm1, %v6966_v2  ;;  %3158 = vmatpush.msrb.mxu2 %v3080_v20  ;;  %v3038_v20 = vld [vmem:[#allocation2 + $0x628] sm:$0xff] }
 0x2ff   : > { %3130 = vmatpush.msrb.mxu0 %v3064_v31  ;;  %2957 = vmatpush.msra.mxu3 %v2909_v50  ;;  %v3053_v31 = vld [vmem:[#allocation2 + $0x6a0] sm:$0xff] }
 0x300   : > { %2825 = vmatpush.msrb.mxu1 %v2751_v22  ;;  %3159 = vmatpush.msrb.mxu2 %v3078_v19  ;;  %v3069_v50 = vld [vmem:[#allocation2 + $0x720] sm:$0xff]  ;;  %v3190_v22 = vld [vmem:[#allocation2 + $0x808] sm:$0xff]  ;;  %v3082_v19 = vrot.slane %v6921_v26, 4 }
 0x301   : > { %3131 = vmatpush.msrb.mxu0 %v3062_v13  ;;  %2826 = vmatmul.f32.vlgmr.msrb.gmra.mxu1 %v6953_v4  ;;  %v2931_v4 = vld [vmem:[#allocation2 + $0x5b0] sm:$0xff] }
 0x302   : > { %2958 = vmatpush.msra.mxu3 %v2907_v17  ;;  %2978 = vmatpush.msra.mxu1 %v2939_v49  ;;  %v3051_v13 = vld [vmem:[#allocation2 + $0x690] sm:$0xff]  ;;  %v3034_v49 = vld [vmem:[#allocation2 + $0x608] sm:$0xff] }
 0x303   : > { %3132 = vmatpush.msrb.mxu0 %v3060_v29  ;;  %3160 = vmatpush.msrb.mxu2 %v3076_v48  ;;  %v3067_v17 = vld [vmem:[#allocation2 + $0x710] sm:$0xff]  ;;  %v3188_v29 = vld [vmem:[#allocation2 + $0x7f8] sm:$0xff]  ;;  %v3081_v48 = vrot.slane %v6918_v34, 4 }
 0x304   : > { %2959 = vmatpush.msra.mxu3 %v2905_v7  ;;  %2979 = vmatpush.msra.mxu1 %v2937_v33  ;;  %v3049_v7 = vld [vmem:[#allocation2 + $0x680] sm:$0xff]  ;;  %v3220_v33 = vld [vmem:[#allocation2 + $0x8f8] sm:$0xff] }
 0x305   : > { %3133 = vmatpush.msrb.mxu0 %v3058_v37  ;;  %3161 = vmatpush.msrb.mxu2 %v3074_v43  ;;  %v3065_v37 = vld [vmem:[#allocation2 + $0x700] sm:$0xff]  ;;  %v6984_v26 = vsel %vm630_vm0, %v3081_v48, %v3082_v19  ;;  %v3186_v43 = vld [vmem:[#allocation2 + $0x7e8] sm:$0xff]  ;;  %v3184_v34 = vld [vmem:[#allocation2 + $0x7d8] sm:$0xff]  ;;  %vm3333_vm0 = vcmask 779264  }
 0x306   : > { %2960 = vmatpush.msra.mxu3 %v2903_v11  ;;  %2980 = vmatpush.msra.mxu1 %v2935_v57  ;;  %v3203_v11 = vld [vmem:[#allocation2 + $0x870] sm:$0xff]  ;;  %v3218_v57 = vld [vmem:[#allocation2 + $0x8e8] sm:$0xff] }
 0x307   : > { %3134 = vmatpush.msrb.mxu0 %v3056_v6  ;;  %3162 = vmatpush.msrb.mxu2 %v3072_v18  ;;  %v3047_v6 = vld [vmem:[#allocation2 + $0x670] sm:$0xff]  ;;  %v3201_v18 = vld [vmem:[#allocation2 + $0x860] sm:$0xff] }
 0x308   : > { %2961 = vmatpush.msra.mxu3 %v2901_v5  ;;  %2981 = vmatpush.msra.mxu1 %v2933_v25  ;;  %v3216_v5 = vld [vmem:[#allocation2 + $0x8d8] sm:$0xff]  ;;  %v3045_v25 = vld [vmem:[#allocation2 + $0x660] sm:$0xff] }
 0x309   : > { %3135 = vmatpush.msrb.mxu0 %v3054_v27  ;;  %3163 = vmatpush.msrb.mxu2 %v3070_v24  ;;  %v3182_v27 = vld [vmem:[#allocation2 + $0x7c8] sm:$0xff]  ;;  %v3199_v24 = vld [vmem:[#allocation2 + $0x850] sm:$0xff] }
 0x30a   : > { %2962 = vmatpush.msra.mxu3 %v2899_v36  ;;  %2982 = vmatpush.msra.mxu1 %v2931_v4  ;;  %v3214_v36 = vld [vmem:[#allocation2 + $0x8c8] sm:$0xff]  ;;  %v3043_v4 = vld [vmem:[#allocation2 + $0x650] sm:$0xff] }
 0x30b   : > { %3136 = vmatpush.msrb.mxu0 %v3052_v55  ;;  %3164 = vmatpush.msrb.mxu2 %v3068_v60  ;;  %v3180_v55 = vld [vmem:[#allocation2 + $0x7b8] sm:$0xff]  ;;  %v3197_v60 = vld [vmem:[#allocation2 + $0x840] sm:$0xff] }
 0x30c   : > { %2963 = vmatpush.msra.mxu3 %v2897_v53  ;;  %2983 = vmatpush.msra.mxu1 %v2929_v62  ;;  %v3212_v53 = vld [vmem:[#allocation2 + $0x8b8] sm:$0xff]  ;;  %v3041_v62 = vld [vmem:[#allocation2 + $0x640] sm:$0xff] }
 0x30d   : > { %3137 = vmatpush.msrb.mxu0 %v3050_v9  ;;  %3165 = vmatpush.msrb.mxu2 %v3066_v10  ;;  %v3195_v9 = vld [vmem:[#allocation2 + $0x830] sm:$0xff]  ;;  %v3210_v10 = vld [vmem:[#allocation2 + $0x8a8] sm:$0xff] }
 0x30e   : > { %2964 = vmatpush.msra.mxu3 %v2895_v54  ;;  %2984 = vmatpush.msra.mxu1 %v2927_v59  ;;  %v3039_v54 = vld [vmem:[#allocation2 + $0x630] sm:$0xff]  ;;  %v3176_v59 = vld [vmem:[#allocation2 + $0x798] sm:$0xff] }
 0x30f   : > { %4839 = vmatmul.msk.f32.vlgmr.msrb.gmra.mxu2 %vm2585_vm1, %v6974_v39  ;;  %3138 = vmatpush.msrb.mxu0 %v3048_v61  ;;  %v3208_v61 = vld [vmem:[#allocation2 + $0x898] sm:$0xff] }
 0x310   : > { %3270 = vmatpush.msra.mxu2 %v3204_v23  ;;  %2965 = vmatpush.msra.mxu3 %v2893_v51  ;;  %v3037_v23 = vld [vmem:[#allocation2 + $0x620] sm:$0xff]  ;;  %v3174_v51 = vld [vmem:[#allocation2 + $0x788] sm:$0xff] }
 0x311   : > { %2985 = vmatpush.msra.mxu1 %v2925_v63  ;;  %2966 = vmatmul.f32.vlgmr.msra.gmra.mxu3 %v6962_v46  ;;  %v3192_v46 = vld [vmem:[#allocation2 + $0x818] sm:$0xff]  ;;  %v3206_v63 = vld [vmem:[#allocation2 + $0x888] sm:$0xff] }
 0x312   : > { %3271 = vmatpush.msra.mxu2 %v3202_v44  ;;  %4836 = vmatmul.msk.f32.vlgmr.msra.gmra.mxu1 %vm2585_vm1, %v6966_v2  ;;  %v3036_v2 = vld [vmem:[#allocation2 + $0x618] sm:$0xff]  ;;  %v3035_v44 = vld [vmem:[#allocation2 + $0x610] sm:$0xff] }
 0x313   : > { %3090 = vmatpush.msrb.mxu1 %v3063_v52  ;;  %3118 = vmatpush.msrb.mxu3 %v3079_v30  ;;  %v3189_v52 = vld [vmem:[#allocation2 + $0x800] sm:$0xff] }
 0x314   : > { %3139 = vmatpush.msrb.mxu0 %v3046_v58  ;;  %3272 = vmatpush.msra.mxu2 %v3200_v56  ;;  %v3033_v30 = vld [vmem:[#allocation2 + $0x600] sm:$0xff]  ;;  %v3187_v58 = vld [vmem:[#allocation2 + $0x7f0] sm:$0xff] }
 0x315   : > { %3091 = vmatpush.msrb.mxu1 %v3061_v8  ;;  %3119 = vmatpush.msrb.mxu3 %v3077_v21  ;;  %v3219_v56 = vld [vmem:[#allocation2 + $0x8f0] sm:$0xff]  ;;  %v3185_v8 = vld [vmem:[#allocation2 + $0x7e0] sm:$0xff] }
 0x316   : > { %3140 = vmatpush.msrb.mxu0 %v3044_v1  ;;  %3273 = vmatpush.msra.mxu2 %v3198_v42  ;;  %v3217_v21 = vld [vmem:[#allocation2 + $0x8e0] sm:$0xff]  ;;  %v3183_v1 = vld [vmem:[#allocation2 + $0x7d0] sm:$0xff] }
 0x317   : > { %3092 = vmatpush.msrb.mxu1 %v3059_v35  ;;  %3120 = vmatpush.msrb.mxu3 %v3075_v15  ;;  %v3215_v42 = vld [vmem:[#allocation2 + $0x8d0] sm:$0xff]  ;;  %v3181_v35 = vld [vmem:[#allocation2 + $0x7c0] sm:$0xff] }
 0x318   : > { %3141 = vmatpush.msrb.mxu0 %v3042_v12  ;;  %3274 = vmatpush.msra.mxu2 %v3196_v16  ;;  %v3213_v15 = vld [vmem:[#allocation2 + $0x8c0] sm:$0xff]  ;;  %v3179_v12 = vld [vmem:[#allocation2 + $0x7b0] sm:$0xff] }
 0x319   : > { %3093 = vmatpush.msrb.mxu1 %v3057_v40  ;;  %3121 = vmatpush.msrb.mxu3 %v3073_v32  ;;  %v3211_v16 = vld [vmem:[#allocation2 + $0x8b0] sm:$0xff]  ;;  %v3177_v40 = vld [vmem:[#allocation2 + $0x7a0] sm:$0xff] }
 0x31a   : > { %3142 = vmatpush.msrb.mxu0 %v3040_v3  ;;  %3275 = vmatpush.msra.mxu2 %v3194_v38  ;;  %v3209_v32 = vld [vmem:[#allocation2 + $0x8a0] sm:$0xff]  ;;  %v3175_v3 = vld [vmem:[#allocation2 + $0x790] sm:$0xff] }
 0x31b   : > { %3094 = vmatpush.msrb.mxu1 %v3055_v47  ;;  %3122 = vmatpush.msrb.mxu3 %v3071_v45  ;;  %v3207_v38 = vld [vmem:[#allocation2 + $0x890] sm:$0xff]  ;;  %v3173_v47 = vld [vmem:[#allocation2 + $0x780] sm:$0xff] }
 0x31c   : > { %3143 = vmatpush.msrb.mxu0 %v3038_v20  ;;  %3276 = vmatpush.msra.mxu2 %v3192_v46  ;;  %v3205_v45 = vld [vmem:[#allocation2 + $0x880] sm:$0xff] }
 0x31d   : > { %3095 = vmatpush.msrb.mxu1 %v3053_v31  ;;  %3123 = vmatpush.msrb.mxu3 %v3069_v50 }
 0x31e   : > { %3144 = vmatpush.msrb.mxu0 %v3036_v2  ;;  %3277 = vmatpush.msra.mxu2 %v3190_v22 }
 0x31f   : > { %3096 = vmatpush.msrb.mxu1 %v3051_v13  ;;  %3124 = vmatpush.msrb.mxu3 %v3067_v17 }
 0x320   : > { %3145 = vmatpush.msrb.mxu0 %v3034_v49  ;;  %3278 = vmatpush.msra.mxu2 %v3188_v29 }
 0x321   : > { %3146 = vmatmul.f32.vlgmr.msrb.gmra.mxu0 %v6984_v26  ;;  %3097 = vmatpush.msrb.mxu1 %v3049_v7 }
 0x322   : > { %3298 = vmatpush.msra.mxu0 %v3220_v33  ;;  %3125 = vmatpush.msrb.mxu3 %v3065_v37 }
 0x323   : > { %4838 = vmatmul.msk.f32.vlgmr.msrb.gmra.mxu3 %vm2585_vm1, %v6974_v39  ;;  %3279 = vmatpush.msra.mxu2 %v3186_v43  ;;  %v3191_v39 = vld [vmem:[#allocation2 + $0x810] sm:$0xff] }
 0x324   : > { %3230 = vmatpush.msra.mxu3 %v3203_v11  ;;  %3299 = vmatpush.msra.mxu0 %v3218_v57 }
 0x325   : > { %3098 = vmatpush.msrb.mxu1 %v3047_v6  ;;  %3280 = vmatpush.msra.mxu2 %v3184_v34 }
 0x326   : > { %3231 = vmatpush.msra.mxu3 %v3201_v18  ;;  %3300 = vmatpush.msra.mxu0 %v3216_v5  ;;  %v3312_v18 = vld [vmem:[%s8214_s6] sm:$0x3] }
 0x327   : > { %3099 = vmatpush.msrb.mxu1 %v3045_v25  ;;  %3281 = vmatpush.msra.mxu2 %v3182_v27 }
 0x328   : > { %3232 = vmatpush.msra.mxu3 %v3199_v24  ;;  %3301 = vmatpush.msra.mxu0 %v3214_v36 }
 0x329   : > { %3100 = vmatpush.msrb.mxu1 %v3043_v4  ;;  %3282 = vmatpush.msra.mxu2 %v3180_v55  ;;  %v3315_v4 = vperm.slane %v3312_v18, 1 }
 0x32a   : > { %3233 = vmatpush.msra.mxu3 %v3197_v60  ;;  %3302 = vmatpush.msra.mxu0 %v3212_v53 }
 0x32b   : > { %3101 = vmatpush.msrb.mxu1 %v3041_v62  ;;  %3283 = vmatpush.msra.mxu2 %v3178_v0 }
 0x32c   : > { %3234 = vmatpush.msra.mxu3 %v3195_v9  ;;  %3303 = vmatpush.msra.mxu0 %v3210_v10 }
 0x32d   : > { %3102 = vmatpush.msrb.mxu1 %v3039_v54  ;;  %3284 = vmatpush.msra.mxu2 %v3176_v59 }
 0x32e   : > { %3235 = vmatpush.msra.mxu3 %v3193_v14  ;;  %3304 = vmatpush.msra.mxu0 %v3208_v61 }
 0x32f   : > { %3103 = vmatpush.msrb.mxu1 %v3037_v23  ;;  %3285 = vmatpush.msra.mxu2 %v3174_v51 }
 0x330   : > { %3236 = vmatpush.msra.mxu3 %v3191_v39  ;;  %3305 = vmatpush.msra.mxu0 %v3206_v63 }
 0x331   : > { %3104 = vmatpush.msrb.mxu1 %v3035_v44  ;;  %3286 = vmatmul.f32.vlgmr.msra.gmra.mxu2 %v6927_v41 }
 0x332   : > { %4841 = vmatmul.msk.f32.vlgmr.msra.gmra.mxu0 %vm2585_vm1, %v6945_v28  ;;  %3237 = vmatpush.msra.mxu3 %v3189_v52 }
 0x333   : > { %3105 = vmatpush.msrb.mxu1 %v3033_v30 }
 0x334   : > { %3106 = vmatmul.f32.vlgmr.msrb.gmra.mxu1 %v6984_v26  ;;  %3238 = vmatpush.msra.mxu3 %v3187_v58 }
 0x335   : > { %3258 = vmatpush.msra.mxu1 %v3219_v56 }
 0x336   : > { %3239 = vmatpush.msra.mxu3 %v3185_v8 }
 0x337   : > { %3259 = vmatpush.msra.mxu1 %v3217_v21 }
 0x338   : > { %3240 = vmatpush.msra.mxu3 %v3183_v1 }
 0x339   : > { %3260 = vmatpush.msra.mxu1 %v3215_v42 }
 0x33a   : > { %3241 = vmatpush.msra.mxu3 %v3181_v35 }
 0x33b   : > { %3261 = vmatpush.msra.mxu1 %v3213_v15 }
 0x33c   : > { %3242 = vmatpush.msra.mxu3 %v3179_v12 }
 0x33d   : > { %3262 = vmatpush.msra.mxu1 %v3211_v16 }
 0x33e   : > { %3243 = vmatpush.msra.mxu3 %v3177_v40 }
 0x33f   : > { %3263 = vmatpush.msra.mxu1 %v3209_v32 }
 0x340   : > { %3244 = vmatpush.msra.mxu3 %v3175_v3 }
 0x341   : > { %3264 = vmatpush.msra.mxu1 %v3207_v38 }
 0x342   : > { %3245 = vmatpush.msra.mxu3 %v3173_v47 }
 0x343   : > { %3265 = vmatpush.msra.mxu1 %v3205_v45  ;;  %3246 = vmatmul.f32.vlgmr.msra.gmra.mxu3 %v6927_v41 }
 0x344   : > { %4840 = vmatmul.msk.f32.vlgmr.msra.gmra.mxu1 %vm2585_vm1, %v6945_v28 }
 0x346   : > { %v2645_v46 = vpop.f32.mrf.mxu0 }
 0x34c   : > { %v2605_v20 = vpop.f32.mrf.mxu2 }
 0x354   : > { %v2727_v31 = vpop.f32.mrf.mxu2 }
 0x357   : > { %v2747_v50 = vpop.f32.mrf.mxu0 }
 0x35a   : > { %v2665_v22 = vpop.f32.mrf.mxu1 }
 0x35b   : > { %v2666_v7 = vadd.f32 %v2665_v22, %v2645_v46  ;;  %v3314_v22 = vperm.slane %v3312_v18, 0 }
 0x35d   : > { %v2728_v33 = vadd.f32 %v2727_v31, %v2666_v7 }
 0x35f   : > { %v2625_v2 = vpop.f32.mrf.mxu3  ;;  %v2748_v28 = vadd.f32 %v2747_v50, %v2728_v33 }
 0x360   : > { %v2626_v0 = vadd.f32 %v2625_v2, %v2605_v20 }
 0x363   : > { %v2707_v48 = vpop.f32.mrf.mxu1 }
 0x368   : > { %v2687_v17 = vpop.f32.mrf.mxu3 }
 0x369   : > { %v2688_v10 = vadd.f32 %v2687_v17, %v2626_v0 }
 0x36a   : > { %v2867_v19 = vpop.f32.mrf.mxu0 }
 0x36b   : > { %v2887_v13 = vpop.f32.mrf.mxu2  ;;  %v2708_v56 = vadd.f32 %v2707_v48, %v2688_v10 }
 0x36c   : > { %v2888_v41 = vadd.f32 %v2887_v13, %v2867_v19 }
 0x36e   : > { %v2891_v6 = vadd.f32 %v2888_v41, %v2748_v28 }
 0x374   : > { %v2847_v43 = vpop.f32.mrf.mxu3 }
 0x37b   : > { %v3027_v49 = vpop.f32.mrf.mxu0 }
 0x37e   : > { %v2827_v11 = vpop.f32.mrf.mxu1 }
 0x37f   : > { %v2848_v54 = vadd.f32 %v2847_v43, %v2827_v11 }
 0x380   : > { %v3007_v29 = vpop.f32.mrf.mxu2 }
 0x381   : > { %v3028_v57 = vadd.f32 %v3027_v49, %v3007_v29  ;;  %v2890_v15 = vadd.f32 %v2848_v54, %v2708_v56 }
 0x383   : > { %v3031_v5 = vadd.f32 %v3028_v57, %v2891_v6 }
 0x38f   : > { %v2987_v55 = vpop.f32.mrf.mxu1 }
 0x392   : > { %v3167_v37 = vpop.f32.mrf.mxu2 }
 0x394   : > { %v2967_v60 = vpop.f32.mrf.mxu3 }
 0x395   : > { %v2988_v8 = vadd.f32 %v2987_v55, %v2967_v60 }
 0x397   : > { %v3030_v38 = vadd.f32 %v2988_v8, %v2890_v15  ;;  %v4902_v15 = vld [vmem:[%s8215_s7 + $0x3e0] sm:$0xff] }
 0x39e   : > { %v3147_v26 = vpop.f32.mrf.mxu0 }
 0x39f   : > { %v3168_v34 = vadd.f32 %v3167_v37, %v3147_v26 }
 0x3a1   : > { %v3171_v24 = vadd.f32 %v3168_v34, %v3031_v5 }
 0x3a6   : > { %v3127_v14 = vpop.f32.mrf.mxu3 }
 0x3af   : > { %v3307_v25 = vpop.f32.mrf.mxu0 }
 0x3b1   : > { %v3107_v61 = vpop.f32.mrf.mxu1 }
 0x3b2   : > { %v3128_v12 = vadd.f32 %v3127_v14, %v3107_v61 }
 0x3b4   : > { %v3287_v27 = vpop.f32.mrf.mxu2  ;;  %v3170_v31 = vadd.f32 %v3128_v12, %v3030_v38  ;;  %v4903_v12 = vld [vmem:[%s8215_s7 + $0x3e8] sm:$0xff] }
 0x3b5   : > { %v3308_v36 = vadd.f32 %v3307_v25, %v3287_v27  ;;  %v4899_v38 = vld [vmem:[%s8215_s7 + $0x3c8] sm:$0xff] }
 0x3b7   : > { %v3311_v53 = vadd.f32 %v3308_v36, %v3171_v24 }
 0x3b9   : > { %v3319_v62 = vadd.f32 %v3315_v4, %v3311_v53 }
 0x3bb   : > { %vm3321_vm2 = vcmp.ge.f32.partialorder %v3319_v62, 0.0  ;;  %v3323_v9 = vmul.f32 0.01, %v3319_v62 }
 0x3bd   : > { %v3325_v59 = vsel %vm3321_vm2, %v3319_v62, %v3323_v9  ;;  %vm4425_vm2 = vcmask 73728  }
 0x3be   : > { %v3334_v23 = vsel %vm3333_vm0, %v3325_v59, -inf  ;;  %v3350_v51 = vsel %vm3349_vm4, %v3325_v59, -inf  ;;  %v3366_v39 = vsel %vm3365_vm8, %v3325_v59, -inf  ;;  %v3382_v63 = vsel %vm3381_vm9, %v3325_v59, -inf }
 0x3bf   : > { %v3335_v44 = vrot.slane %v3334_v23, 4  ;;  %v3351_v52 = vrot.slane %v3350_v51, 4  ;;  %v3367_v30 = vrot.slane %v3366_v39, 4  ;;  %v3383_v58 = vrot.slane %v3382_v63, 4 }
 0x3c0   : > { %vm4401_vm4 = vcmask 130048  }
 0x3c1   : > { %v3336_v21 = vmax.f32 %v3334_v23, %v3335_v44  ;;  %v3352_v1 = vmax.f32 %v3350_v51, %v3351_v52  ;;  %v3368_v42 = vmax.f32 %v3366_v39, %v3367_v30  ;;  %v3384_v35 = vmax.f32 %v3382_v63, %v3383_v58  ;;  %v3267_v50 = vpop.f32.mrf.mxu1 }
 0x3c3   : > { %v3337_v16 = vrot.slane %v3336_v21, 2  ;;  %v3353_v40 = vrot.slane %v3352_v1, 2  ;;  %v3369_v32 = vrot.slane %v3368_v42, 2  ;;  %v3385_v3 = vrot.slane %v3384_v35, 2 }
 0x3c5   : > { %v3338_v47 = vmax.f32 %v3336_v21, %v3337_v16  ;;  %v3354_v45 = vmax.f32 %v3352_v1, %v3353_v40  ;;  %v3370_v20 = vmax.f32 %v3368_v42, %v3369_v32  ;;  %v3386_v46 = vmax.f32 %v3384_v35, %v3385_v3  ;;  %v4904_v42 = vld [vmem:[%s8215_s7 + $0x3f0] sm:$0xff]  ;;  %v4905_v35 = vld [vmem:[%s8215_s7 + $0x3f8] sm:$0xff]  ;;  %v4898_v3 = vld [vmem:[%s8215_s7 + $0x3c0] sm:$0xff] }
 0x3c6   : > { %v3247_v2 = vpop.f32.mrf.mxu3  ;;  %3597 = vmatpush.msrb.mxu3 %v4904_v42  ;;  %3637 = vmatpush.msrb.mxu2 %v4905_v35  ;;  %v4900_v16 = vld [vmem:[%s8215_s7 + $0x3d0] sm:$0xff]  ;;  %v4901_v40 = vld [vmem:[%s8215_s7 + $0x3d8] sm:$0xff]  ;;  %v3494_v35 = vld [vmem:[%s8215_s7 + $0x1a0] sm:$0xff] }
 0x3c7   : > { %v3268_v19 = vadd.f32 %v3267_v50, %v3247_v2  ;;  %v3339_v13 = vrot.slane %v3338_v47, 1  ;;  %v3355_v17 = vrot.slane %v3354_v45, 1  ;;  %v3371_v49 = vrot.slane %v3370_v20, 1  ;;  %v4892_v50 = vld [vmem:[%s8215_s7 + $0x390] sm:$0xff]  ;;  %v4893_v2 = vld [vmem:[%s8215_s7 + $0x398] sm:$0xff] }
 0x3c8   : > { %v3387_v29 = vrot.slane %v3386_v46, 1  ;;  %3598 = vmatpush.msrb.mxu3 %v4902_v15  ;;  %3638 = vmatpush.msrb.mxu2 %v4903_v12  ;;  %v3497_v42 = vld [vmem:[%s8215_s7 + $0x1b8] sm:$0xff]  ;;  %v3495_v15 = vld [vmem:[%s8215_s7 + $0x1a8] sm:$0xff]  ;;  %v3492_v12 = vld [vmem:[%s8215_s7 + $0x190] sm:$0xff] }
 0x3c9   : > { %v3310_v48 = vadd.f32 %v3268_v19, %v3170_v31  ;;  %v3340_v7 = vmax.f32 %v3338_v47, %v3339_v13  ;;  %v3356_v33 = vmax.f32 %v3354_v45, %v3355_v17  ;;  %v3372_v37 = vmax.f32 %v3370_v20, %v3371_v49  ;;  %v4896_v47 = vld [vmem:[%s8215_s7 + $0x3b0] sm:$0xff]  ;;  %v4897_v45 = vld [vmem:[%s8215_s7 + $0x3b8] sm:$0xff]  ;;  %v4894_v20 = vld [vmem:[%s8215_s7 + $0x3a0] sm:$0xff] }
 0x3ca   : > { %v3388_v41 = vmax.f32 %v3386_v46, %v3387_v29  ;;  %3599 = vmatpush.msrb.mxu3 %v4900_v16  ;;  %3639 = vmatpush.msrb.mxu2 %v4901_v40  ;;  %v4895_v46 = vld [vmem:[%s8215_s7 + $0x3a8] sm:$0xff]  ;;  %v4890_v13 = vld [vmem:[%s8215_s7 + $0x380] sm:$0xff]  ;;  %v4888_v49 = vld [vmem:[%s8215_s7 + $0x370] sm:$0xff] }
 0x3cb   : > { %v3318_v26 = vadd.f32 %v3314_v22, %v3310_v48  ;;  %v3390_v43 = vsel %vm1827_vm7, %v3340_v7, %v3356_v33  ;;  %v4891_v17 = vld [vmem:[%s8215_s7 + $0x388] sm:$0xff]  ;;  %v4889_v29 = vld [vmem:[%s8215_s7 + $0x378] sm:$0xff]  ;;  %v4872_v48 = vld [vmem:[%s8215_s7 + $0x2f0] sm:$0xff] }
 0x3cc   : > { %v3392_v11 = vsel %vm1644_vm6, %v3390_v43, %v3372_v37  ;;  %3600 = vmatpush.msrb.mxu3 %v4898_v3  ;;  %3640 = vmatpush.msrb.mxu2 %v4899_v38  ;;  %v4873_v7 = vld [vmem:[%s8215_s7 + $0x2f8] sm:$0xff]  ;;  %v4870_v33 = vld [vmem:[%s8215_s7 + $0x2e0] sm:$0xff]  ;;  %v4871_v37 = vld [vmem:[%s8215_s7 + $0x2e8] sm:$0xff] }
 0x3cd   : > { %vm3320_vm12 = vcmp.ge.f32.partialorder %v3318_v26, 0.0  ;;  %v3322_v28 = vmul.f32 0.01, %v3318_v26  ;;  %v7002_v57 = vsel %vm1461_vm5, %v3392_v11, %v3388_v41  ;;  %v4887_v41 = vld [vmem:[%s8215_s7 + $0x368] sm:$0xff]  ;;  %3577 = vmatpush.msrb.mxu1 %v4872_v48  ;;  %3617 = vmatpush.msrb.mxu0 %v4873_v7  ;;  %v4868_v43 = vld [vmem:[%s8215_s7 + $0x2d0] sm:$0xff]  ;;  %v4869_v11 = vld [vmem:[%s8215_s7 + $0x2d8] sm:$0xff] }
 0x3ce   : > { %3405 = vrot.lane.b32.xlu0 %v7002_v57, %s5287_s30  ;;  %3601 = vmatpush.msrb.mxu3 %v4896_v47  ;;  %v3493_v16 = vld [vmem:[%s8215_s7 + $0x198] sm:$0xff]  ;;  %v3490_v40 = vld [vmem:[%s8215_s7 + $0x180] sm:$0xff]  ;;  %v3491_v3 = vld [vmem:[%s8215_s7 + $0x188] sm:$0xff] }
 0x3cf   : > { %v3324_v6 = vsel %vm3320_vm12, %v3318_v26, %v3322_v28  ;;  %3641 = vmatpush.msrb.mxu2 %v4897_v45  ;;  %v4886_v26 = vld [vmem:[%s8215_s7 + $0x360] sm:$0xff]  ;;  %v4884_v28 = vld [vmem:[%s8215_s7 + $0x350] sm:$0xff]  ;;  %3578 = vmatpush.msrb.mxu1 %v4870_v33  ;;  %v3489_v47 = vld [vmem:[%s8215_s7 + $0x178] sm:$0xff] }
 0x3d0   : > { %v3326_v34 = vsel %vm1644_vm6, %v3324_v6, -inf  ;;  %v3342_v18 = vsel %vm3341_vm10, %v3324_v6, -inf  ;;  %v3358_v5 = vsel %vm3357_vm11, %v3324_v6, -inf  ;;  %v3374_v25 = vsel %vm3373_vm13, %v3324_v6, -inf  ;;  %3602 = vmatpush.msrb.mxu3 %v4894_v20  ;;  %v4885_v6 = vld [vmem:[%s8215_s7 + $0x358] sm:$0xff]  ;;  %3618 = vmatpush.msrb.mxu0 %v4871_v37  ;;  %v3488_v38 = vld [vmem:[%s8215_s7 + $0x170] sm:$0xff] }
 0x3d1   : > { %v3327_v27 = vrot.slane %v3326_v34, 4  ;;  %v3343_v24 = vrot.slane %v3342_v18, 4  ;;  %v3359_v36 = vrot.slane %v3358_v5, 4  ;;  %v3375_v4 = vrot.slane %v3374_v25, 4  ;;  %3642 = vmatpush.msrb.mxu2 %v4895_v46  ;;  %3579 = vmatpush.msrb.mxu1 %v4868_v43  ;;  %v3486_v45 = vld [vmem:[%s8215_s7 + $0x160] sm:$0xff]  ;;  %v3487_v20 = vld [vmem:[%s8215_s7 + $0x168] sm:$0xff] }
 0x3d2   : > { %3603 = vmatpush.msrb.mxu3 %v4892_v50  ;;  %3619 = vmatpush.msrb.mxu0 %v4869_v11  ;;  %v3484_v46 = vld [vmem:[%s8215_s7 + $0x150] sm:$0xff]  ;;  %v3482_v50 = vld [vmem:[%s8215_s7 + $0x140] sm:$0xff]  ;;  %v3479_v7 = vld [vmem:[%s8215_s7 + $0x128] sm:$0xff] }
 0x3d3   : > { %v3328_v55 = vmax.f32 %v3326_v34, %v3327_v27  ;;  %v3344_v60 = vmax.f32 %v3342_v18, %v3343_v24  ;;  %v3360_v53 = vmax.f32 %v3358_v5, %v3359_v36  ;;  %v3376_v62 = vmax.f32 %v3374_v25, %v3375_v4  ;;  %3643 = vmatpush.msrb.mxu2 %v4893_v2  ;;  %v4866_v34 = vld [vmem:[%s8215_s7 + $0x2c0] sm:$0xff]  ;;  %v4867_v18 = vld [vmem:[%s8215_s7 + $0x2c8] sm:$0xff]  ;;  %v4864_v24 = vld [vmem:[%s8215_s7 + $0x2b0] sm:$0xff] }
 0x3d4   : > { %3604 = vmatpush.msrb.mxu3 %v4890_v13  ;;  %v4882_v5 = vld [vmem:[%s8215_s7 + $0x340] sm:$0xff]  ;;  %v4883_v25 = vld [vmem:[%s8215_s7 + $0x348] sm:$0xff]  ;;  %v4880_v4 = vld [vmem:[%s8215_s7 + $0x330] sm:$0xff]  ;;  %3580 = vmatpush.msrb.mxu1 %v4866_v34 }
 0x3d5   : > { %v3329_v0 = vrot.slane %v3328_v55, 2  ;;  %v3345_v9 = vrot.slane %v3344_v60, 2  ;;  %v3361_v10 = vrot.slane %v3360_v53, 2  ;;  %v3377_v54 = vrot.slane %v3376_v62, 2  ;;  %3644 = vmatpush.msrb.mxu2 %v4891_v17  ;;  %3620 = vmatpush.msrb.mxu0 %v4867_v18  ;;  %v3483_v2 = vld [vmem:[%s8215_s7 + $0x148] sm:$0xff]  ;;  %v3480_v13 = vld [vmem:[%s8215_s7 + $0x130] sm:$0xff] }
 0x3d6   : > { %3409 = vrot.lane.b32.xlu0 %v7002_v57, %s5288_s27  ;;  %3605 = vmatpush.msrb.mxu3 %v4888_v49  ;;  %v3481_v17 = vld [vmem:[%s8215_s7 + $0x138] sm:$0xff]  ;;  %v4856_v49 = vld [vmem:[%s8215_s7 + $0x270] sm:$0xff]  ;;  %v3478_v48 = vld [vmem:[%s8215_s7 + $0x120] sm:$0xff] }
 0x3d7   : > { %v3330_v59 = vmax.f32 %v3328_v55, %v3329_v0  ;;  %v3346_v14 = vmax.f32 %v3344_v60, %v3345_v9  ;;  %v3362_v61 = vmax.f32 %v3360_v53, %v3361_v10  ;;  %v3378_v23 = vmax.f32 %v3376_v62, %v3377_v54  ;;  %3645 = vmatpush.msrb.mxu2 %v4889_v29  ;;  %v4881_v55 = vld [vmem:[%s8215_s7 + $0x338] sm:$0xff]  ;;  %v4862_v53 = vld [vmem:[%s8215_s7 + $0x2a0] sm:$0xff]  ;;  %v4879_v0 = vld [vmem:[%s8215_s7 + $0x328] sm:$0xff] }
 0x3d8   : > { %3606 = vmatpush.msrb.mxu3 %v4886_v26  ;;  %v4865_v60 = vld [vmem:[%s8215_s7 + $0x2b8] sm:$0xff]  ;;  %v4878_v62 = vld [vmem:[%s8215_s7 + $0x320] sm:$0xff]  ;;  %3581 = vmatpush.msrb.mxu1 %v4864_v24  ;;  %v4863_v9 = vld [vmem:[%s8215_s7 + $0x2a8] sm:$0xff] }
 0x3d9   : > { %v3331_v51 = vrot.slane %v3330_v59, 1  ;;  %v3347_v39 = vrot.slane %v3346_v14, 1  ;;  %v3363_v63 = vrot.slane %v3362_v61, 1  ;;  %v3379_v44 = vrot.slane %v3378_v23, 1  ;;  %3646 = vmatpush.msrb.mxu2 %v4887_v41  ;;  %v4860_v10 = vld [vmem:[%s8215_s7 + $0x290] sm:$0xff]  ;;  %3621 = vmatpush.msrb.mxu0 %v4865_v60  ;;  %v4857_v29 = vld [vmem:[%s8215_s7 + $0x278] sm:$0xff] }
 0x3da   : > { %3607 = vmatpush.msrb.mxu3 %v4884_v28  ;;  %v4876_v54 = vld [vmem:[%s8215_s7 + $0x310] sm:$0xff]  ;;  %3582 = vmatpush.msrb.mxu1 %v4862_v53  ;;  %v4854_v33 = vld [vmem:[%s8215_s7 + $0x260] sm:$0xff]  ;;  %v4855_v37 = vld [vmem:[%s8215_s7 + $0x268] sm:$0xff] }
 0x3db   : > { %v3332_v52 = vmax.f32 %v3330_v59, %v3331_v51  ;;  %v3348_v30 = vmax.f32 %v3346_v14, %v3347_v39  ;;  %v3364_v58 = vmax.f32 %v3362_v61, %v3363_v63  ;;  %v3380_v56 = vmax.f32 %v3378_v23, %v3379_v44  ;;  %3647 = vmatpush.msrb.mxu2 %v4885_v6  ;;  %v4877_v59 = vld [vmem:[%s8215_s7 + $0x318] sm:$0xff]  ;;  %v4874_v61 = vld [vmem:[%s8215_s7 + $0x300] sm:$0xff]  ;;  %v4875_v23 = vld [vmem:[%s8215_s7 + $0x308] sm:$0xff] }
 0x3dc   : > { %3608 = vmatpush.msrb.mxu3 %v4882_v5  ;;  %v4861_v14 = vld [vmem:[%s8215_s7 + $0x298] sm:$0xff]  ;;  %3622 = vmatpush.msrb.mxu0 %v4863_v9  ;;  %v3504_v39 = vld [vmem:[%s8215_s7 + $0x1f0] sm:$0xff]  ;;  %v3474_v28 = vld [vmem:[%s8215_s7 + $0x100] sm:$0xff] }
 0x3dd   : > { %v3389_v8 = vsel %vm1827_vm7, %v3332_v52, %v3348_v30  ;;  %3648 = vmatpush.msrb.mxu2 %v4883_v25  ;;  %3583 = vmatpush.msrb.mxu1 %v4860_v10  ;;  %v3505_v44 = vld [vmem:[%s8215_s7 + $0x1f8] sm:$0xff]  ;;  %v3502_v52 = vld [vmem:[%s8215_s7 + $0x1e0] sm:$0xff]  ;;  %v3503_v30 = vld [vmem:[%s8215_s7 + $0x1e8] sm:$0xff] }
 0x3de   : > { %v3391_v21 = vsel %vm1644_vm6, %v3389_v8, %v3364_v58  ;;  %3609 = vmatpush.msrb.mxu3 %v4880_v4  ;;  %3623 = vmatpush.msrb.mxu0 %v4861_v14  ;;  %v3500_v58 = vld [vmem:[%s8215_s7 + $0x1d0] sm:$0xff]  ;;  %v3498_v8 = vld [vmem:[%s8215_s7 + $0x1c0] sm:$0xff]  ;;  %v3477_v41 = vld [vmem:[%s8215_s7 + $0x118] sm:$0xff] }
 0x3df   : > { %v7012_v1 = vsel %vm1461_vm5, %v3391_v21, %v3380_v56  ;;  %3649 = vmatpush.msrb.mxu2 %v4881_v55  ;;  %v3501_v56 = vld [vmem:[%s8215_s7 + $0x1d8] sm:$0xff]  ;;  %v3499_v21 = vld [vmem:[%s8215_s7 + $0x1c8] sm:$0xff]  ;;  %v3476_v26 = vld [vmem:[%s8215_s7 + $0x110] sm:$0xff]  ;;  %vm3429_vm5 = vcmask 261120  }
 0x3e0   : > { %3396 = vrot.lane.b32.xlu1 %v7012_v1, %s5287_s30  ;;  %3610 = vmatpush.msrb.mxu3 %v4878_v62  ;;  %v4852_v43 = vld [vmem:[%s8215_s7 + $0x250] sm:$0xff]  ;;  %v4853_v11 = vld [vmem:[%s8215_s7 + $0x258] sm:$0xff]  ;;  %v3475_v6 = vld [vmem:[%s8215_s7 + $0x108] sm:$0xff] }
 0x3e1   : > { %3650 = vmatpush.msrb.mxu2 %v4879_v0  ;;  %v4850_v34 = vld [vmem:[%s8215_s7 + $0x240] sm:$0xff]  ;;  %v4851_v18 = vld [vmem:[%s8215_s7 + $0x248] sm:$0xff]  ;;  %v4848_v5 = vld [vmem:[%s8215_s7 + $0x230] sm:$0xff] }
 0x3e2   : > { %3611 = vmatpush.msrb.mxu3 %v4876_v54  ;;  %v4849_v25 = vld [vmem:[%s8215_s7 + $0x238] sm:$0xff]  ;;  %v4847_v24 = vld [vmem:[%s8215_s7 + $0x228] sm:$0xff]  ;;  %v4842_v55 = vld [vmem:[%s8215_s7 + $0x200] sm:$0xff] }
 0x3e3   : > { %3651 = vmatpush.msrb.mxu2 %v4877_v59  ;;  %v4845_v4 = vld [vmem:[%s8215_s7 + $0x218] sm:$0xff]  ;;  %v4843_v60 = vld [vmem:[%s8215_s7 + $0x208] sm:$0xff]  ;;  %v3472_v53 = vld [vmem:[%s8215_s7 + $0xf0] sm:$0xff] }
 0x3e4   : > { %3612 = vmatpush.msrb.mxu3 %v4874_v61  ;;  %v3473_v62 = vld [vmem:[%s8215_s7 + $0xf8] sm:$0xff]  ;;  %v3470_v0 = vld [vmem:[%s8215_s7 + $0xe0] sm:$0xff]  ;;  %v3471_v9 = vld [vmem:[%s8215_s7 + $0xe8] sm:$0xff] }
 0x3e5   : > { %3652 = vmatpush.msrb.mxu2 %v4875_v23  ;;  %v3468_v10 = vld [vmem:[%s8215_s7 + $0xd0] sm:$0xff]  ;;  %v3469_v54 = vld [vmem:[%s8215_s7 + $0xd8] sm:$0xff]  ;;  %v3466_v59 = vld [vmem:[%s8215_s7 + $0xc0] sm:$0xff] }
 0x3e6   : > { %3677 = vmatpush.msra.mxu3 %v3504_v39  ;;  %v3467_v14 = vld [vmem:[%s8215_s7 + $0xc8] sm:$0xff]  ;;  %v3464_v61 = vld [vmem:[%s8215_s7 + $0xb0] sm:$0xff]  ;;  %v3465_v23 = vld [vmem:[%s8215_s7 + $0xb8] sm:$0xff] }
 0x3e7   : > { %3717 = vmatpush.msra.mxu2 %v3505_v44  ;;  %v3463_v39 = vld [vmem:[%s8215_s7 + $0xa8] sm:$0xff]  ;;  %v3461_v44 = vld [vmem:[%s8215_s7 + $0x98] sm:$0xff] }
 0x3e8   : > { %3400 = vrot.lane.b32.xlu1 %v7012_v1, %s5288_s27  ;;  %3678 = vmatpush.msra.mxu3 %v3502_v52 }
 0x3e9   : > { %3718 = vmatpush.msra.mxu2 %v3503_v30 }
 0x3ea   : > { %3679 = vmatpush.msra.mxu3 %v3500_v58  ;;  %v3458_v58 = vld [vmem:[%s8215_s7 + $0x80] sm:$0xff] }
 0x3eb   : > { %3719 = vmatpush.msra.mxu2 %v3501_v56  ;;  %v3459_v56 = vld [vmem:[%s8215_s7 + $0x88] sm:$0xff] }
 0x3ec   : > { %3680 = vmatpush.msra.mxu3 %v3498_v8 }
 0x3ed   : > { %3720 = vmatpush.msra.mxu2 %v3499_v21 }
 0x3ef   : > { %3721 = vmatpush.msra.mxu2 %v3497_v42  ;;  %v3454_v42 = vld [vmem:[%s8215_s7 + $0x60] sm:$0xff] }
 0x3f1   : > { %3722 = vmatpush.msra.mxu2 %v3495_v15 }
 0x3f3   : > { %3723 = vmatpush.msra.mxu2 %v3493_v16  ;;  %v3452_v16 = vld [vmem:[%s8215_s7 + $0x50] sm:$0xff] }
 0x3f5   : > { %3724 = vmatpush.msra.mxu2 %v3491_v3 }
 0x3f7   : > { %3725 = vmatpush.msra.mxu2 %v3489_v47  ;;  %v4973_v47 = vld [vmem:[%s8215_s7 + $0x5f8] sm:$0xff] }
 0x3f9   : > { %3726 = vmatpush.msra.mxu2 %v3487_v20  ;;  %v4971_v20 = vld [vmem:[%s8215_s7 + $0x5e8] sm:$0xff] }
 0x440   : > { %v7036_v32 = vpop.permute.xlu0 %3405 }
 0x441   : > { %v3408_v31 = vmax.f32 %v7012_v1, %v7036_v32  ;;  %v3413_v52 = vmax.f32 %v7002_v57, %v7036_v32  ;;  %v3456_v57 = vld [vmem:[%s8215_s7 + $0x70] sm:$0xff]  ;;  %v3457_v32 = vld [vmem:[%s8215_s7 + $0x78] sm:$0xff] }
 0x448   : > { %v3410_v22 = vpop.permute.xlu0 %3409 }
 0x449   : > { %v3412_v19 = vmax.f32 %v3408_v31, %v3410_v22  ;;  %v3485_v31 = vld [vmem:[%s8215_s7 + $0x158] sm:$0xff]  ;;  %v4858_v22 = vld [vmem:[%s8215_s7 + $0x280] sm:$0xff] }
 0x44a   : > { %3727 = vmatpush.msra.mxu2 %v3485_v31  ;;  %3584 = vmatpush.msrb.mxu1 %v4858_v22  ;;  %v3451_v31 = vld [vmem:[%s8215_s7 + $0x48] sm:$0xff]  ;;  %v3448_v22 = vld [vmem:[%s8215_s7 + $0x30] sm:$0xff] }
 0x44b   : > { %3423 = vrot.lane.b32.xlu2 %v3412_v19, %s5289_s23  ;;  %v4859_v19 = vld [vmem:[%s8215_s7 + $0x288] sm:$0xff] }
 0x44c   : > { %3728 = vmatpush.msra.mxu2 %v3483_v2  ;;  %3624 = vmatpush.msrb.mxu0 %v4859_v19  ;;  %v4969_v2 = vld [vmem:[%s8215_s7 + $0x5d8] sm:$0xff] }
 0x44d   : > { %3585 = vmatpush.msrb.mxu1 %v4856_v49  ;;  %v3449_v19 = vld [vmem:[%s8215_s7 + $0x38] sm:$0xff]  ;;  %v3446_v49 = vld [vmem:[%s8215_s7 + $0x20] sm:$0xff] }
 0x44e   : > { %3729 = vmatpush.msra.mxu2 %v3481_v17  ;;  %3625 = vmatpush.msrb.mxu0 %v4857_v29  ;;  %v4967_v17 = vld [vmem:[%s8215_s7 + $0x5c8] sm:$0xff] }
 0x44f   : > { %3586 = vmatpush.msrb.mxu1 %v4854_v33  ;;  %v3447_v29 = vld [vmem:[%s8215_s7 + $0x28] sm:$0xff]  ;;  %v3444_v33 = vld [vmem:[%s8215_s7 + $0x10] sm:$0xff] }
 0x450   : > { %3730 = vmatpush.msra.mxu2 %v3479_v7  ;;  %3626 = vmatpush.msrb.mxu0 %v4855_v37  ;;  %v4965_v7 = vld [vmem:[%s8215_s7 + $0x5b8] sm:$0xff] }
 0x451   : > { %3587 = vmatpush.msrb.mxu1 %v4852_v43  ;;  %v3445_v37 = vld [vmem:[%s8215_s7 + $0x18] sm:$0xff]  ;;  %v3442_v43 = vld [vmem:[%s8215_s7] sm:$0xff] }
 0x452   : > { %v3397_v27 = vpop.permute.xlu1 %3396  ;;  %3731 = vmatpush.msra.mxu2 %v3477_v41  ;;  %3627 = vmatpush.msrb.mxu0 %v4853_v11  ;;  %v4963_v41 = vld [vmem:[%s8215_s7 + $0x5a8] sm:$0xff] }
 0x453   : > { %v3399_v36 = vmax.f32 %v7012_v1, %v3397_v27  ;;  %v3496_v1 = vld [vmem:[%s8215_s7 + $0x1b0] sm:$0xff]  ;;  %3588 = vmatpush.msrb.mxu1 %v4850_v34  ;;  %v4846_v27 = vld [vmem:[%s8215_s7 + $0x220] sm:$0xff]  ;;  %v3443_v11 = vld [vmem:[%s8215_s7 + $0x8] sm:$0xff] }
 0x454   : > { %3681 = vmatpush.msra.mxu3 %v3496_v1  ;;  %3732 = vmatpush.msra.mxu2 %v3475_v6  ;;  %v4961_v6 = vld [vmem:[%s8215_s7 + $0x598] sm:$0xff]  ;;  %v4958_v34 = vld [vmem:[%s8215_s7 + $0x580] sm:$0xff] }
 0x455   : > { %3415 = vrot.lane.b32.xlu2 %v3399_v36, %s5288_s27  ;;  %3628 = vmatpush.msrb.mxu0 %v4851_v18  ;;  %v4959_v18 = vld [vmem:[%s8215_s7 + $0x588] sm:$0xff] }
 0x456   : > { %3682 = vmatpush.msra.mxu3 %v3494_v35  ;;  %3589 = vmatpush.msrb.mxu1 %v4848_v5  ;;  %v3455_v35 = vld [vmem:[%s8215_s7 + $0x68] sm:$0xff]  ;;  %v4956_v5 = vld [vmem:[%s8215_s7 + $0x570] sm:$0xff] }
 0x457   : > { %3629 = vmatpush.msrb.mxu0 %v4849_v25  ;;  %v4957_v25 = vld [vmem:[%s8215_s7 + $0x578] sm:$0xff] }
 0x458   : > { %3683 = vmatpush.msra.mxu3 %v3492_v12  ;;  %3590 = vmatpush.msrb.mxu1 %v4846_v27  ;;  %v4954_v27 = vld [vmem:[%s8215_s7 + $0x560] sm:$0xff] }
 0x459   : > { %3630 = vmatpush.msrb.mxu0 %v4847_v24  ;;  %v4955_v24 = vld [vmem:[%s8215_s7 + $0x568] sm:$0xff] }
 0x45a   : > { %v3401_v51 = vpop.permute.xlu1 %3400  ;;  %3684 = vmatpush.msra.mxu3 %v3490_v40  ;;  %v3453_v40 = vld [vmem:[%s8215_s7 + $0x58] sm:$0xff] }
 0x45b   : > { %v3403_v63 = vmax.f32 %v3399_v36, %v3401_v51  ;;  %v4844_v36 = vld [vmem:[%s8215_s7 + $0x210] sm:$0xff]  ;;  %3631 = vmatpush.msrb.mxu0 %v4845_v4  ;;  %v3462_v51 = vld [vmem:[%s8215_s7 + $0xa0] sm:$0xff]  ;;  %v4953_v4 = vld [vmem:[%s8215_s7 + $0x558] sm:$0xff] }
 0x45c   : > { %3685 = vmatpush.msra.mxu3 %v3488_v38  ;;  %3591 = vmatpush.msrb.mxu1 %v4844_v36  ;;  %v4972_v38 = vld [vmem:[%s8215_s7 + $0x5f0] sm:$0xff] }
 0x45d   : > { %3419 = vrot.lane.b32.xlu0 %v3403_v63, %s5288_s27  ;;  %3632 = vmatpush.msrb.mxu0 %v4843_v60  ;;  %v3460_v63 = vld [vmem:[%s8215_s7 + $0x90] sm:$0xff]  ;;  %v4951_v60 = vld [vmem:[%s8215_s7 + $0x548] sm:$0xff] }
 0x45e   : > { %3686 = vmatpush.msra.mxu3 %v3486_v45  ;;  %3592 = vmatpush.msrb.mxu1 %v4842_v55  ;;  %v4970_v45 = vld [vmem:[%s8215_s7 + $0x5e0] sm:$0xff]  ;;  %v4952_v36 = vld [vmem:[%s8215_s7 + $0x550] sm:$0xff] }
 0x45f   : > { %3697 = vmatpush.msra.mxu0 %v3473_v62  ;;  %v4950_v55 = vld [vmem:[%s8215_s7 + $0x540] sm:$0xff]  ;;  %v4949_v62 = vld [vmem:[%s8215_s7 + $0x538] sm:$0xff] }
 0x460   : > { %3687 = vmatpush.msra.mxu3 %v3484_v46  ;;  %3657 = vmatpush.msra.mxu1 %v3472_v53  ;;  %v3450_v46 = vld [vmem:[%s8215_s7 + $0x40] sm:$0xff]  ;;  %v4948_v53 = vld [vmem:[%s8215_s7 + $0x530] sm:$0xff] }
 0x461   : > { %3698 = vmatpush.msra.mxu0 %v3471_v9  ;;  %v4947_v9 = vld [vmem:[%s8215_s7 + $0x528] sm:$0xff] }
 0x462   : > { %3688 = vmatpush.msra.mxu3 %v3482_v50  ;;  %3658 = vmatpush.msra.mxu1 %v3470_v0  ;;  %v4968_v50 = vld [vmem:[%s8215_s7 + $0x5d0] sm:$0xff]  ;;  %v4946_v0 = vld [vmem:[%s8215_s7 + $0x520] sm:$0xff] }
 0x463   : > { %3699 = vmatpush.msra.mxu0 %v3469_v54  ;;  %v4945_v54 = vld [vmem:[%s8215_s7 + $0x518] sm:$0xff] }
 0x464   : > { %3689 = vmatpush.msra.mxu3 %v3480_v13  ;;  %3659 = vmatpush.msra.mxu1 %v3468_v10  ;;  %v4966_v13 = vld [vmem:[%s8215_s7 + $0x5c0] sm:$0xff]  ;;  %v4944_v10 = vld [vmem:[%s8215_s7 + $0x510] sm:$0xff] }
 0x465   : > { %3700 = vmatpush.msra.mxu0 %v3467_v14  ;;  %v4943_v14 = vld [vmem:[%s8215_s7 + $0x508] sm:$0xff] }
 0x466   : > { %3690 = vmatpush.msra.mxu3 %v3478_v48  ;;  %3660 = vmatpush.msra.mxu1 %v3466_v59  ;;  %v4964_v48 = vld [vmem:[%s8215_s7 + $0x5b0] sm:$0xff]  ;;  %v4942_v59 = vld [vmem:[%s8215_s7 + $0x500] sm:$0xff] }
 0x467   : > { %3701 = vmatpush.msra.mxu0 %v3465_v23 }
 0x468   : > { %3691 = vmatpush.msra.mxu3 %v3476_v26  ;;  %3661 = vmatpush.msra.mxu1 %v3464_v61  ;;  %v4962_v26 = vld [vmem:[%s8215_s7 + $0x5a0] sm:$0xff] }
 0x469   : > { %3702 = vmatpush.msra.mxu0 %v3463_v39  ;;  %v5037_v39 = vld [vmem:[%s8215_s7 + $0x7f8] sm:$0xff] }
 0x46a   : > { %3692 = vmatpush.msra.mxu3 %v3474_v28  ;;  %3662 = vmatpush.msra.mxu1 %v3462_v51  ;;  %v4960_v28 = vld [vmem:[%s8215_s7 + $0x590] sm:$0xff] }
 0x46b   : > { %3703 = vmatpush.msra.mxu0 %v3461_v44  ;;  %v5036_v51 = vld [vmem:[%s8215_s7 + $0x7f0] sm:$0xff]  ;;  %v5035_v44 = vld [vmem:[%s8215_s7 + $0x7e8] sm:$0xff] }
 0x46c   : > { %3663 = vmatpush.msra.mxu1 %v3460_v63  ;;  %v5034_v63 = vld [vmem:[%s8215_s7 + $0x7e0] sm:$0xff] }
 0x46d   : > { %3704 = vmatpush.msra.mxu0 %v3459_v56  ;;  %v5032_v56 = vld [vmem:[%s8215_s7 + $0x7d0] sm:$0xff] }
 0x46e   : > { %3664 = vmatpush.msra.mxu1 %v3458_v58 }
 0x46f   : > { %3705 = vmatpush.msra.mxu0 %v3457_v32  ;;  %v5031_v32 = vld [vmem:[%s8215_s7 + $0x7c8] sm:$0xff] }
 0x470   : > { %3665 = vmatpush.msra.mxu1 %v3456_v57  ;;  %v5030_v57 = vld [vmem:[%s8215_s7 + $0x7c0] sm:$0xff] }
 0x471   : > { %3706 = vmatpush.msra.mxu0 %v3455_v35  ;;  %v5028_v35 = vld [vmem:[%s8215_s7 + $0x7b0] sm:$0xff] }
 0x472   : > { %3666 = vmatpush.msra.mxu1 %v3454_v42 }
 0x473   : > { %3707 = vmatpush.msra.mxu0 %v3453_v40  ;;  %v4940_v40 = vld [vmem:[%s8215_s7 + $0x4f0] sm:$0xff] }
 0x474   : > { %3667 = vmatpush.msra.mxu1 %v3452_v16 }
 0x475   : > { %3708 = vmatpush.msra.mxu0 %v3451_v31  ;;  %v5025_v31 = vld [vmem:[%s8215_s7 + $0x798] sm:$0xff] }
 0x476   : > { %3668 = vmatpush.msra.mxu1 %v3450_v46  ;;  %v5024_v46 = vld [vmem:[%s8215_s7 + $0x790] sm:$0xff] }
 0x477   : > { %3709 = vmatpush.msra.mxu0 %v3449_v19  ;;  %v5023_v19 = vld [vmem:[%s8215_s7 + $0x788] sm:$0xff] }
 0x478   : > { %3669 = vmatpush.msra.mxu1 %v3448_v22  ;;  %v5022_v22 = vld [vmem:[%s8215_s7 + $0x780] sm:$0xff] }
 0x479   : > { %3710 = vmatpush.msra.mxu0 %v3447_v29  ;;  %v5021_v29 = vld [vmem:[%s8215_s7 + $0x778] sm:$0xff] }
 0x47a   : > { %3670 = vmatpush.msra.mxu1 %v3446_v49  ;;  %v5020_v49 = vld [vmem:[%s8215_s7 + $0x770] sm:$0xff] }
 0x47b   : > { %3711 = vmatpush.msra.mxu0 %v3445_v37  ;;  %v5019_v37 = vld [vmem:[%s8215_s7 + $0x768] sm:$0xff] }
 0x47c   : > { %3671 = vmatpush.msra.mxu1 %v3444_v33  ;;  %v5018_v33 = vld [vmem:[%s8215_s7 + $0x760] sm:$0xff] }
 0x47d   : > { %3712 = vmatpush.msra.mxu0 %v3443_v11  ;;  %v5017_v11 = vld [vmem:[%s8215_s7 + $0x758] sm:$0xff] }
 0x47e   : > { %3672 = vmatpush.msra.mxu1 %v3442_v43  ;;  %v5016_v43 = vld [vmem:[%s8215_s7 + $0x750] sm:$0xff] }
 0x4a5   : > { %v3424_v30 = vpop.permute.xlu2 %3423 }
 0x4a6   : > { %v3430_v8 = vsel %vm3429_vm5, %v3424_v30, %v3413_v52 }
 0x4a7   : > { %v3431_v21 = vsel %vm2585_vm1, %v3430_v8, 0.0  ;;  %v5033_v8 = vld [vmem:[%s8215_s7 + $0x7d8] sm:$0xff] }
 0x4a8   : > { %v3435_v1 = vrot.slane %v3431_v21, 6 }
 0x4aa   : > { %v3439_v15 = vsel %vm1644_vm6, 0.0, %v3435_v1 }
 0x4ab   : > { %v7379_v12 = vsel %vm916_vm3, %v3439_v15, 0.0 }
 0x4ac   : > { %v3574_v3 = vrot.slane %v7379_v12, 1  ;;  %v3803_v61 = vrot.slane %v7379_v12, 2 }
 0x4ae   : > { %3613 = vmatmul.f32.vlgmr.msrb.gmra.mxu3 %v3574_v3  ;;  %3653 = vmatmul.f32.vlgmr.msrb.gmra.mxu2 %v3574_v3  ;;  %v4941_v3 = vld [vmem:[%s8215_s7 + $0x4f8] sm:$0xff] }
 0x4af   : > { %3826 = vmatpush.msrb.mxu3 %v4972_v38  ;;  %3866 = vmatpush.msrb.mxu2 %v4973_v47  ;;  %v3416_v23 = vpop.permute.xlu2 %3415  ;;  %v5026_v38 = vld [vmem:[%s8215_s7 + $0x7a0] sm:$0xff]  ;;  %v5027_v47 = vld [vmem:[%s8215_s7 + $0x7a8] sm:$0xff] }
 0x4b0   : > { %v3426_v52 = vsel %vm2585_vm1, 0.0, %v3416_v23  ;;  %v5100_v23 = vld [vmem:[%s8215_s7 + $0x9f0] sm:$0xff] }
 0x4b1   : > { %3827 = vmatpush.msrb.mxu3 %v4970_v45  ;;  %3867 = vmatpush.msrb.mxu2 %v4971_v20  ;;  %v4938_v45 = vld [vmem:[%s8215_s7 + $0x4e0] sm:$0xff]  ;;  %v4939_v20 = vld [vmem:[%s8215_s7 + $0x4e8] sm:$0xff] }
 0x4b3   : > { %3828 = vmatpush.msrb.mxu3 %v4968_v50  ;;  %3868 = vmatpush.msrb.mxu2 %v4969_v2  ;;  %v4936_v50 = vld [vmem:[%s8215_s7 + $0x4d0] sm:$0xff]  ;;  %v4937_v2 = vld [vmem:[%s8215_s7 + $0x4d8] sm:$0xff] }
 0x4b5   : > { %3829 = vmatpush.msrb.mxu3 %v4966_v13  ;;  %3869 = vmatpush.msrb.mxu2 %v4967_v17  ;;  %v4934_v13 = vld [vmem:[%s8215_s7 + $0x4c0] sm:$0xff]  ;;  %v4935_v17 = vld [vmem:[%s8215_s7 + $0x4c8] sm:$0xff] }
 0x4b6   : > { %4907 = vmatmul.msk.f32.vlgmr.msra.gmra.mxu3 %vm916_vm3, %v3439_v15  ;;  %4909 = vmatmul.msk.f32.vlgmr.msra.gmra.mxu2 %vm916_vm3, %v3439_v15  ;;  %v5029_v15 = vld [vmem:[%s8215_s7 + $0x7b8] sm:$0xff] }
 0x4b7   : > { %3830 = vmatpush.msrb.mxu3 %v4964_v48  ;;  %3870 = vmatpush.msrb.mxu2 %v4965_v7  ;;  %v4932_v48 = vld [vmem:[%s8215_s7 + $0x4b0] sm:$0xff]  ;;  %v4933_v7 = vld [vmem:[%s8215_s7 + $0x4b8] sm:$0xff] }
 0x4b9   : > { %3831 = vmatpush.msrb.mxu3 %v4962_v26  ;;  %3871 = vmatpush.msrb.mxu2 %v4963_v41  ;;  %v4930_v26 = vld [vmem:[%s8215_s7 + $0x4a0] sm:$0xff]  ;;  %v4931_v41 = vld [vmem:[%s8215_s7 + $0x4a8] sm:$0xff] }
 0x4bb   : > { %3832 = vmatpush.msrb.mxu3 %v4960_v28  ;;  %3872 = vmatpush.msrb.mxu2 %v4961_v6  ;;  %v4928_v28 = vld [vmem:[%s8215_s7 + $0x490] sm:$0xff]  ;;  %v4929_v6 = vld [vmem:[%s8215_s7 + $0x498] sm:$0xff] }
 0x4bd   : > { %3833 = vmatpush.msrb.mxu3 %v4958_v34  ;;  %3873 = vmatpush.msrb.mxu2 %v4959_v18  ;;  %v5014_v34 = vld [vmem:[%s8215_s7 + $0x740] sm:$0xff]  ;;  %v5015_v18 = vld [vmem:[%s8215_s7 + $0x748] sm:$0xff] }
 0x4bf   : > { %3834 = vmatpush.msrb.mxu3 %v4956_v5  ;;  %3874 = vmatpush.msrb.mxu2 %v4957_v25  ;;  %v4926_v5 = vld [vmem:[%s8215_s7 + $0x480] sm:$0xff]  ;;  %v4927_v25 = vld [vmem:[%s8215_s7 + $0x488] sm:$0xff] }
 0x4c1   : > { %3835 = vmatpush.msrb.mxu3 %v4954_v27  ;;  %3875 = vmatpush.msrb.mxu2 %v4955_v24  ;;  %v5012_v27 = vld [vmem:[%s8215_s7 + $0x730] sm:$0xff]  ;;  %v5013_v24 = vld [vmem:[%s8215_s7 + $0x738] sm:$0xff] }
 0x4c3   : > { %3836 = vmatpush.msrb.mxu3 %v4952_v36  ;;  %3876 = vmatpush.msrb.mxu2 %v4953_v4  ;;  %v4924_v36 = vld [vmem:[%s8215_s7 + $0x470] sm:$0xff]  ;;  %v4925_v4 = vld [vmem:[%s8215_s7 + $0x478] sm:$0xff] }
 0x4c5   : > { %3837 = vmatpush.msrb.mxu3 %v4950_v55  ;;  %3877 = vmatpush.msrb.mxu2 %v4951_v60  ;;  %v5010_v55 = vld [vmem:[%s8215_s7 + $0x720] sm:$0xff]  ;;  %v5011_v60 = vld [vmem:[%s8215_s7 + $0x728] sm:$0xff] }
 0x4c7   : > { %3838 = vmatpush.msrb.mxu3 %v4948_v53  ;;  %3878 = vmatpush.msrb.mxu2 %v4949_v62  ;;  %v4922_v53 = vld [vmem:[%s8215_s7 + $0x460] sm:$0xff]  ;;  %v4923_v62 = vld [vmem:[%s8215_s7 + $0x468] sm:$0xff] }
 0x4c9   : > { %3839 = vmatpush.msrb.mxu3 %v4946_v0  ;;  %3879 = vmatpush.msrb.mxu2 %v4947_v9  ;;  %v5008_v0 = vld [vmem:[%s8215_s7 + $0x710] sm:$0xff]  ;;  %v5009_v9 = vld [vmem:[%s8215_s7 + $0x718] sm:$0xff] }
 0x4cb   : > { %3840 = vmatpush.msrb.mxu3 %v4944_v10  ;;  %3880 = vmatpush.msrb.mxu2 %v4945_v54  ;;  %v4920_v10 = vld [vmem:[%s8215_s7 + $0x450] sm:$0xff]  ;;  %v4921_v54 = vld [vmem:[%s8215_s7 + $0x458] sm:$0xff] }
 0x4cd   : > { %3841 = vmatpush.msrb.mxu3 %v4942_v59  ;;  %3881 = vmatpush.msrb.mxu2 %v4943_v14  ;;  %v5006_v59 = vld [vmem:[%s8215_s7 + $0x700] sm:$0xff]  ;;  %v5007_v14 = vld [vmem:[%s8215_s7 + $0x708] sm:$0xff] }
 0x4ce   : > { %3842 = vmatmul.f32.vlgmr.msrb.gmra.mxu3 %v3803_v61  ;;  %3882 = vmatmul.f32.vlgmr.msrb.gmra.mxu2 %v3803_v61  ;;  %v3954_v61 = vrot.slane %v7379_v12, 3 }
 0x4cf   : > { %3977 = vmatpush.msra.mxu3 %v5036_v51  ;;  %4017 = vmatpush.msra.mxu2 %v5037_v39  ;;  %v3420_v30 = vpop.permute.xlu0 %3419  ;;  %v5101_v51 = vld [vmem:[%s8215_s7 + $0x9f8] sm:$0xff]  ;;  %v4918_v39 = vld [vmem:[%s8215_s7 + $0x440] sm:$0xff] }
 0x4d0   : > { %v3428_v58 = vsel %vm3427_vm14, %v3426_v52, %v3420_v30  ;;  %v5099_v52 = vld [vmem:[%s8215_s7 + $0x9e8] sm:$0xff]  ;;  %v4916_v30 = vld [vmem:[%s8215_s7 + $0x430] sm:$0xff] }
 0x4d1   : > { %v3434_v21 = vrot.slane %v3428_v58, 6  ;;  %3978 = vmatpush.msra.mxu3 %v5034_v63  ;;  %4018 = vmatpush.msra.mxu2 %v5035_v44  ;;  %v4919_v63 = vld [vmem:[%s8215_s7 + $0x448] sm:$0xff]  ;;  %v5098_v44 = vld [vmem:[%s8215_s7 + $0x9e0] sm:$0xff]  ;;  %v4917_v58 = vld [vmem:[%s8215_s7 + $0x438] sm:$0xff] }
 0x4d3   : > { %v3438_v1 = vsel %vm1644_vm6, 0.0, %v3434_v21  ;;  %3979 = vmatpush.msra.mxu3 %v5032_v56  ;;  %4019 = vmatpush.msra.mxu2 %v5033_v8  ;;  %v5096_v56 = vld [vmem:[%s8215_s7 + $0x9d0] sm:$0xff]  ;;  %v5097_v8 = vld [vmem:[%s8215_s7 + $0x9d8] sm:$0xff]  ;;  %v4914_v21 = vld [vmem:[%s8215_s7 + $0x420] sm:$0xff] }
 0x4d4   : > { %v7544_v42 = vsel %vm916_vm3, %v3438_v1, 0.0 }
 0x4d5   : > { %v3573_v16 = vrot.slane %v7544_v42, 1  ;;  %3980 = vmatpush.msra.mxu3 %v5030_v57  ;;  %4020 = vmatpush.msra.mxu2 %v5031_v32  ;;  %v4915_v57 = vld [vmem:[%s8215_s7 + $0x428] sm:$0xff]  ;;  %v5094_v32 = vld [vmem:[%s8215_s7 + $0x9c0] sm:$0xff] }
 0x4d7   : > { %3981 = vmatpush.msra.mxu3 %v5028_v35  ;;  %4021 = vmatpush.msra.mxu2 %v5029_v15  ;;  %v4912_v35 = vld [vmem:[%s8215_s7 + $0x410] sm:$0xff]  ;;  %v4913_v15 = vld [vmem:[%s8215_s7 + $0x418] sm:$0xff] }
 0x4d8   : > { %3593 = vmatmul.f32.vlgmr.msrb.gmra.mxu1 %v3573_v16  ;;  %3633 = vmatmul.f32.vlgmr.msrb.gmra.mxu0 %v3573_v16  ;;  %v5092_v16 = vld [vmem:[%s8215_s7 + $0x9b0] sm:$0xff] }
 0x4d9   : > { %3806 = vmatpush.msrb.mxu1 %v4940_v40  ;;  %3846 = vmatpush.msrb.mxu0 %v4941_v3  ;;  %v5093_v40 = vld [vmem:[%s8215_s7 + $0x9b8] sm:$0xff]  ;;  %v4910_v3 = vld [vmem:[%s8215_s7 + $0x400] sm:$0xff] }
 0x4da   : > { %3982 = vmatpush.msra.mxu3 %v5026_v38  ;;  %4022 = vmatpush.msra.mxu2 %v5027_v47  ;;  %v4911_v38 = vld [vmem:[%s8215_s7 + $0x408] sm:$0xff]  ;;  %v3802_v47 = vrot.slane %v7544_v42, 2 }
 0x4db   : > { %3807 = vmatpush.msrb.mxu1 %v4938_v45  ;;  %3847 = vmatpush.msrb.mxu0 %v4939_v20  ;;  %v5004_v45 = vld [vmem:[%s8215_s7 + $0x6f0] sm:$0xff]  ;;  %v5005_v20 = vld [vmem:[%s8215_s7 + $0x6f8] sm:$0xff] }
 0x4dc   : > { %3983 = vmatpush.msra.mxu3 %v5024_v46  ;;  %4023 = vmatpush.msra.mxu2 %v5025_v31  ;;  %v5090_v46 = vld [vmem:[%s8215_s7 + $0x9a0] sm:$0xff]  ;;  %v5091_v31 = vld [vmem:[%s8215_s7 + $0x9a8] sm:$0xff] }
 0x4dd   : > { %3808 = vmatpush.msrb.mxu1 %v4936_v50  ;;  %3848 = vmatpush.msrb.mxu0 %v4937_v2  ;;  %v5002_v50 = vld [vmem:[%s8215_s7 + $0x6e0] sm:$0xff]  ;;  %v5003_v2 = vld [vmem:[%s8215_s7 + $0x6e8] sm:$0xff] }
 0x4de   : > { %3984 = vmatpush.msra.mxu3 %v5022_v22  ;;  %4024 = vmatpush.msra.mxu2 %v5023_v19  ;;  %v5088_v22 = vld [vmem:[%s8215_s7 + $0x990] sm:$0xff]  ;;  %v5089_v19 = vld [vmem:[%s8215_s7 + $0x998] sm:$0xff] }
 0x4df   : > { %3809 = vmatpush.msrb.mxu1 %v4934_v13  ;;  %3849 = vmatpush.msrb.mxu0 %v4935_v17  ;;  %v5000_v13 = vld [vmem:[%s8215_s7 + $0x6d0] sm:$0xff]  ;;  %v5001_v17 = vld [vmem:[%s8215_s7 + $0x6d8] sm:$0xff] }
 0x4e0   : > { %3985 = vmatpush.msra.mxu3 %v5020_v49  ;;  %4025 = vmatpush.msra.mxu2 %v5021_v29  ;;  %v5086_v49 = vld [vmem:[%s8215_s7 + $0x980] sm:$0xff]  ;;  %v5087_v29 = vld [vmem:[%s8215_s7 + $0x988] sm:$0xff] }
 0x4e1   : > { %4906 = vmatmul.msk.f32.vlgmr.msra.gmra.mxu1 %vm916_vm3, %v3438_v1  ;;  %4908 = vmatmul.msk.f32.vlgmr.msra.gmra.mxu0 %vm916_vm3, %v3438_v1  ;;  %v5095_v1 = vld [vmem:[%s8215_s7 + $0x9c8] sm:$0xff]  ;;  %vm4218_vm3 = vcmask 1043458  }
 0x4e2   : > { %3810 = vmatpush.msrb.mxu1 %v4932_v48  ;;  %3850 = vmatpush.msrb.mxu0 %v4933_v7  ;;  %v4998_v48 = vld [vmem:[%s8215_s7 + $0x6c0] sm:$0xff]  ;;  %v4999_v7 = vld [vmem:[%s8215_s7 + $0x6c8] sm:$0xff] }
 0x4e3   : > { %3986 = vmatpush.msra.mxu3 %v5018_v33  ;;  %4026 = vmatpush.msra.mxu2 %v5019_v37  ;;  %v5084_v33 = vld [vmem:[%s8215_s7 + $0x970] sm:$0xff]  ;;  %v5085_v37 = vld [vmem:[%s8215_s7 + $0x978] sm:$0xff] }
 0x4e4   : > { %3811 = vmatpush.msrb.mxu1 %v4930_v26  ;;  %3851 = vmatpush.msrb.mxu0 %v4931_v41  ;;  %v4996_v26 = vld [vmem:[%s8215_s7 + $0x6b0] sm:$0xff]  ;;  %v4997_v41 = vld [vmem:[%s8215_s7 + $0x6b8] sm:$0xff] }
 0x4e5   : > { %3987 = vmatpush.msra.mxu3 %v5016_v43  ;;  %4027 = vmatpush.msra.mxu2 %v5017_v11  ;;  %v5082_v43 = vld [vmem:[%s8215_s7 + $0x960] sm:$0xff]  ;;  %v5083_v11 = vld [vmem:[%s8215_s7 + $0x968] sm:$0xff] }
 0x4e6   : > { %3812 = vmatpush.msrb.mxu1 %v4928_v28  ;;  %3852 = vmatpush.msrb.mxu0 %v4929_v6  ;;  %v4994_v28 = vld [vmem:[%s8215_s7 + $0x6a0] sm:$0xff]  ;;  %v4995_v6 = vld [vmem:[%s8215_s7 + $0x6a8] sm:$0xff] }
 0x4e7   : > { %3988 = vmatpush.msra.mxu3 %v5014_v34  ;;  %4028 = vmatpush.msra.mxu2 %v5015_v18  ;;  %v5080_v34 = vld [vmem:[%s8215_s7 + $0x950] sm:$0xff]  ;;  %v5081_v18 = vld [vmem:[%s8215_s7 + $0x958] sm:$0xff] }
 0x4e8   : > { %3813 = vmatpush.msrb.mxu1 %v4926_v5  ;;  %3853 = vmatpush.msrb.mxu0 %v4927_v25  ;;  %v4992_v5 = vld [vmem:[%s8215_s7 + $0x690] sm:$0xff]  ;;  %v4993_v25 = vld [vmem:[%s8215_s7 + $0x698] sm:$0xff] }
 0x4e9   : > { %3989 = vmatpush.msra.mxu3 %v5012_v27  ;;  %4029 = vmatpush.msra.mxu2 %v5013_v24  ;;  %v5078_v27 = vld [vmem:[%s8215_s7 + $0x940] sm:$0xff]  ;;  %v5079_v24 = vld [vmem:[%s8215_s7 + $0x948] sm:$0xff] }
 0x4ea   : > { %3814 = vmatpush.msrb.mxu1 %v4924_v36  ;;  %3854 = vmatpush.msrb.mxu0 %v4925_v4  ;;  %v4990_v36 = vld [vmem:[%s8215_s7 + $0x680] sm:$0xff]  ;;  %v4991_v4 = vld [vmem:[%s8215_s7 + $0x688] sm:$0xff] }
 0x4eb   : > { %3990 = vmatpush.msra.mxu3 %v5010_v55  ;;  %4030 = vmatpush.msra.mxu2 %v5011_v60  ;;  %v5076_v55 = vld [vmem:[%s8215_s7 + $0x930] sm:$0xff]  ;;  %v5077_v60 = vld [vmem:[%s8215_s7 + $0x938] sm:$0xff] }
 0x4ec   : > { %3815 = vmatpush.msrb.mxu1 %v4922_v53  ;;  %3855 = vmatpush.msrb.mxu0 %v4923_v62  ;;  %v4988_v53 = vld [vmem:[%s8215_s7 + $0x670] sm:$0xff]  ;;  %v4989_v62 = vld [vmem:[%s8215_s7 + $0x678] sm:$0xff] }
 0x4ed   : > { %3991 = vmatpush.msra.mxu3 %v5008_v0  ;;  %4031 = vmatpush.msra.mxu2 %v5009_v9  ;;  %v5074_v0 = vld [vmem:[%s8215_s7 + $0x920] sm:$0xff]  ;;  %v5075_v9 = vld [vmem:[%s8215_s7 + $0x928] sm:$0xff] }
 0x4ee   : > { %3816 = vmatpush.msrb.mxu1 %v4920_v10  ;;  %3856 = vmatpush.msrb.mxu0 %v4921_v54  ;;  %v4986_v10 = vld [vmem:[%s8215_s7 + $0x660] sm:$0xff]  ;;  %v4987_v54 = vld [vmem:[%s8215_s7 + $0x668] sm:$0xff] }
 0x4ef   : > { %3992 = vmatpush.msra.mxu3 %v5006_v59  ;;  %4032 = vmatpush.msra.mxu2 %v5007_v14  ;;  %v5072_v59 = vld [vmem:[%s8215_s7 + $0x910] sm:$0xff]  ;;  %v5073_v14 = vld [vmem:[%s8215_s7 + $0x918] sm:$0xff] }
 0x4f0   : > { %3993 = vmatmul.f32.vlgmr.msra.gmra.mxu3 %v3954_v61  ;;  %4033 = vmatmul.f32.vlgmr.msra.gmra.mxu2 %v3954_v61  ;;  %v4984_v61 = vld [vmem:[%s8215_s7 + $0x650] sm:$0xff] }
 0x4f1   : > { %4128 = vmatpush.msrb.mxu3 %v5100_v23  ;;  %4168 = vmatpush.msrb.mxu2 %v5101_v51  ;;  %v4985_v23 = vld [vmem:[%s8215_s7 + $0x658] sm:$0xff]  ;;  %v5070_v51 = vld [vmem:[%s8215_s7 + $0x900] sm:$0xff] }
 0x4f2   : > { %3817 = vmatpush.msrb.mxu1 %v4918_v39  ;;  %3857 = vmatpush.msrb.mxu0 %v4919_v63  ;;  %v5071_v39 = vld [vmem:[%s8215_s7 + $0x908] sm:$0xff]  ;;  %v4105_v63 = vrot.slane %v7379_v12, 4  ;;  %v4981_v12 = vld [vmem:[%s8215_s7 + $0x638] sm:$0xff] }
 0x4f3   : > { %4129 = vmatpush.msrb.mxu3 %v5098_v44  ;;  %4169 = vmatpush.msrb.mxu2 %v5099_v52  ;;  %v4982_v44 = vld [vmem:[%s8215_s7 + $0x640] sm:$0xff]  ;;  %v4983_v52 = vld [vmem:[%s8215_s7 + $0x648] sm:$0xff] }
 0x4f4   : > { %3818 = vmatpush.msrb.mxu1 %v4916_v30  ;;  %3858 = vmatpush.msrb.mxu0 %v4917_v58  ;;  %v4980_v30 = vld [vmem:[%s8215_s7 + $0x630] sm:$0xff]  ;;  %v4978_v58 = vld [vmem:[%s8215_s7 + $0x620] sm:$0xff] }
 0x4f5   : > { %4130 = vmatpush.msrb.mxu3 %v5096_v56  ;;  %4170 = vmatpush.msrb.mxu2 %v5097_v8  ;;  %v4979_v56 = vld [vmem:[%s8215_s7 + $0x628] sm:$0xff]  ;;  %v4976_v8 = vld [vmem:[%s8215_s7 + $0x610] sm:$0xff] }
 0x4f6   : > { %3819 = vmatpush.msrb.mxu1 %v4914_v21  ;;  %3859 = vmatpush.msrb.mxu0 %v4915_v57  ;;  %v4977_v21 = vld [vmem:[%s8215_s7 + $0x618] sm:$0xff]  ;;  %v4974_v57 = vld [vmem:[%s8215_s7 + $0x600] sm:$0xff] }
 0x4f7   : > { %4131 = vmatpush.msrb.mxu3 %v5094_v32  ;;  %4171 = vmatpush.msrb.mxu2 %v5095_v1  ;;  %v4975_v32 = vld [vmem:[%s8215_s7 + $0x608] sm:$0xff]  ;;  %v3953_v1 = vrot.slane %v7544_v42, 3 }
 0x4f8   : > { %3820 = vmatpush.msrb.mxu1 %v4912_v35  ;;  %3860 = vmatpush.msrb.mxu0 %v4913_v15  ;;  %v5068_v35 = vld [vmem:[%s8215_s7 + $0x8f0] sm:$0xff]  ;;  %v5069_v15 = vld [vmem:[%s8215_s7 + $0x8f8] sm:$0xff] }
 0x4f9   : > { %4132 = vmatpush.msrb.mxu3 %v5092_v16  ;;  %4172 = vmatpush.msrb.mxu2 %v5093_v40  ;;  %v5066_v16 = vld [vmem:[%s8215_s7 + $0x8e0] sm:$0xff]  ;;  %v5067_v40 = vld [vmem:[%s8215_s7 + $0x8e8] sm:$0xff] }
 0x4fa   : > { %3821 = vmatpush.msrb.mxu1 %v4910_v3  ;;  %3861 = vmatpush.msrb.mxu0 %v4911_v38  ;;  %v5064_v3 = vld [vmem:[%s8215_s7 + $0x8d0] sm:$0xff]  ;;  %v5065_v38 = vld [vmem:[%s8215_s7 + $0x8d8] sm:$0xff] }
 0x4fb   : > { %3822 = vmatmul.f32.vlgmr.msrb.gmra.mxu1 %v3802_v47  ;;  %3862 = vmatmul.f32.vlgmr.msrb.gmra.mxu0 %v3802_v47  ;;  %v5062_v47 = vld [vmem:[%s8215_s7 + $0x8c0] sm:$0xff] }
 0x4fc   : > { %3957 = vmatpush.msra.mxu1 %v5004_v45  ;;  %3997 = vmatpush.msra.mxu0 %v5005_v20  ;;  %v5063_v45 = vld [vmem:[%s8215_s7 + $0x8c8] sm:$0xff]  ;;  %v5060_v20 = vld [vmem:[%s8215_s7 + $0x8b0] sm:$0xff] }
 0x4fd   : > { %4133 = vmatpush.msrb.mxu3 %v5090_v46  ;;  %4173 = vmatpush.msrb.mxu2 %v5091_v31  ;;  %v5061_v46 = vld [vmem:[%s8215_s7 + $0x8b8] sm:$0xff]  ;;  %v5058_v31 = vld [vmem:[%s8215_s7 + $0x8a0] sm:$0xff] }
 0x4fe   : > { %3958 = vmatpush.msra.mxu1 %v5002_v50  ;;  %3998 = vmatpush.msra.mxu0 %v5003_v2  ;;  %v5059_v50 = vld [vmem:[%s8215_s7 + $0x8a8] sm:$0xff]  ;;  %v5056_v2 = vld [vmem:[%s8215_s7 + $0x890] sm:$0xff] }
 0x4ff   : > { %4134 = vmatpush.msrb.mxu3 %v5088_v22  ;;  %4174 = vmatpush.msrb.mxu2 %v5089_v19  ;;  %v5057_v22 = vld [vmem:[%s8215_s7 + $0x898] sm:$0xff]  ;;  %v5054_v19 = vld [vmem:[%s8215_s7 + $0x880] sm:$0xff] }
 0x500   : > { %3959 = vmatpush.msra.mxu1 %v5000_v13  ;;  %3999 = vmatpush.msra.mxu0 %v5001_v17  ;;  %v5055_v13 = vld [vmem:[%s8215_s7 + $0x888] sm:$0xff]  ;;  %v5052_v17 = vld [vmem:[%s8215_s7 + $0x870] sm:$0xff] }
 0x501   : > { %4135 = vmatpush.msrb.mxu3 %v5086_v49  ;;  %4175 = vmatpush.msrb.mxu2 %v5087_v29  ;;  %v5053_v49 = vld [vmem:[%s8215_s7 + $0x878] sm:$0xff]  ;;  %v5050_v29 = vld [vmem:[%s8215_s7 + $0x860] sm:$0xff] }
 0x502   : > { %3960 = vmatpush.msra.mxu1 %v4998_v48  ;;  %4000 = vmatpush.msra.mxu0 %v4999_v7  ;;  %v5051_v48 = vld [vmem:[%s8215_s7 + $0x868] sm:$0xff]  ;;  %v5048_v7 = vld [vmem:[%s8215_s7 + $0x850] sm:$0xff] }
 0x503   : > { %4136 = vmatpush.msrb.mxu3 %v5084_v33  ;;  %4176 = vmatpush.msrb.mxu2 %v5085_v37  ;;  %v5049_v33 = vld [vmem:[%s8215_s7 + $0x858] sm:$0xff]  ;;  %v5046_v37 = vld [vmem:[%s8215_s7 + $0x840] sm:$0xff] }
 0x504   : > { %3961 = vmatpush.msra.mxu1 %v4996_v26  ;;  %4001 = vmatpush.msra.mxu0 %v4997_v41  ;;  %v5047_v26 = vld [vmem:[%s8215_s7 + $0x848] sm:$0xff]  ;;  %v5044_v41 = vld [vmem:[%s8215_s7 + $0x830] sm:$0xff] }
 0x505   : > { %4137 = vmatpush.msrb.mxu3 %v5082_v43  ;;  %4177 = vmatpush.msrb.mxu2 %v5083_v11  ;;  %v5045_v43 = vld [vmem:[%s8215_s7 + $0x838] sm:$0xff]  ;;  %v5042_v11 = vld [vmem:[%s8215_s7 + $0x820] sm:$0xff] }
 0x506   : > { %3962 = vmatpush.msra.mxu1 %v4994_v28  ;;  %4002 = vmatpush.msra.mxu0 %v4995_v6  ;;  %v5043_v28 = vld [vmem:[%s8215_s7 + $0x828] sm:$0xff]  ;;  %v5040_v6 = vld [vmem:[%s8215_s7 + $0x810] sm:$0xff] }
 0x507   : > { %4138 = vmatpush.msrb.mxu3 %v5080_v34  ;;  %4178 = vmatpush.msrb.mxu2 %v5081_v18  ;;  %v5041_v34 = vld [vmem:[%s8215_s7 + $0x818] sm:$0xff]  ;;  %v5038_v18 = vld [vmem:[%s8215_s7 + $0x800] sm:$0xff] }
 0x508   : > { %3963 = vmatpush.msra.mxu1 %v4992_v5  ;;  %4003 = vmatpush.msra.mxu0 %v4993_v25  ;;  %v5039_v5 = vld [vmem:[%s8215_s7 + $0x808] sm:$0xff]  ;;  %v4104_v25 = vrot.slane %v7544_v42, 4 }
 0x509   : > { %4139 = vmatpush.msrb.mxu3 %v5078_v27  ;;  %4179 = vmatpush.msrb.mxu2 %v5079_v24 }
 0x50a   : > { %3964 = vmatpush.msra.mxu1 %v4990_v36  ;;  %4004 = vmatpush.msra.mxu0 %v4991_v4 }
 0x50b   : > { %4140 = vmatpush.msrb.mxu3 %v5076_v55  ;;  %4180 = vmatpush.msrb.mxu2 %v5077_v60 }
 0x50c   : > { %3965 = vmatpush.msra.mxu1 %v4988_v53  ;;  %4005 = vmatpush.msra.mxu0 %v4989_v62 }
 0x50d   : > { %4141 = vmatpush.msrb.mxu3 %v5074_v0  ;;  %4181 = vmatpush.msrb.mxu2 %v5075_v9 }
 0x50e   : > { %3966 = vmatpush.msra.mxu1 %v4986_v10  ;;  %4006 = vmatpush.msra.mxu0 %v4987_v54 }
 0x50f   : > { %4142 = vmatpush.msrb.mxu3 %v5072_v59  ;;  %4182 = vmatpush.msrb.mxu2 %v5073_v14 }
 0x510   : > { %3967 = vmatpush.msra.mxu1 %v4984_v61  ;;  %4007 = vmatpush.msra.mxu0 %v4985_v23 }
 0x511   : > { %4143 = vmatpush.msrb.mxu3 %v5070_v51  ;;  %4183 = vmatpush.msrb.mxu2 %v5071_v39 }
 0x512   : > { %4144 = vmatmul.f32.vlgmr.msrb.gmra.mxu3 %v4105_v63  ;;  %4184 = vmatmul.f32.vlgmr.msrb.gmra.mxu2 %v4105_v63 }
 0x513   : > { %3968 = vmatpush.msra.mxu1 %v4982_v44  ;;  %4008 = vmatpush.msra.mxu0 %v4983_v52 }
 0x515   : > { %3969 = vmatpush.msra.mxu1 %v4980_v30  ;;  %4009 = vmatpush.msra.mxu0 %v4981_v12 }
 0x517   : > { %3970 = vmatpush.msra.mxu1 %v4978_v58  ;;  %4010 = vmatpush.msra.mxu0 %v4979_v56 }
 0x519   : > { %3971 = vmatpush.msra.mxu1 %v4976_v8  ;;  %4011 = vmatpush.msra.mxu0 %v4977_v21 }
 0x51b   : > { %3972 = vmatpush.msra.mxu1 %v4974_v57  ;;  %4012 = vmatpush.msra.mxu0 %v4975_v32  ;;  %v4190_v57 = vld [vmem:[%s8216_s8] sm:$0x3] }
 0x51c   : > { %3973 = vmatmul.f32.vlgmr.msra.gmra.mxu1 %v3953_v1  ;;  %4013 = vmatmul.f32.vlgmr.msra.gmra.mxu0 %v3953_v1 }
 0x51d   : > { %4108 = vmatpush.msrb.mxu1 %v5068_v35  ;;  %4148 = vmatpush.msrb.mxu0 %v5069_v15 }
 0x51f   : > { %4109 = vmatpush.msrb.mxu1 %v5066_v16  ;;  %4149 = vmatpush.msrb.mxu0 %v5067_v40 }
 0x521   : > { %4110 = vmatpush.msrb.mxu1 %v5064_v3  ;;  %4150 = vmatpush.msrb.mxu0 %v5065_v38  ;;  %v4192_v38 = vperm.slane %v4190_v57, 0 }
 0x523   : > { %4111 = vmatpush.msrb.mxu1 %v5062_v47  ;;  %4151 = vmatpush.msrb.mxu0 %v5063_v45  ;;  %v4193_v45 = vperm.slane %v4190_v57, 1  ;;  %v5110_v57 = vld [vmem:[%s8217_s9 + $0xc0] sm:$0xff] }
 0x525   : > { %4112 = vmatpush.msrb.mxu1 %v5060_v20  ;;  %4152 = vmatpush.msrb.mxu0 %v5061_v46 }
 0x527   : > { %4113 = vmatpush.msrb.mxu1 %v5058_v31  ;;  %4153 = vmatpush.msrb.mxu0 %v5059_v50 }
 0x529   : > { %4114 = vmatpush.msrb.mxu1 %v5056_v2  ;;  %4154 = vmatpush.msrb.mxu0 %v5057_v22 }
 0x52b   : > { %4115 = vmatpush.msrb.mxu1 %v5054_v19  ;;  %4155 = vmatpush.msrb.mxu0 %v5055_v13 }
 0x52d   : > { %4116 = vmatpush.msrb.mxu1 %v5052_v17  ;;  %4156 = vmatpush.msrb.mxu0 %v5053_v49 }
 0x52f   : > { %4117 = vmatpush.msrb.mxu1 %v5050_v29  ;;  %4157 = vmatpush.msrb.mxu0 %v5051_v48 }
 0x531   : > { %4118 = vmatpush.msrb.mxu1 %v5048_v7  ;;  %4158 = vmatpush.msrb.mxu0 %v5049_v33  ;;  %v3614_v27 = vpop.f32.mrf.mxu3  ;;  %v3654_v24 = vpop.f32.mrf.mxu2 }
 0x533   : > { %4119 = vmatpush.msrb.mxu1 %v5046_v37  ;;  %4159 = vmatpush.msrb.mxu0 %v5047_v26 }
 0x535   : > { %4120 = vmatpush.msrb.mxu1 %v5044_v41  ;;  %4160 = vmatpush.msrb.mxu0 %v5045_v43 }
 0x537   : > { %4121 = vmatpush.msrb.mxu1 %v5042_v11  ;;  %4161 = vmatpush.msrb.mxu0 %v5043_v28 }
 0x539   : > { %4122 = vmatpush.msrb.mxu1 %v5040_v6  ;;  %4162 = vmatpush.msrb.mxu0 %v5041_v34  ;;  %v3694_v55 = vpop.f32.mrf.mxu3  ;;  %v3734_v60 = vpop.f32.mrf.mxu2 }
 0x53b   : > { %4123 = vmatpush.msrb.mxu1 %v5038_v18  ;;  %4163 = vmatpush.msrb.mxu0 %v5039_v5 }
 0x53c   : > { %4124 = vmatmul.f32.vlgmr.msrb.gmra.mxu1 %v4104_v25  ;;  %4164 = vmatmul.f32.vlgmr.msrb.gmra.mxu0 %v4104_v25 }
 0x551   : > { %v3843_v0 = vpop.f32.mrf.mxu3  ;;  %v3883_v9 = vpop.f32.mrf.mxu2 }
 0x555   : > { %v3594_v36 = vpop.f32.mrf.mxu1  ;;  %v3634_v4 = vpop.f32.mrf.mxu0 }
 0x556   : > { %v3615_v59 = vadd.f32 %v3614_v27, %v3594_v36  ;;  %v3655_v14 = vadd.f32 %v3654_v24, %v3634_v4 }
 0x55e   : > { %v3674_v53 = vpop.f32.mrf.mxu1  ;;  %v3714_v62 = vpop.f32.mrf.mxu0 }
 0x55f   : > { %v3675_v23 = vadd.f32 %v3674_v53, %v3615_v59  ;;  %v3715_v51 = vadd.f32 %v3714_v62, %v3655_v14  ;;  %v4266_v14 = vld [vmem:[%s8217_s9 + $0x78] sm:$0xff] }
 0x560   : > { %4267 = vmatpush.msra.mxu1 %v4266_v14 }
 0x561   : > { %v3695_v30 = vadd.f32 %v3694_v55, %v3675_v23  ;;  %v3735_v12 = vadd.f32 %v3734_v60, %v3715_v51  ;;  %v5116_v23 = vld [vmem:[%s8217_s9 + $0xf0] sm:$0xff]  ;;  %v4264_v51 = vld [vmem:[%s8217_s9 + $0x68] sm:$0xff] }
 0x573   : > { %v3994_v61 = vpop.f32.mrf.mxu3  ;;  %v4034_v42 = vpop.f32.mrf.mxu2 }
 0x578   : > { %v3823_v10 = vpop.f32.mrf.mxu1  ;;  %v3863_v54 = vpop.f32.mrf.mxu0 }
 0x579   : > { %v3844_v44 = vadd.f32 %v3843_v0, %v3823_v10  ;;  %v3884_v52 = vadd.f32 %v3883_v9, %v3863_v54 }
 0x57b   : > { %v3886_v8 = vadd.f32 %v3844_v44, %v3695_v30  ;;  %v3887_v21 = vadd.f32 %v3884_v52, %v3735_v12  ;;  %v5114_v44 = vld [vmem:[%s8217_s9 + $0xe0] sm:$0xff]  ;;  %v4262_v52 = vld [vmem:[%s8217_s9 + $0x58] sm:$0xff]  ;;  %v4261_v12 = vld [vmem:[%s8217_s9 + $0x50] sm:$0xff] }
 0x57c   : > { %v5113_v30 = vld [vmem:[%s8217_s9 + $0xd8] sm:$0xff] }
 0x595   : > { %v4145_v32 = vpop.f32.mrf.mxu3  ;;  %v4185_v1 = vpop.f32.mrf.mxu2 }
 0x599   : > { %v3974_v39 = vpop.f32.mrf.mxu1  ;;  %v4014_v63 = vpop.f32.mrf.mxu0 }
 0x59a   : > { %v3995_v58 = vadd.f32 %v3994_v61, %v3974_v39  ;;  %v4035_v56 = vadd.f32 %v4034_v42, %v4014_v63  ;;  %v4265_v61 = vld [vmem:[%s8217_s9 + $0x70] sm:$0xff]  ;;  %v5117_v42 = vld [vmem:[%s8217_s9 + $0xf8] sm:$0xff]  ;;  %v5115_v39 = vld [vmem:[%s8217_s9 + $0xe8] sm:$0xff] }
 0x59b   : > { %4308 = vmatpush.msra.mxu3 %v5117_v42  ;;  %4268 = vmatpush.msra.mxu1 %v4265_v61  ;;  %v4263_v63 = vld [vmem:[%s8217_s9 + $0x60] sm:$0xff] }
 0x59c   : > { %v4037_v35 = vadd.f32 %v3995_v58, %v3886_v8  ;;  %v4038_v15 = vadd.f32 %v4035_v56, %v3887_v21  ;;  %v5112_v58 = vld [vmem:[%s8217_s9 + $0xd0] sm:$0xff]  ;;  %v4260_v56 = vld [vmem:[%s8217_s9 + $0x48] sm:$0xff]  ;;  %v4259_v21 = vld [vmem:[%s8217_s9 + $0x40] sm:$0xff] }
 0x59d   : > { %4309 = vmatpush.msra.mxu3 %v5116_v23  ;;  %4269 = vmatpush.msra.mxu1 %v4264_v51  ;;  %v5111_v8 = vld [vmem:[%s8217_s9 + $0xc8] sm:$0xff]  ;;  %v4398_v42 = vld [vmem:[%s8223_s15] sm:$0xff] }
 0x59e   : > { %v4371_v23 = vld [vmem:[%s8222_s14] sm:$0x1] }
 0x59f   : > { %4310 = vmatpush.msra.mxu3 %v5115_v39  ;;  %4270 = vmatpush.msra.mxu1 %v4263_v63 }
 0x5a1   : > { %4311 = vmatpush.msra.mxu3 %v5114_v44  ;;  %4271 = vmatpush.msra.mxu1 %v4262_v52  ;;  %v4400_v52 = vld [vmem:[%s8224_s16] sm:$0x1] }
 0x5a3   : > { %4312 = vmatpush.msra.mxu3 %v5113_v30  ;;  %4272 = vmatpush.msra.mxu1 %v4261_v12 }
 0x5a5   : > { %4313 = vmatpush.msra.mxu3 %v5112_v58  ;;  %4273 = vmatpush.msra.mxu1 %v4260_v56 }
 0x5a7   : > { %4314 = vmatpush.msra.mxu3 %v5111_v8  ;;  %4274 = vmatpush.msra.mxu1 %v4259_v21 }
 0x5a9   : > { %4315 = vmatpush.msra.mxu3 %v5110_v57 }
 0x5b9   : > { %v4125_v16 = vpop.f32.mrf.mxu1  ;;  %v4165_v40 = vpop.f32.mrf.mxu0 }
 0x5ba   : > { %v4146_v3 = vadd.f32 %v4145_v32, %v4125_v16  ;;  %v4186_v47 = vadd.f32 %v4185_v1, %v4165_v40  ;;  %v4258_v32 = vld [vmem:[%s8217_s9 + $0x38] sm:$0xff]  ;;  %v4256_v16 = vld [vmem:[%s8217_s9 + $0x28] sm:$0xff] }
 0x5bb   : > { %v5109_v1 = vld [vmem:[%s8217_s9 + $0xb8] sm:$0xff]  ;;  %4275 = vmatpush.msra.mxu1 %v4258_v32  ;;  %v5107_v40 = vld [vmem:[%s8217_s9 + $0xa8] sm:$0xff] }
 0x5bc   : > { %v4188_v20 = vadd.f32 %v4146_v3, %v4037_v35  ;;  %v4189_v46 = vadd.f32 %v4186_v47, %v4038_v15  ;;  %v4257_v35 = vld [vmem:[%s8217_s9 + $0x30] sm:$0xff]  ;;  %4316 = vmatpush.msra.mxu3 %v5109_v1  ;;  %v4255_v3 = vld [vmem:[%s8217_s9 + $0x20] sm:$0xff]  ;;  %v4254_v47 = vld [vmem:[%s8217_s9 + $0x18] sm:$0xff] }
 0x5bd   : > { %v5108_v15 = vld [vmem:[%s8217_s9 + $0xb0] sm:$0xff]  ;;  %4276 = vmatpush.msra.mxu1 %v4257_v35 }
 0x5be   : > { %v4196_v31 = vadd.f32 %v4192_v38, %v4188_v20  ;;  %v4197_v50 = vadd.f32 %v4193_v45, %v4189_v46  ;;  %4317 = vmatpush.msra.mxu3 %v5108_v15  ;;  %v5106_v38 = vld [vmem:[%s8217_s9 + $0xa0] sm:$0xff] }
 0x5bf   : > { %4277 = vmatpush.msra.mxu1 %v4256_v16 }
 0x5c0   : > { %vm4198_vm15 = vcmp.ge.f32.partialorder %v4196_v31, 0.0  ;;  %v4200_v2 = vmul.f32 0.01, %v4196_v31  ;;  %vm4199_vm0 = vcmp.ge.f32.partialorder %v4197_v50, 0.0  ;;  %v4201_v22 = vmul.f32 0.01, %v4197_v50  ;;  %4318 = vmatpush.msra.mxu3 %v5107_v40 }
 0x5c1   : > { %4278 = vmatpush.msra.mxu1 %v4255_v3 }
 0x5c2   : > { %v4202_v19 = vsel %vm4198_vm15, %v4196_v31, %v4200_v2  ;;  %v4203_v13 = vsel %vm4199_vm0, %v4197_v50, %v4201_v22  ;;  %4319 = vmatpush.msra.mxu3 %v5106_v38  ;;  %v4253_v31 = vld [vmem:[%s8217_s9 + $0x10] sm:$0xff]  ;;  %v5105_v50 = vld [vmem:[%s8217_s9 + $0x98] sm:$0xff]  ;;  %v4252_v2 = vld [vmem:[%s8217_s9 + $0x8] sm:$0xff] }
 0x5c3   : > { %v4204_v17 = vsel %vm1644_vm6, %v4202_v19, -inf  ;;  %v4219_v49 = vsel %vm4218_vm3, %v4202_v19, -inf  ;;  %v4211_v29 = vsel %vm1644_vm6, %v4203_v13, -inf  ;;  %v4226_v48 = vsel %vm4218_vm3, %v4203_v13, -inf  ;;  %4279 = vmatpush.msra.mxu1 %v4254_v47  ;;  %v5104_v22 = vld [vmem:[%s8217_s9 + $0x90] sm:$0xff]  ;;  %v4251_v19 = vld [vmem:[%s8217_s9] sm:$0xff] }
 0x5c4   : > { %v4205_v7 = vrot.slane %v4204_v17, 4  ;;  %v4220_v33 = vrot.slane %v4219_v49, 4  ;;  %v4212_v37 = vrot.slane %v4211_v29, 4  ;;  %v4227_v26 = vrot.slane %v4226_v48, 4  ;;  %4320 = vmatpush.msra.mxu3 %v5105_v50  ;;  %v5103_v13 = vld [vmem:[%s8217_s9 + $0x88] sm:$0xff] }
 0x5c5   : > { %4280 = vmatpush.msra.mxu1 %v4253_v31 }
 0x5c6   : > { %v4206_v41 = vmax.f32 %v4204_v17, %v4205_v7  ;;  %v4221_v43 = vmax.f32 %v4219_v49, %v4220_v33  ;;  %v4213_v11 = vmax.f32 %v4211_v29, %v4212_v37  ;;  %v4228_v28 = vmax.f32 %v4226_v48, %v4227_v26  ;;  %4321 = vmatpush.msra.mxu3 %v5104_v22  ;;  %v5102_v17 = vld [vmem:[%s8217_s9 + $0x80] sm:$0xff]  ;;  %v4339_v49 = vld [vmem:[%s8219_s11 + $0x38] sm:$0xff] }
 0x5c7   : > { %4281 = vmatpush.msra.mxu1 %v4252_v2  ;;  %4352 = vmatpush.msra.mxu0 %v4339_v49 }
 0x5c8   : > { %v4214_v6 = vrot.slane %v4213_v11, 2  ;;  %v4229_v34 = vrot.slane %v4228_v28, 2  ;;  %v4207_v18 = vrot.slane %v4206_v41, 2  ;;  %v4222_v5 = vrot.slane %v4221_v43, 2  ;;  %4322 = vmatpush.msra.mxu3 %v5103_v13 }
 0x5c9   : > { %4282 = vmatpush.msra.mxu1 %v4251_v19 }
 0x5ca   : > { %v4215_v25 = vmax.f32 %v4213_v11, %v4214_v6  ;;  %v4230_v27 = vmax.f32 %v4228_v28, %v4229_v34  ;;  %v4208_v24 = vmax.f32 %v4206_v41, %v4207_v18  ;;  %v4223_v36 = vmax.f32 %v4221_v43, %v4222_v5  ;;  %4323 = vmatpush.msra.mxu3 %v5102_v17  ;;  %v4338_v41 = vld [vmem:[%s8219_s11 + $0x30] sm:$0xff]  ;;  %v4337_v43 = vld [vmem:[%s8219_s11 + $0x28] sm:$0xff]  ;;  %v4336_v11 = vld [vmem:[%s8219_s11 + $0x20] sm:$0xff] }
 0x5cb   : > { %4353 = vmatpush.msra.mxu0 %v4338_v41  ;;  %v4335_v28 = vld [vmem:[%s8219_s11 + $0x18] sm:$0xff]  ;;  %v4334_v6 = vld [vmem:[%s8219_s11 + $0x10] sm:$0xff]  ;;  %v4333_v34 = vld [vmem:[%s8219_s11 + $0x8] sm:$0xff] }
 0x5cc   : > { %v4216_v4 = vrot.slane %v4215_v25, 1  ;;  %v4231_v55 = vrot.slane %v4230_v27, 1  ;;  %v4209_v60 = vrot.slane %v4208_v24, 1  ;;  %v4224_v53 = vrot.slane %v4223_v36, 1  ;;  %v4332_v18 = vld [vmem:[%s8219_s11] sm:$0xff]  ;;  %v4370_v5 = vld [vmem:[%s8221_s13 + $0x18] sm:$0xff] }
 0x5cd   : > { %4354 = vmatpush.msra.mxu0 %v4337_v43  ;;  %4387 = vmatpush.msra.mxu2 %v4370_v5 }
 0x5ce   : > { %v4217_v62 = vmax.f32 %v4215_v25, %v4216_v4  ;;  %v4232_v0 = vmax.f32 %v4230_v27, %v4231_v55  ;;  %v4210_v9 = vmax.f32 %v4208_v24, %v4209_v60  ;;  %v4225_v10 = vmax.f32 %v4223_v36, %v4224_v53  ;;  %v4250_v25 = vld [vmem:[%s8218_s10] sm:$0x1]  ;;  %v4369_v53 = vld [vmem:[%s8221_s13 + $0x10] sm:$0xff] }
 0x5cf   : > { %4355 = vmatpush.msra.mxu0 %v4336_v11  ;;  %4388 = vmatpush.msra.mxu2 %v4369_v53 }
 0x5d0   : > { %v4234_v54 = vsel %vm1827_vm7, %v4217_v62, %v4232_v0  ;;  %v8017_v59 = vsel %vm1827_vm7, %v4210_v9, %v4225_v10  ;;  %v4368_v62 = vld [vmem:[%s8221_s13 + $0x8] sm:$0xff]  ;;  %v4367_v0 = vld [vmem:[%s8221_s13] sm:$0xff] }
 0x5d1   : > { %4241 = vrot.lane.b32.xlu1 %v4234_v54, %s5288_s27  ;;  %4356 = vmatpush.msra.mxu0 %v4335_v28  ;;  %v4399_v9 = vld [vmem:[%s8223_s15 + $0x8] sm:$0xff]  ;;  %v4340_v10 = vld [vmem:[%s8220_s12] sm:$0x1] }
 0x5d2   : > { %4389 = vmatpush.msra.mxu2 %v4368_v62 }
 0x5d3   : > { %4357 = vmatpush.msra.mxu0 %v4334_v6 }
 0x5d4   : > { %4390 = vmatpush.msra.mxu2 %v4367_v0 }
 0x5d5   : > { %4358 = vmatpush.msra.mxu0 %v4333_v34 }
 0x5d6   : > { %4419 = vmatpush.msrb.mxu2 %v4399_v9 }
 0x5d7   : > { %4359 = vmatpush.msra.mxu0 %v4332_v18 }
 0x5d8   : > { %4420 = vmatpush.msrb.mxu2 %v4398_v42 }
 0x643   : > { %v4242_v45 = vpop.permute.xlu1 %4241 }
 0x644   : > { %v4244_v20 = vmax.f32 %v4234_v54, %v4242_v45 }
 0x646   : > { %v5179_v46 = vpack.i.bf16 %v4244_v20, %v8017_v59 }
 0x648   : > { %5180 = vrot.lane.b32.xlu2 %v5179_v46, %s5288_s27  ;;  %s5232_s27 = scalar_lea.hbm %s5231_s26, 1 }
 0x649   : > { %p5233_p0 = scmp.ne.s32.totalorder %s5231_s26, %s5232_s27  ;;  %p5238_p4 = scmp.lt.s32.totalorder %s5236_s20, %s5232_s27 }
 0x64b   : > { %p5234_p1 = pnand %p5233_p0, %p5418_p5  ;;  %p5239_p7 = por %p5238_p4, %p5237_p3 }
 0x64d   : > { %p5235_p2 = pneg %p5234_p1 }
 0x64f   : > { %p5240_p8 = pnand %p5239_p7, %p5235_p2 }
 0x6a2   : > { %v5181_v29 = vpop.permute.xlu2 %5180 }
 0x6a3   : > { %v5182_v48 = vunpack.i.l.bf16 %v5181_v29  ;;  %v5183_v7 = vunpack.i.h.bf16 %v5181_v29 }
 0x6a5   : > { %v4239_v33 = vmax.f32 %v8017_v59, %v5182_v48 }
 0x6a7   : > { %v4249_v37 = vsel %vm2585_vm1, %v4239_v33, %v5183_v7 }
 0x6a8   : > { %v4306_v26 = vrot.slane %v4249_v37, 1  ;;  %4283 = vmatmul.f32.vlgmr.msra.gmra.mxu1 %v4249_v37 }
 0x6aa   : > { %4324 = vmatmul.f32.vlgmr.msra.gmra.mxu3 %v4306_v26 }
 0x725   : > { %v4284_v27 = vpop.f32.mrf.mxu1 }
 0x726   : > { %v4287_v24 = vadd.f32 %v4284_v27, %v4250_v25 }
 0x72d   : > { %v4325_v36 = vpop.f32.mrf.mxu3 }
 0x72e   : > { %v4328_v4 = vadd.f32 %v4325_v36, %v4287_v24 }
 0x730   : > { %vm4329_vm6 = vcmp.ge.f32.partialorder %v4328_v4, 0.0  ;;  %v4330_v55 = vmul.f32 0.01, %v4328_v4 }
 0x732   : > { %v4331_v60 = vsel %vm4329_vm6, %v4328_v4, %v4330_v55 }
 0x733   : > { %5118 = vmatmul.msk.f32.vlgmr.msra.gmra.mxu0 %vm2585_vm1, %v4331_v60 }
 0x7b0   : > { %v4361_v54 = vpop.f32.mrf.mxu0 }
 0x7b1   : > { %v4362_v59 = vadd.f32 %v4361_v54, %v4340_v10 }
 0x7b3   : > { %vm4364_vm7 = vcmp.ge.f32.partialorder %v4362_v59, 0.0  ;;  %v4365_v14 = vmul.f32 0.01, %v4362_v59 }
 0x7b5   : > { %v4366_v61 = vsel %vm4364_vm7, %v4362_v59, %v4365_v14 }
 0x7b6   : > { %5119 = vmatmul.msk.f32.vlgmr.msra.gmra.mxu2 %vm3429_vm5, %v4366_v61 }
 0x839   : > { %v4392_v51 = vpop.f32.mrf.mxu2 }
 0x83a   : > { %v4393_v39 = vadd.f32 %v4392_v51, %v4371_v23 }
 0x83c   : > { %vm4395_vm1 = vcmp.ge.f32.partialorder %v4393_v39, 0.0  ;;  %v4396_v63 = vmul.f32 0.01, %v4393_v39 }
 0x83e   : > { %v4397_v44 = vsel %vm4395_vm1, %v4393_v39, %v4396_v63 }
 0x83f   : > { %5120 = vmatmul.msk.f32.vlgmr.msrb.gmra.mxu2 %vm4401_vm4, %v4397_v44 }
 0x8c2   : > { %v4422_v30 = vpop.f32.mrf.mxu2 }
 0x8c3   : > { %v4423_v12 = vadd.f32 %v4422_v30, %v4400_v52 }
 0x8c5   : > { %4426 = vst.msk [vmem:[%s557_s18] sm:$0x1] %vm4425_vm2, %v4423_v12 }
 0x8c6   : > { %5243 = shalt.err (!%p5240_p8)
}
 0x8c7   : > { %5128 = dma.vmem_to_hbm [thread:$0]  (%p5418_p5), %s4439_s21, 16, %s4441_s5, %s4428_s22  }
 0x8c8 PF: > { %s8345_s1 = sld [smem:[#allocation10_spill]] }
 0x8c9   : > { %s8346_s23 = sld [smem:[#allocation8_spill]] }
 0x8ce   : > { %p5140_p9 = scmp.ge.s32.totalorder %s8345_s1, 2 }
 0x8cf   : > { %s4452_s0 = sand.u32 1, %s8346_s23  }
 0x8d0   : > { %p5135_p10 = pnand %p5140_p9, %p5422_p6  ;;  %s4453_s28 = scalar_lea.sflag [#allocation4], %s4452_s0 }
 0x8d2   : > { %p5136_p11 = pneg %p5135_p10 }
 0x8d4   : > { %5265 = dma.done.wait (%p5136_p11), %s4453_s28, 16  }
 0x8d5   : > { %5267 = vsyncadd (%p5136_p11), %s4453_s28, 4294967280  ;;  %s8348_s27 = sld [smem:[#allocation11_spill]]  ;;  %s8351_s24 = smov %s5274_s25 }
 0x8d6   : > { %s8349_s26 = sld [smem:[#allocation9_spill]] }
 0x8d7   : > { %s8350_s20 = sld [smem:[#allocation12_spill]] }
 0x8db   : > { %p28_p12 = scmp.ge.s32.totalorder %s8348_s27, 4  }
 0x8dc   : > { %s8352_s25 = smov %s8349_s26 }
 0x8dd   : > { %s8353_s26 = smov %s8350_s20  ;;  %30 = sbr.rel (!%p28_p12) target bundleno = 8 (0x8), region = 145 }
 0x8e2   :  { %4458 = vsyncpa [#allocation3], 1 }
 0x8e3   :  { %4460 = vsyncpa [#allocation3 + $0x1], 1 }
 0x8e4   :  { %4461 = vsyncpa [#allocation4], 1 }
 0x8e5   :  { %4463 = vsyncpa [#allocation4 + $0x1], 1 }

</bundles_post_ra>
